<compile_context>
chip_gen: v7x
topology: tpu7x:2x2x1
jax: 0.10.0
libtpu: 0.0.40
codegen_flags: <defaults>
</compile_context>

<pallas_src>
import jax
import jax.numpy as jnp
from jax.experimental import pallas as pl
from jax.experimental.pallas import tpu as pltpu

EPS = 1e-5
LANES = 128                 # TPU lane width; channel dims are padded up to this
MXU_DTYPE = jnp.bfloat16    # matmul input dtype (accumulation stays f32)
OUT_DTYPE = jnp.bfloat16    # kernel store dtype (wrapper casts back to f32)
GELU_APPROX = True          # tanh GELU (EUP); nn.GELU() default erf differs <~1e-3


def _round_up(n, m=LANES):
    return ((n + m - 1) // m) * m


# ------------------------------------------------------------------ kernel ---
def conv_block_kernel(x_ref, w1_ref, s1_ref, b1_ref, w2_ref, s2_ref, b2_ref,
                      o_ref):
    """Fused (Conv3x3 -> BN -> GELU) x 2 for one NHWC image, lane-dense layout.

    x_ref  : (1, H, W, CI)   bf16 input tile (CI = in channels padded to 128)
    w*_ref : (CI, 9*CO)      bf16 weights, column = (kh*3 + kw)*CO + cout
    s*/b*  : (1, CO)         f32 folded BN scale / bias (conv bias included)
    o_ref  : (1, H, W, CO)   bf16 output tile (CO = out channels padded to 128)
    """
    _, H, W, CO = o_ref.shape
    CI = x_ref.shape[3]
    HW = H * W

    # Boundary masks for the virtual SAME padding, built once from a 2-D iota
    # (no integer % W); (HW, 1) bools are widened by broadcasting in jnp.where.
    r = jax.lax.broadcasted_iota(jnp.int32, (H, W, 1), 0).reshape(HW, 1)
    c = jax.lax.broadcasted_iota(jnp.int32, (H, W, 1), 1).reshape(HW, 1)
    not_top, not_bot = r != 0, r != H - 1
    not_left, not_right = c != 0, c != W - 1
    tap_mask = {
        (0, 0): not_top & not_left, (0, 1): not_top, (0, 2): not_top & not_right,
        (1, 0): not_left,                            (1, 2): not_right,
        (2, 0): not_bot & not_left, (2, 1): not_bot, (2, 2): not_bot & not_right,
    }

    def conv3x3(inp, w_ref):
        # inp: (HW, CI) bf16 -> (HW, CO) f32, SAME padding.
        # One MXU matmul produces all 9 kernel-tap partial sums side by side on
        # the lane axis; taps are aligned to the output pixel by rolling the
        # result +-W/+-1 rows (XLU, otherwise idle) and masking the wrapped
        # first/last rows/columns (virtual zero padding).
        s = jnp.dot(inp, w_ref[...], preferred_element_type=jnp.float32)
        out = s[:, 4 * CO:5 * CO]                      # centre tap (kh=1, kw=1)
        for kh in range(3):
            for kw in range(3):
                if kh == 1 and kw == 1:
                    continue
                t = (kh * 3 + kw) * CO                 # 128-aligned lane slice
                shift = (-((kh - 1) * W + (kw - 1))) % HW
                rolled = pltpu.roll(s[:, t:t + CO], shift, axis=0)
                out = out + jnp.where(tap_mask[(kh, kw)], rolled, 0.0)
        return out

    x = x_ref[0].reshape(HW, CI)          # zero-copy (W is sublane aligned)

    y = conv3x3(x, w1_ref)
    y = jax.nn.gelu(y * s1_ref[...] + b1_ref[...], approximate=GELU_APPROX)

    y = conv3x3(y.astype(MXU_DTYPE), w2_ref)
    y = jax.nn.gelu(y * s2_ref[...] + b2_ref[...], approximate=GELU_APPROX)

    # TODO(synk): Dropout2d(p_drop) for p_drop > 0 (training mode) not
    # implemented; with p_drop = 0.0 the PyTorch module uses nn.Identity.
    o_ref[0] = y.reshape(H, W, CO).astype(o_ref.dtype)


# ----------------------------------------------------------------- wrapper ---
def _vmem_limit_bytes(H, W, ci_p, co_p):
    """Size the VMEM limit from the actual tile footprint, capped per chip."""
    tile_in = H * W * ci_p * 2                    # bf16 input tile
    tile_out = H * W * co_p * 2                   # bf16 output tile
    weights = 2 * ci_p * 9 * co_p * 2             # both convs, bf16
    interm = H * W * 9 * co_p * 4 + 2 * H * W * co_p * 4   # f32 taps + accum
    est = 2 * (tile_in + tile_out) + 2 * weights + 2 * interm
    try:
        cap = int(0.85 * pltpu.get_tpu_info().vmem_capacity_bytes)
    except Exception:
        cap = 56 * 1024 * 1024                    # safe even on v7x (64 MiB)
    return min(cap, max(16 * 1024 * 1024, 2 * est))


def conv_block_forward(x_nchw, kernel_params, out_c):
    """NCHW f32 input -> fused Pallas kernel (lane-dense NHWC) -> NCHW f32."""
    w1r, s1, b1, w2r, s2, b2 = kernel_params
    ci, co = w1r.shape[0], s1.shape[1]            # padded channel widths
    N, cin, H, W = x_nchw.shape
    # Keep the in-kernel (H,W,C)<->(HW,C) reshapes zero-copy.
    assert W % 8 == 0, "W must be a multiple of 8 (pad W in the wrapper otherwise)"

    # Single fused XLA pass: NCHW -> NHWC, channel zero-pad to 128 lanes, bf16.
    x = jnp.pad(jnp.transpose(x_nchw, (0, 2, 3, 1)),
                ((0, 0), (0, 0), (0, 0), (0, ci - cin))).astype(MXU_DTYPE)

    out = pl.pallas_call(
        conv_block_kernel,
        out_shape=jax.ShapeDtypeStruct((N, H, W, co), OUT_DTYPE),
        grid_spec=pltpu.PrefetchScalarGridSpec(
            num_scalar_prefetch=0,
            grid=(N,),     # parallel over batch: keeps both v7x TCs busy
            in_specs=[
                pl.BlockSpec((1, H, W, ci), lambda n: (n, 0, 0, 0)),
                pl.BlockSpec(w1r.shape, lambda n: (0, 0)),
                pl.BlockSpec(s1.shape, lambda n: (0, 0)),
                pl.BlockSpec(b1.shape, lambda n: (0, 0)),
                pl.BlockSpec(w2r.shape, lambda n: (0, 0)),
                pl.BlockSpec(s2.shape, lambda n: (0, 0)),
                pl.BlockSpec(b2.shape, lambda n: (0, 0)),
            ],
            out_specs=pl.BlockSpec((1, H, W, co), lambda n: (n, 0, 0, 0)),
        ),
        compiler_params=pltpu.CompilerParams(
            dimension_semantics=("parallel",),
            vmem_limit_bytes=_vmem_limit_bytes(H, W, ci, co),
        ),
    )(x, w1r, s1, b1, w2r, s2, b2)

    # Slice off padded lanes, back to the module's NCHW f32 interface (fused).
    return jnp.transpose(out[..., :out_c], (0, 3, 1, 2)).astype(jnp.float32)


# ------------------------------------------------------------ param packing ---
def _fold_bn(conv_b, gamma, beta, mean, var):
    scale = gamma / jnp.sqrt(var + EPS)
    return scale, (conv_b - mean) * scale + beta


def _pack_weight(w_hwio, ci_p, co_p):
    """(3,3,cin,cout) HWIO -> (ci_p, 9*co_p) bf16 RHS; column = (kh*3+kw)*co_p+co."""
    kh, kw, cin, cout = w_hwio.shape
    wp = jnp.zeros((kh, kw, ci_p, co_p), jnp.float32)
    wp = wp.at[:, :, :cin, :cout].set(w_hwio)
    return jnp.transpose(wp, (2, 0, 1, 3)).reshape(ci_p, kh * kw * co_p).astype(MXU_DTYPE)


def _pad_vec(v, co_p):
    return jnp.zeros((1, co_p), jnp.float32).at[0, :v.shape[0]].set(v)


def init_params(key, in_c, out_c):
    """Deterministic synthetic parameters (same shapes as the torch module)."""
    ks = jax.random.split(key, 12)
    # conv1 / bn1
    w1 = 0.2 * jax.random.normal(ks[0], (3, 3, in_c, out_c), jnp.float32)   # HWIO
    cb1 = 0.05 * jax.random.normal(ks[1], (out_c,), jnp.float32)
    g1 = 1.0 + 0.1 * jax.random.normal(ks[2], (out_c,), jnp.float32)
    be1 = 0.1 * jax.random.normal(ks[3], (out_c,), jnp.float32)
    rm1 = 0.1 * jax.random.normal(ks[4], (out_c,), jnp.float32)
    rv1 = 1.0 + 0.1 * jnp.abs(jax.random.normal(ks[5], (out_c,), jnp.float32))
    # conv2 / bn2
    w2 = 0.2 * jax.random.normal(ks[6], (3, 3, out_c, out_c), jnp.float32)
    cb2 = 0.05 * jax.random.normal(ks[7], (out_c,), jnp.float32)
    g2 = 1.0 + 0.1 * jax.random.normal(ks[8], (out_c,), jnp.float32)
    be2 = 0.1 * jax.random.normal(ks[9], (out_c,), jnp.float32)
    rm2 = 0.1 * jax.random.normal(ks[10], (out_c,), jnp.float32)
    rv2 = 1.0 + 0.1 * jnp.abs(jax.random.normal(ks[11], (out_c,), jnp.float32))

    raw = (w1, cb1, g1, be1, rm1, rv1, w2, cb2, g2, be2, rm2, rv2)

    # Fold BN (eval mode) + conv bias, pad to lane-dense widths, pack weights.
    ci_p, co_p = _round_up(in_c), _round_up(out_c)
    s1, b1 = _fold_bn(cb1, g1, be1, rm1, rv1)
    s2, b2 = _fold_bn(cb2, g2, be2, rm2, rv2)
    kernel_params = (_pack_weight(w1, ci_p, co_p), _pad_vec(s1, co_p), _pad_vec(b1, co_p),
                     _pack_weight(w2, co_p, co_p), _pad_vec(s2, co_p), _pad_vec(b2, co_p))
    return kernel_params, raw


# --------------------------------------------------------------- reference ---
def reference_forward(x_nchw, raw, mxu_dtype=None):
    """Pure-JAX reference mirroring the PyTorch forward (eval-mode BN).

    Uses the same tanh-GELU as the kernel (nn.GELU() default is exact erf;
    the tanh form deviates by <~1e-3 and keeps the transcendental on the EUP).
    If mxu_dtype is given, conv inputs/weights are rounded to it (as the kernel
    does for the MXU); accumulation, BN and GELU stay in f32 on both sides.
    """
    (w1, cb1, g1, be1, rm1, rv1, w2, cb2, g2, be2, rm2, rv2) = raw
    rnd = ((lambda a: a.astype(mxu_dtype).astype(jnp.float32))
           if mxu_dtype is not None else (lambda a: a))
    dn = ('NHWC', 'HWIO', 'NHWC')
    x = jnp.transpose(x_nchw, (0, 2, 3, 1)).astype(jnp.float32)

    y = jax.lax.conv_general_dilated(rnd(x), rnd(w1), (1, 1), 'SAME',
                                     dimension_numbers=dn,
                                     precision=jax.lax.Precision.HIGHEST) + cb1
    y = (y - rm1) / jnp.sqrt(rv1 + EPS) * g1 + be1
    y = jax.nn.gelu(y, approximate=GELU_APPROX)

    y = jax.lax.conv_general_dilated(rnd(y), rnd(w2), (1, 1), 'SAME',
                                     dimension_numbers=dn,
                                     precision=jax.lax.Precision.HIGHEST) + cb2
    y = (y - rm2) / jnp.sqrt(rv2 + EPS) * g2 + be2
    y = jax.nn.gelu(y, approximate=GELU_APPROX)
    return jnp.transpose(y, (0, 3, 1, 2))


if __name__ == "__main__":
    key = jax.random.PRNGKey(0)
    k_x, k_p = jax.random.split(key)

    N, IN_C, OUT_C, H, W = 2, 4, 8, 16, 16
    x = jax.random.normal(k_x, (N, IN_C, H, W), jnp.float32)       # NCHW, like torch

    kernel_params, raw_params = init_params(k_p, IN_C, OUT_C)

    y = jax.block_until_ready(conv_block_forward(x, kernel_params, OUT_C))
    assert y.shape == (N, OUT_C, H, W)

    # Reference applies the same bf16 rounding to the conv inputs/weights the
    # kernel feeds the MXU, and its output is rounded through bf16 to mirror
    # the kernel's bf16 store; tolerance covers 1-ulp bf16 rounding deltas.
    y_ref = reference_forward(x, raw_params, MXU_DTYPE)
    y_ref = jax.block_until_ready(y_ref.astype(OUT_DTYPE).astype(jnp.float32))
    assert jnp.allclose(y, y_ref, atol=1e-2, rtol=1e-2), "mismatch vs reference"

    print("KERNEL_OK")
</pallas_src>

<mosaic_0001>
module attributes {stable_mosaic.version = 11 : i64} {
  func.func @conv_block_kernel(%arg0: i32, %arg1: memref<1x16x16x128xbf16, #tpu.memory_space<vmem>>, %arg2: memref<128x1152xbf16, #tpu.memory_space<vmem>>, %arg3: memref<1x128xf32, #tpu.memory_space<vmem>>, %arg4: memref<1x128xf32, #tpu.memory_space<vmem>>, %arg5: memref<128x1152xbf16, #tpu.memory_space<vmem>>, %arg6: memref<1x128xf32, #tpu.memory_space<vmem>>, %arg7: memref<1x128xf32, #tpu.memory_space<vmem>>, %arg8: memref<1x16x16x128xbf16, #tpu.memory_space<vmem>>) attributes {dimension_semantics = [#tpu.dimension_semantics<parallel>], iteration_bounds = array<i64: 2>, scalar_prefetch = 0 : i64, scratch_operands = 0 : i64, tpu.core_type = #tpu.core_type<tc>, window_params = [{transform_indices = @transform_0, window_bounds = array<i64: 1, 16, 16, 128>}, {pipeline_mode = #tpu.pipeline_mode<synchronous>, transform_indices = @transform_1, window_bounds = array<i64: 128, 1152>}, {pipeline_mode = #tpu.pipeline_mode<synchronous>, transform_indices = @transform_2, window_bounds = array<i64: 1, 128>}, {pipeline_mode = #tpu.pipeline_mode<synchronous>, transform_indices = @transform_3, window_bounds = array<i64: 1, 128>}, {pipeline_mode = #tpu.pipeline_mode<synchronous>, transform_indices = @transform_4, window_bounds = array<i64: 128, 1152>}, {pipeline_mode = #tpu.pipeline_mode<synchronous>, transform_indices = @transform_5, window_bounds = array<i64: 1, 128>}, {pipeline_mode = #tpu.pipeline_mode<synchronous>, transform_indices = @transform_6, window_bounds = array<i64: 1, 128>}, {transform_indices = @transform_7, window_bounds = array<i64: 1, 16, 16, 128>}]} {
    %0 = tpu.iota {dimensions = array<i32: 0>} : vector<16x16x1xi32>
    %1 = vector.shape_cast %0 : vector<16x16x1xi32> to vector<256x1xi32>
    %2 = tpu.iota {dimensions = array<i32: 1>} : vector<16x16x1xi32>
    %3 = vector.shape_cast %2 : vector<16x16x1xi32> to vector<256x1xi32>
    %c0_i32 = arith.constant 0 : i32
    %4 = vector.broadcast %c0_i32 : i32 to vector<256x1xi32>
    %5 = arith.cmpi ne, %1, %4 : vector<256x1xi32>
    %c15_i32 = arith.constant 15 : i32
    %6 = vector.broadcast %c15_i32 : i32 to vector<256x1xi32>
    %7 = arith.cmpi ne, %1, %6 : vector<256x1xi32>
    %c0_i32_0 = arith.constant 0 : i32
    %8 = vector.broadcast %c0_i32_0 : i32 to vector<256x1xi32>
    %9 = arith.cmpi ne, %3, %8 : vector<256x1xi32>
    %c15_i32_1 = arith.constant 15 : i32
    %10 = vector.broadcast %c15_i32_1 : i32 to vector<256x1xi32>
    %11 = arith.cmpi ne, %3, %10 : vector<256x1xi32>
    %12 = arith.andi %5, %9 : vector<256x1xi1>
    %13 = arith.andi %5, %11 : vector<256x1xi1>
    %14 = arith.andi %7, %9 : vector<256x1xi1>
    %15 = arith.andi %7, %11 : vector<256x1xi1>
    %c0 = arith.constant 0 : index
    %c0_2 = arith.constant 0 : index
    %c0_3 = arith.constant 0 : index
    %c0_4 = arith.constant 0 : index
    %16 = vector.load %arg1[%c0, %c0_2, %c0_3, %c0_4] : memref<1x16x16x128xbf16, #tpu.memory_space<vmem>>, vector<1x16x16x128xbf16>
    %17 = vector.shape_cast %16 : vector<1x16x16x128xbf16> to vector<16x16x128xbf16>
    %18 = vector.shape_cast %17 : vector<16x16x128xbf16> to vector<256x128xbf16>
    %c0_5 = arith.constant 0 : index
    %c0_6 = arith.constant 0 : index
    %19 = vector.load %arg2[%c0_5, %c0_6] : memref<128x1152xbf16, #tpu.memory_space<vmem>>, vector<128x1152xbf16>
    %cst = arith.constant dense<0.000000e+00> : vector<256x1152xf32>
    %20 = tpu.matmul %18, %19, %cst {dimension_numbers = #tpu.dot_dimension_numbers<[1], [0], [0], [1], [0, 0, 1, 1], [], []>} : vector<256x128xbf16>, vector<128x1152xbf16>, vector<256x1152xf32> -> vector<256x1152xf32>
    %21 = vector.extract_strided_slice %20 {offsets = [0, 512], sizes = [256, 128], strides = [1, 1]} : vector<256x1152xf32> to vector<256x128xf32>
    %22 = vector.extract_strided_slice %20 {offsets = [0, 0], sizes = [256, 128], strides = [1, 1]} : vector<256x1152xf32> to vector<256x128xf32>
    %c17_i32 = arith.constant 17 : i32
    %23 = tpu.dynamic_rotate %22 by %c17_i32 dim 0 : vector<256x128xf32>, i32 -> vector<256x128xf32>
    %cst_7 = arith.constant 0.000000e+00 : f32
    %24 = vector.shape_cast %12 : vector<256x1xi1> to vector<256x1xi1>
    %25 = vector.broadcast %24 : vector<256x1xi1> to vector<256x128xi1>
    %26 = vector.broadcast %cst_7 : f32 to vector<256x128xf32>
    %27 = arith.select %25, %23, %26 : vector<256x128xi1>, vector<256x128xf32>
    %28 = arith.addf %21, %27 : vector<256x128xf32>
    %29 = vector.extract_strided_slice %20 {offsets = [0, 128], sizes = [256, 128], strides = [1, 1]} : vector<256x1152xf32> to vector<256x128xf32>
    %c16_i32 = arith.constant 16 : i32
    %30 = tpu.dynamic_rotate %29 by %c16_i32 dim 0 : vector<256x128xf32>, i32 -> vector<256x128xf32>
    %cst_8 = arith.constant 0.000000e+00 : f32
    %31 = vector.shape_cast %5 : vector<256x1xi1> to vector<256x1xi1>
    %32 = vector.broadcast %31 : vector<256x1xi1> to vector<256x128xi1>
    %33 = vector.broadcast %cst_8 : f32 to vector<256x128xf32>
    %34 = arith.select %32, %30, %33 : vector<256x128xi1>, vector<256x128xf32>
    %35 = arith.addf %28, %34 : vector<256x128xf32>
    %36 = vector.extract_strided_slice %20 {offsets = [0, 256], sizes = [256, 128], strides = [1, 1]} : vector<256x1152xf32> to vector<256x128xf32>
    %c15_i32_9 = arith.constant 15 : i32
    %37 = tpu.dynamic_rotate %36 by %c15_i32_9 dim 0 : vector<256x128xf32>, i32 -> vector<256x128xf32>
    %cst_10 = arith.constant 0.000000e+00 : f32
    %38 = vector.shape_cast %13 : vector<256x1xi1> to vector<256x1xi1>
    %39 = vector.broadcast %38 : vector<256x1xi1> to vector<256x128xi1>
    %40 = vector.broadcast %cst_10 : f32 to vector<256x128xf32>
    %41 = arith.select %39, %37, %40 : vector<256x128xi1>, vector<256x128xf32>
    %42 = arith.addf %35, %41 : vector<256x128xf32>
    %43 = vector.extract_strided_slice %20 {offsets = [0, 384], sizes = [256, 128], strides = [1, 1]} : vector<256x1152xf32> to vector<256x128xf32>
    %c1_i32 = arith.constant 1 : i32
    %44 = tpu.dynamic_rotate %43 by %c1_i32 dim 0 : vector<256x128xf32>, i32 -> vector<256x128xf32>
    %cst_11 = arith.constant 0.000000e+00 : f32
    %45 = vector.shape_cast %9 : vector<256x1xi1> to vector<256x1xi1>
    %46 = vector.broadcast %45 : vector<256x1xi1> to vector<256x128xi1>
    %47 = vector.broadcast %cst_11 : f32 to vector<256x128xf32>
    %48 = arith.select %46, %44, %47 : vector<256x128xi1>, vector<256x128xf32>
    %49 = arith.addf %42, %48 : vector<256x128xf32>
    %50 = vector.extract_strided_slice %20 {offsets = [0, 640], sizes = [256, 128], strides = [1, 1]} : vector<256x1152xf32> to vector<256x128xf32>
    %c255_i32 = arith.constant 255 : i32
    %51 = tpu.dynamic_rotate %50 by %c255_i32 dim 0 : vector<256x128xf32>, i32 -> vector<256x128xf32>
    %cst_12 = arith.constant 0.000000e+00 : f32
    %52 = vector.shape_cast %11 : vector<256x1xi1> to vector<256x1xi1>
    %53 = vector.broadcast %52 : vector<256x1xi1> to vector<256x128xi1>
    %54 = vector.broadcast %cst_12 : f32 to vector<256x128xf32>
    %55 = arith.select %53, %51, %54 : vector<256x128xi1>, vector<256x128xf32>
    %56 = arith.addf %49, %55 : vector<256x128xf32>
    %57 = vector.extract_strided_slice %20 {offsets = [0, 768], sizes = [256, 128], strides = [1, 1]} : vector<256x1152xf32> to vector<256x128xf32>
    %c241_i32 = arith.constant 241 : i32
    %58 = tpu.dynamic_rotate %57 by %c241_i32 dim 0 : vector<256x128xf32>, i32 -> vector<256x128xf32>
    %cst_13 = arith.constant 0.000000e+00 : f32
    %59 = vector.shape_cast %14 : vector<256x1xi1> to vector<256x1xi1>
    %60 = vector.broadcast %59 : vector<256x1xi1> to vector<256x128xi1>
    %61 = vector.broadcast %cst_13 : f32 to vector<256x128xf32>
    %62 = arith.select %60, %58, %61 : vector<256x128xi1>, vector<256x128xf32>
    %63 = arith.addf %56, %62 : vector<256x128xf32>
    %64 = vector.extract_strided_slice %20 {offsets = [0, 896], sizes = [256, 128], strides = [1, 1]} : vector<256x1152xf32> to vector<256x128xf32>
    %c240_i32 = arith.constant 240 : i32
    %65 = tpu.dynamic_rotate %64 by %c240_i32 dim 0 : vector<256x128xf32>, i32 -> vector<256x128xf32>
    %cst_14 = arith.constant 0.000000e+00 : f32
    %66 = vector.shape_cast %7 : vector<256x1xi1> to vector<256x1xi1>
    %67 = vector.broadcast %66 : vector<256x1xi1> to vector<256x128xi1>
    %68 = vector.broadcast %cst_14 : f32 to vector<256x128xf32>
    %69 = arith.select %67, %65, %68 : vector<256x128xi1>, vector<256x128xf32>
    %70 = arith.addf %63, %69 : vector<256x128xf32>
    %71 = vector.extract_strided_slice %20 {offsets = [0, 1024], sizes = [256, 128], strides = [1, 1]} : vector<256x1152xf32> to vector<256x128xf32>
    %c239_i32 = arith.constant 239 : i32
    %72 = tpu.dynamic_rotate %71 by %c239_i32 dim 0 : vector<256x128xf32>, i32 -> vector<256x128xf32>
    %cst_15 = arith.constant 0.000000e+00 : f32
    %73 = vector.shape_cast %15 : vector<256x1xi1> to vector<256x1xi1>
    %74 = vector.broadcast %73 : vector<256x1xi1> to vector<256x128xi1>
    %75 = vector.broadcast %cst_15 : f32 to vector<256x128xf32>
    %76 = arith.select %74, %72, %75 : vector<256x128xi1>, vector<256x128xf32>
    %77 = arith.addf %70, %76 : vector<256x128xf32>
    %c0_16 = arith.constant 0 : index
    %c0_17 = arith.constant 0 : index
    %78 = vector.load %arg3[%c0_16, %c0_17] : memref<1x128xf32, #tpu.memory_space<vmem>>, vector<1x128xf32>
    %79 = vector.broadcast %78 : vector<1x128xf32> to vector<256x128xf32>
    %80 = arith.mulf %77, %79 : vector<256x128xf32>
    %c0_18 = arith.constant 0 : index
    %c0_19 = arith.constant 0 : index
    %81 = vector.load %arg4[%c0_18, %c0_19] : memref<1x128xf32, #tpu.memory_space<vmem>>, vector<1x128xf32>
    %82 = vector.broadcast %81 : vector<1x128xf32> to vector<256x128xf32>
    %83 = arith.addf %80, %82 : vector<256x128xf32>
    %84 = arith.mulf %83, %83 : vector<256x128xf32>
    %85 = arith.mulf %83, %84 : vector<256x128xf32>
    %cst_20 = arith.constant 4.471500e-02 : f32
    %86 = vector.broadcast %cst_20 : f32 to vector<256x128xf32>
    %87 = arith.mulf %86, %85 : vector<256x128xf32>
    %88 = arith.addf %83, %87 : vector<256x128xf32>
    %cst_21 = arith.constant 0.797884583 : f32
    %89 = vector.broadcast %cst_21 : f32 to vector<256x128xf32>
    %90 = arith.mulf %89, %88 : vector<256x128xf32>
    %91 = math.tanh %90 : vector<256x128xf32>
    %cst_22 = arith.constant 1.000000e+00 : f32
    %92 = vector.broadcast %cst_22 : f32 to vector<256x128xf32>
    %93 = arith.addf %92, %91 : vector<256x128xf32>
    %cst_23 = arith.constant 5.000000e-01 : f32
    %94 = vector.broadcast %cst_23 : f32 to vector<256x128xf32>
    %95 = arith.mulf %94, %93 : vector<256x128xf32>
    %96 = arith.mulf %83, %95 : vector<256x128xf32>
    %97 = arith.truncf %96 : vector<256x128xf32> to vector<256x128xbf16>
    %c0_24 = arith.constant 0 : index
    %c0_25 = arith.constant 0 : index
    %98 = vector.load %arg5[%c0_24, %c0_25] : memref<128x1152xbf16, #tpu.memory_space<vmem>>, vector<128x1152xbf16>
    %cst_26 = arith.constant dense<0.000000e+00> : vector<256x1152xf32>
    %99 = tpu.matmul %97, %98, %cst_26 {dimension_numbers = #tpu.dot_dimension_numbers<[1], [0], [0], [1], [0, 0, 1, 1], [], []>} : vector<256x128xbf16>, vector<128x1152xbf16>, vector<256x1152xf32> -> vector<256x1152xf32>
    %100 = vector.extract_strided_slice %99 {offsets = [0, 512], sizes = [256, 128], strides = [1, 1]} : vector<256x1152xf32> to vector<256x128xf32>
    %101 = vector.extract_strided_slice %99 {offsets = [0, 0], sizes = [256, 128], strides = [1, 1]} : vector<256x1152xf32> to vector<256x128xf32>
    %c17_i32_27 = arith.constant 17 : i32
    %102 = tpu.dynamic_rotate %101 by %c17_i32_27 dim 0 : vector<256x128xf32>, i32 -> vector<256x128xf32>
    %cst_28 = arith.constant 0.000000e+00 : f32
    %103 = vector.shape_cast %12 : vector<256x1xi1> to vector<256x1xi1>
    %104 = vector.broadcast %103 : vector<256x1xi1> to vector<256x128xi1>
    %105 = vector.broadcast %cst_28 : f32 to vector<256x128xf32>
    %106 = arith.select %104, %102, %105 : vector<256x128xi1>, vector<256x128xf32>
    %107 = arith.addf %100, %106 : vector<256x128xf32>
    %108 = vector.extract_strided_slice %99 {offsets = [0, 128], sizes = [256, 128], strides = [1, 1]} : vector<256x1152xf32> to vector<256x128xf32>
    %c16_i32_29 = arith.constant 16 : i32
    %109 = tpu.dynamic_rotate %108 by %c16_i32_29 dim 0 : vector<256x128xf32>, i32 -> vector<256x128xf32>
    %cst_30 = arith.constant 0.000000e+00 : f32
    %110 = vector.shape_cast %5 : vector<256x1xi1> to vector<256x1xi1>
    %111 = vector.broadcast %110 : vector<256x1xi1> to vector<256x128xi1>
    %112 = vector.broadcast %cst_30 : f32 to vector<256x128xf32>
    %113 = arith.select %111, %109, %112 : vector<256x128xi1>, vector<256x128xf32>
    %114 = arith.addf %107, %113 : vector<256x128xf32>
    %115 = vector.extract_strided_slice %99 {offsets = [0, 256], sizes = [256, 128], strides = [1, 1]} : vector<256x1152xf32> to vector<256x128xf32>
    %c15_i32_31 = arith.constant 15 : i32
    %116 = tpu.dynamic_rotate %115 by %c15_i32_31 dim 0 : vector<256x128xf32>, i32 -> vector<256x128xf32>
    %cst_32 = arith.constant 0.000000e+00 : f32
    %117 = vector.shape_cast %13 : vector<256x1xi1> to vector<256x1xi1>
    %118 = vector.broadcast %117 : vector<256x1xi1> to vector<256x128xi1>
    %119 = vector.broadcast %cst_32 : f32 to vector<256x128xf32>
    %120 = arith.select %118, %116, %119 : vector<256x128xi1>, vector<256x128xf32>
    %121 = arith.addf %114, %120 : vector<256x128xf32>
    %122 = vector.extract_strided_slice %99 {offsets = [0, 384], sizes = [256, 128], strides = [1, 1]} : vector<256x1152xf32> to vector<256x128xf32>
    %c1_i32_33 = arith.constant 1 : i32
    %123 = tpu.dynamic_rotate %122 by %c1_i32_33 dim 0 : vector<256x128xf32>, i32 -> vector<256x128xf32>
    %cst_34 = arith.constant 0.000000e+00 : f32
    %124 = vector.shape_cast %9 : vector<256x1xi1> to vector<256x1xi1>
    %125 = vector.broadcast %124 : vector<256x1xi1> to vector<256x128xi1>
    %126 = vector.broadcast %cst_34 : f32 to vector<256x128xf32>
    %127 = arith.select %125, %123, %126 : vector<256x128xi1>, vector<256x128xf32>
    %128 = arith.addf %121, %127 : vector<256x128xf32>
    %129 = vector.extract_strided_slice %99 {offsets = [0, 640], sizes = [256, 128], strides = [1, 1]} : vector<256x1152xf32> to vector<256x128xf32>
    %c255_i32_35 = arith.constant 255 : i32
    %130 = tpu.dynamic_rotate %129 by %c255_i32_35 dim 0 : vector<256x128xf32>, i32 -> vector<256x128xf32>
    %cst_36 = arith.constant 0.000000e+00 : f32
    %131 = vector.shape_cast %11 : vector<256x1xi1> to vector<256x1xi1>
    %132 = vector.broadcast %131 : vector<256x1xi1> to vector<256x128xi1>
    %133 = vector.broadcast %cst_36 : f32 to vector<256x128xf32>
    %134 = arith.select %132, %130, %133 : vector<256x128xi1>, vector<256x128xf32>
    %135 = arith.addf %128, %134 : vector<256x128xf32>
    %136 = vector.extract_strided_slice %99 {offsets = [0, 768], sizes = [256, 128], strides = [1, 1]} : vector<256x1152xf32> to vector<256x128xf32>
    %c241_i32_37 = arith.constant 241 : i32
    %137 = tpu.dynamic_rotate %136 by %c241_i32_37 dim 0 : vector<256x128xf32>, i32 -> vector<256x128xf32>
    %cst_38 = arith.constant 0.000000e+00 : f32
    %138 = vector.shape_cast %14 : vector<256x1xi1> to vector<256x1xi1>
    %139 = vector.broadcast %138 : vector<256x1xi1> to vector<256x128xi1>
    %140 = vector.broadcast %cst_38 : f32 to vector<256x128xf32>
    %141 = arith.select %139, %137, %140 : vector<256x128xi1>, vector<256x128xf32>
    %142 = arith.addf %135, %141 : vector<256x128xf32>
    %143 = vector.extract_strided_slice %99 {offsets = [0, 896], sizes = [256, 128], strides = [1, 1]} : vector<256x1152xf32> to vector<256x128xf32>
    %c240_i32_39 = arith.constant 240 : i32
    %144 = tpu.dynamic_rotate %143 by %c240_i32_39 dim 0 : vector<256x128xf32>, i32 -> vector<256x128xf32>
    %cst_40 = arith.constant 0.000000e+00 : f32
    %145 = vector.shape_cast %7 : vector<256x1xi1> to vector<256x1xi1>
    %146 = vector.broadcast %145 : vector<256x1xi1> to vector<256x128xi1>
    %147 = vector.broadcast %cst_40 : f32 to vector<256x128xf32>
    %148 = arith.select %146, %144, %147 : vector<256x128xi1>, vector<256x128xf32>
    %149 = arith.addf %142, %148 : vector<256x128xf32>
    %150 = vector.extract_strided_slice %99 {offsets = [0, 1024], sizes = [256, 128], strides = [1, 1]} : vector<256x1152xf32> to vector<256x128xf32>
    %c239_i32_41 = arith.constant 239 : i32
    %151 = tpu.dynamic_rotate %150 by %c239_i32_41 dim 0 : vector<256x128xf32>, i32 -> vector<256x128xf32>
    %cst_42 = arith.constant 0.000000e+00 : f32
    %152 = vector.shape_cast %15 : vector<256x1xi1> to vector<256x1xi1>
    %153 = vector.broadcast %152 : vector<256x1xi1> to vector<256x128xi1>
    %154 = vector.broadcast %cst_42 : f32 to vector<256x128xf32>
    %155 = arith.select %153, %151, %154 : vector<256x128xi1>, vector<256x128xf32>
    %156 = arith.addf %149, %155 : vector<256x128xf32>
    %c0_43 = arith.constant 0 : index
    %c0_44 = arith.constant 0 : index
    %157 = vector.load %arg6[%c0_43, %c0_44] : memref<1x128xf32, #tpu.memory_space<vmem>>, vector<1x128xf32>
    %158 = vector.broadcast %157 : vector<1x128xf32> to vector<256x128xf32>
    %159 = arith.mulf %156, %158 : vector<256x128xf32>
    %c0_45 = arith.constant 0 : index
    %c0_46 = arith.constant 0 : index
    %160 = vector.load %arg7[%c0_45, %c0_46] : memref<1x128xf32, #tpu.memory_space<vmem>>, vector<1x128xf32>
    %161 = vector.broadcast %160 : vector<1x128xf32> to vector<256x128xf32>
    %162 = arith.addf %159, %161 : vector<256x128xf32>
    %163 = arith.mulf %162, %162 : vector<256x128xf32>
    %164 = arith.mulf %162, %163 : vector<256x128xf32>
    %cst_47 = arith.constant 4.471500e-02 : f32
    %165 = vector.broadcast %cst_47 : f32 to vector<256x128xf32>
    %166 = arith.mulf %165, %164 : vector<256x128xf32>
    %167 = arith.addf %162, %166 : vector<256x128xf32>
    %cst_48 = arith.constant 0.797884583 : f32
    %168 = vector.broadcast %cst_48 : f32 to vector<256x128xf32>
    %169 = arith.mulf %168, %167 : vector<256x128xf32>
    %170 = math.tanh %169 : vector<256x128xf32>
    %cst_49 = arith.constant 1.000000e+00 : f32
    %171 = vector.broadcast %cst_49 : f32 to vector<256x128xf32>
    %172 = arith.addf %171, %170 : vector<256x128xf32>
    %cst_50 = arith.constant 5.000000e-01 : f32
    %173 = vector.broadcast %cst_50 : f32 to vector<256x128xf32>
    %174 = arith.mulf %173, %172 : vector<256x128xf32>
    %175 = arith.mulf %162, %174 : vector<256x128xf32>
    %176 = vector.shape_cast %175 : vector<256x128xf32> to vector<16x16x128xf32>
    %177 = arith.truncf %176 : vector<16x16x128xf32> to vector<16x16x128xbf16>
    %c0_51 = arith.constant 0 : index
    %c0_52 = arith.constant 0 : index
    %c0_53 = arith.constant 0 : index
    %c0_54 = arith.constant 0 : index
    %178 = vector.load %arg8[%c0_51, %c0_52, %c0_53, %c0_54] : memref<1x16x16x128xbf16, #tpu.memory_space<vmem>>, vector<1x16x16x128xbf16>
    %179 = vector.shape_cast %178 : vector<1x16x16x128xbf16> to vector<16x16x128xbf16>
    %180 = vector.shape_cast %177 : vector<16x16x128xbf16> to vector<1x16x16x128xbf16>
    tpu.vector_store %arg8[%c0_51, %c0_52, %c0_53, %c0_54], %180 {strides = array<i32>} : memref<1x16x16x128xbf16, #tpu.memory_space<vmem>>, vector<1x16x16x128xbf16>,
    return
  }
  func.func @transform_0(%arg0: i32) -> (i32, i32, i32, i32) {
    %c0_i32 = arith.constant 0 : i32
    %c0_i32_0 = arith.constant 0 : i32
    %c0_i32_1 = arith.constant 0 : i32
    %c0_i32_2 = arith.constant 0 : i32
    return %arg0, %c0_i32, %c0_i32_0, %c0_i32_1 : i32, i32, i32, i32
  }
  func.func @transform_1(%arg0: i32) -> (i32, i32) {
    %c0_i32 = arith.constant 0 : i32
    %c0_i32_0 = arith.constant 0 : i32
    %c0_i32_1 = arith.constant 0 : i32
    return %c0_i32, %c0_i32_0 : i32, i32
  }
  func.func @transform_2(%arg0: i32) -> (i32, i32) {
    %c0_i32 = arith.constant 0 : i32
    %c0_i32_0 = arith.constant 0 : i32
    %c0_i32_1 = arith.constant 0 : i32
    return %c0_i32, %c0_i32_0 : i32, i32
  }
  func.func @transform_3(%arg0: i32) -> (i32, i32) {
    %c0_i32 = arith.constant 0 : i32
    %c0_i32_0 = arith.constant 0 : i32
    %c0_i32_1 = arith.constant 0 : i32
    return %c0_i32, %c0_i32_0 : i32, i32
  }
  func.func @transform_4(%arg0: i32) -> (i32, i32) {
    %c0_i32 = arith.constant 0 : i32
    %c0_i32_0 = arith.constant 0 : i32
    %c0_i32_1 = arith.constant 0 : i32
    return %c0_i32, %c0_i32_0 : i32, i32
  }
  func.func @transform_5(%arg0: i32) -> (i32, i32) {
    %c0_i32 = arith.constant 0 : i32
    %c0_i32_0 = arith.constant 0 : i32
    %c0_i32_1 = arith.constant 0 : i32
    return %c0_i32, %c0_i32_0 : i32, i32
  }
  func.func @transform_6(%arg0: i32) -> (i32, i32) {
    %c0_i32 = arith.constant 0 : i32
    %c0_i32_0 = arith.constant 0 : i32
    %c0_i32_1 = arith.constant 0 : i32
    return %c0_i32, %c0_i32_0 : i32, i32
  }
  func.func @transform_7(%arg0: i32) -> (i32, i32, i32, i32) {
    %c0_i32 = arith.constant 0 : i32
    %c0_i32_0 = arith.constant 0 : i32
    %c0_i32_1 = arith.constant 0 : i32
    %c0_i32_2 = arith.constant 0 : i32
    return %arg0, %c0_i32, %c0_i32_0, %c0_i32_1 : i32, i32, i32, i32
  }
}

</mosaic_0001>

<bundles_post_ra>
// kernel: tpu_custom_call.1
= control target key start
LH: loop header
LB: loop body
LE: loop exit
PB: predicated region body
PF: predicated region fallthrough
CT: control target
= control target key end

     0   :  { %12 = vsyncpa [#allocation3], 0  ;;  %s10499_s0 = inlined_call_operand.hbm [shape: bf16[2,16,16,128], index: 0, kind: input, shape index: {}]   ;;  %s10500_s1 = inlined_call_operand.hbm [shape: bf16[128,1152], index: 1, kind: input, shape index: {}]   ;;  %s10501_s2 = inlined_call_operand.vmem [shape: f32[1,128], index: 2, kind: input, shape index: {}]   ;;  %s10502_s3 = inlined_call_operand.vmem [shape: f32[1,128], index: 3, kind: input, shape index: {}]   ;;  %s10503_s4 = inlined_call_operand.hbm [shape: bf16[128,1152], index: 4, kind: input, shape index: {}]   ;;  %s10504_s5 = inlined_call_operand.vmem [shape: f32[1,128], index: 5, kind: input, shape index: {}]   ;;  %s10505_s6 = inlined_call_operand.vmem [shape: f32[1,128], index: 6, kind: input, shape index: {}]   ;;  %s10506_s7 = inlined_call_operand.hbm [shape: bf16[2,16,16,128], index: 7, kind: output, shape index: {}]  }
   0x1   :  { %14 = vsyncpa [#allocation3 + $0x1], 0 }
   0x2   :  { %15 = vsyncpa [#allocation6], 0 }
   0x3   :  { %16 = vsyncpa [#allocation4], 0 }
   0x4   :  { %18 = vsyncpa [#allocation4 + $0x1], 0  ;;  %s6978_s24 = smov 0   ;;  %s6980_s25 = smov 0  }
   0x5   :  { %s6982_s26 = smov 0   ;;  %s6984_s27 = smov 0  }
   0x6 LB: > { %s6999_s28 = sadd.s32 4294967295, %s6925_s27   ;;  %s5856_s29 = sadd.s32 4294967294, %s6925_s27   ;;  %s6925_s27 = sphi %s6984_s27, %s10903_s27   ;;  %s6921_s26 = sphi %s6982_s26, %s10902_s26   ;;  %s6917_s25 = sphi %s6980_s25, %s10901_s25   ;;  %s6913_s24 = sphi %s6978_s24, %s10900_s24  }
   0x7   : > { %p44_p0 = scmp.ne.s32.totalorder %s6917_s25, %s6913_s24  ;;  %p10507_p1 = scmp.eq.s32.totalorder %s6999_s28, 0 }
   0x8   : > { %p200_p3 = scmp.eq.s32.totalorder %s5856_s29, 1  ;;  %p5857_p5 = scmp.ge.s32.totalorder %s6925_s27, 1 }
   0x9   : > { %p7008_p4 = por %p10507_p1, %p44_p0  ;;  %p207_p7 = scmp.lt.s32.totalorder %s6925_s27, 3 }
   0xa   : > { %p7013_p6 = por %p200_p3, %p44_p0  ;;  %s6927_s10 = smov [#allocation5]  }
   0xb   : > { %s10532_s30 = scalar_select %p7008_p4, 1, 0 }
   0xc   : > { %s10533_s8 = scalar_select %p7013_p6, 1, 0 }
   0xd   : > { %p7018_p8 = pnand %p5857_p5, %p207_p7  ;;  %s219_s11 = sshll.u32 %s6927_s10, 4  ;;  %s7022_s11 = int_to_ptr.vmem [resolvable:$true] %s219_s11 }
   0xe   : > { %s6928_s13 = smov [#allocation7]   ;;  %s6769_s17 = scalar_lea.hbm %s10500_s1, 9216 }
   0xf   : > { %p6355_p9 = pneg %p7018_p8  ;;  %s238_s14 = sshll.u32 %s6928_s13, 4  ;;  %s7033_s14 = int_to_ptr.vmem [resolvable:$true] %s238_s14 }
  0x10   : > { %p6770_p12 = scmp.ne.s32.totalorder %s10500_s1, %s6769_s17  ;;  %p6776_p5 = scmp.lt.u32.totalorder %s6769_s17, %s10500_s1 }
  0x11   : > { %p7029_p11 = pnand %p6355_p9, %p10507_p1 }
  0x13   : > { %p6771_p13 = pneg %p7029_p11 }
  0x15   : > { %p6772_p0 = pnand %p6771_p13, %p6770_p12 }
  0x17   : > { %p6773_p3 = pneg %p6772_p0 }
  0x19   : > { %p6778_p7 = pnand %p6776_p5, %p6773_p3 }
  0x1b   : > { %6781 = shalt.err (!%p6778_p7)
}
  0x1c   : > { %s6782_s22 = scalar_lea.vmem %s7022_s11, 9216  ;;  %p6790_p2 = scmp.lt.s32.totalorder %s7022_s11, %s7022_s11 }
  0x1d   : > { %p6783_p9 = scmp.ne.s32.totalorder %s7022_s11, %s6782_s22  ;;  %p6791_p12 = scmp.lt.s32.totalorder %s6782_s22, %s6782_s22 }
  0x1f   : > { %p6785_p10 = pnand %p6783_p9, %p6771_p13  ;;  %p6792_p0 = por %p6791_p12, %p6790_p2 }
  0x21   : > { %p6786_p1 = pneg %p6785_p10 }
  0x23   : > { %p6793_p6 = pnand %p6792_p0, %p6786_p1 }
  0x25   : > { %6796 = shalt.err (!%p6793_p6)
}
  0x26   : > { %s6929_s23 = smov 576   ;;  %s6930_s29 = smov 36  }
  0x27   : > { %6358 = dma.hbm_to_vmem [thread:$0]  (!%p7029_p11), %s10500_s1, 9216, %s7022_s11, [#allocation6], %s6929_s23, %s6929_s23, %s6930_s29  }
  0x28   : > { %s6797_s17 = scalar_lea.hbm %s10503_s4, 9216 }
  0x29   : > { %p6798_p2 = scmp.ne.s32.totalorder %s10503_s4, %s6797_s17  ;;  %p6804_p10 = scmp.lt.u32.totalorder %s6797_s17, %s10503_s4 }
  0x2b   : > { %p6800_p1 = pnand %p6798_p2, %p6771_p13 }
  0x2d   : > { %p6801_p6 = pneg %p6800_p1 }
  0x2f   : > { %p6806_p3 = pnand %p6804_p10, %p6801_p6 }
  0x31   : > { %6809 = shalt.err (!%p6806_p3)
}
  0x32   : > { %s6810_s11 = scalar_lea.vmem %s7033_s14, 9216  ;;  %p6818_p12 = scmp.lt.s32.totalorder %s7033_s14, %s7033_s14 }
  0x33   : > { %p6811_p5 = scmp.ne.s32.totalorder %s7033_s14, %s6810_s11  ;;  %p6819_p0 = scmp.lt.s32.totalorder %s6810_s11, %s6810_s11 }
  0x35   : > { %p6813_p7 = pnand %p6811_p5, %p6771_p13  ;;  %p6820_p2 = por %p6819_p0, %p6818_p12 }
  0x37   : > { %p6814_p9 = pneg %p6813_p7 }
  0x39   : > { %p6821_p1 = pnand %p6820_p2, %p6814_p9 }
  0x3b   : > { %6824 = shalt.err (!%p6821_p1)
}
  0x3c   : > { %6361 = dma.hbm_to_vmem [thread:$0]  (!%p7029_p11), %s10503_s4, 9216, %s7033_s14, [#allocation6], %s6929_s23, %s6929_s23, %s6930_s29  }
  0x3d   : > { %s7088_s13 = sadd.s32 1, %s6925_s27   ;;  %s31_s12 = sadd.s32 1, %s6921_s26 }
  0x3e   : > { %s28_s15 = ssub.s32 %s6925_s27, %s7088_s13  ;;  %p38_p13 = scmp.ne.s32.totalorder %s6921_s26, %s6917_s25 }
  0x3f   : > { %p29_p6 = scmp.eq.s32.totalorder %s28_s15, 0  ;;  %p39_p10 = scmp.eq.s32.totalorder %s6925_s27, 0 }
  0x40   : > { %p10536_p3 = scmp.eq.s32.totalorder %s6999_s28, 1  ;;  %p6372_p7 = scmp.lt.s32.totalorder %s6925_s27, 2 }
  0x41   : > { %s7104_s17 = scalar_select %p29_p6, %s6921_s26, %s31_s12  }
  0x42   : > { %p7098_p5 = por %p10536_p3, %p38_p13  ;;  %p40_p9 = por %p39_p10, %p38_p13 }
  0x43   : > { %s258_s18 = sand.u32 1, %s6921_s26   ;;  %s6070_s14 = sshll.u32 %s6925_s27, 11 }
  0x44   : > { %s10537_s16 = scalar_select %p7098_p5, 1, 0 }
  0x45   : > { %s5861_s19 = sshll.u32 %s258_s18, 7  ;;  %s7111_s20 = scalar_lea.hbm %s10499_s0, %s6070_s14 }
  0x46   : > { %s262_s21 = scalar_lea.vmem [#allocation2], %s5861_s19  ;;  %p7115_p11 = pnand %p6372_p7, %p40_p9 }
  0x47   : > { %s269_s11 = sshll.u32 %s262_s21, 4  ;;  %s7119_s10 = scalar_lea.sflag [#allocation3], %s258_s18  ;;  %s7113_s11 = int_to_ptr.vmem [resolvable:$true] %s269_s11 }
  0x48   : > { %s6825_s12 = scalar_lea.hbm %s7111_s20, 2048  ;;  %p6827_p0 = pneg %p7115_p11 }
  0x49   : > { %p6826_p12 = scmp.ne.s32.totalorder %s7111_s20, %s6825_s12  ;;  %s6830_s14 = scalar_lea.hbm %s10499_s0, 4096 }
  0x4a   : > { %p6831_p13 = scmp.lt.u32.totalorder %s7111_s20, %s10499_s0  ;;  %p6832_p6 = scmp.lt.u32.totalorder %s6830_s14, %s6825_s12 }
  0x4b   : > { %p6828_p2 = pnand %p6827_p0, %p6826_p12  ;;  %p6834_p3 = scmp.lt.u32.totalorder %s6825_s12, %s7111_s20 }
  0x4c   : > { %p6833_p10 = por %p6832_p6, %p6831_p13 }
  0x4d   : > { %p6829_p1 = pneg %p6828_p2 }
  0x4e   : > { %p6835_p7 = por %p6834_p3, %p6833_p10 }
  0x50   : > { %p6836_p9 = pnand %p6835_p7, %p6829_p1 }
  0x52   : > { %6839 = shalt.err (!%p6836_p9)
}
  0x53   : > { %s6840_s18 = scalar_lea.vmem %s7113_s11, 2048  ;;  %s6931_s21 = smov [#allocation2]  }
  0x54   : > { %p6841_p12 = scmp.ne.s32.totalorder %s7113_s11, %s6840_s18  ;;  %s6845_s15 = sshll.u32 %s6931_s21, 4  ;;  %s6846_s15 = int_to_ptr.vmem [resolvable:$false] %s6845_s15 }
  0x55   : > { %s6847_s19 = scalar_lea.vmem %s6846_s15, 4096  ;;  %p6848_p4 = scmp.lt.s32.totalorder %s7113_s11, %s6846_s15 }
  0x56   : > { %p6843_p2 = pnand %p6841_p12, %p6827_p0  ;;  %p6849_p13 = scmp.lt.s32.totalorder %s6847_s19, %s6840_s18 }
  0x58   : > { %p6844_p5 = pneg %p6843_p2  ;;  %p6850_p6 = por %p6849_p13, %p6848_p4 }
  0x5a   : > { %p6851_p10 = pnand %p6850_p6, %p6844_p5 }
  0x5c   : > { %6854 = shalt.err (!%p6851_p10)
}
  0x5d   : > { %s6932_s12 = smov 64   ;;  %s6933_s14 = smov 4  }
  0x5e   : > { %6365 = dma.hbm_to_vmem [thread:$0]  (!%p7115_p11), %s7111_s20, 2048, %s7113_s11, %s7119_s10, %s6932_s12, %s6932_s12, %s6933_s14  }
  0x5f   : > { %281 = sbr.rel (%p7018_p8) target bundleno = 1326 (0x52e), region = 48 }
  0x66   : > { %s7150_s23 = sand.u32 1, %s6917_s25   ;;  %p10539_p4 = scmp.ne.s32.totalorder %s10532_s30, 0 }
  0x67   : > { %s5865_s29 = sshll.u32 %s7150_s23, 7  ;;  %s284_s18 = scalar_lea.sflag [#allocation3], %s7150_s23 }
  0x68   : > { %s7156_s21 = scalar_lea.vmem [#allocation2], %s5865_s29 }
  0x69   : > { %6900 = dma.done.wait (%p10539_p4), %s284_s18, 2048  }
  0x6a   : > { %6902 = vsyncadd (%p10539_p4), %s284_s18, 4294965248  ;;  %p10540_p5 = scmp.eq.s32.totalorder %s6999_s28, 0 }
  0x6c   : > { %6904 = dma.done.wait (%p10540_p5), [#allocation6], 18432   ;;  %p10541_p8 = pmov %p10540_p5 }
  0x6d   : > { %v10512_v0 = vmov 0   ;;  %v6417_v1 = vld [vmem:[#allocation5 + $0x4] ss:$36 sps:$4 sm:$0xff]   ;;  %v6419_v2 = vld [vmem:[#allocation5 + $0xc] ss:$36 sps:$4 sm:$0xff]   ;;  %v7190_v56 = vld [vmem:[%s7156_s21 + $0x18] sm:$0xff]  }
  0x6e   : > { %6906 = vsyncadd (%p10541_p8), [#allocation6], 4294948864  ;;  %942 = vmatprep.mubr.bf16.mxu0 %v10512_v0  ;;  %1132 = vmatprep.mubr.bf16.mxu1 %v10512_v0  ;;  %v6421_v3 = vld [vmem:[#allocation5] ss:$36 sps:$4 sm:$0xff]   ;;  %v6422_v4 = vld [vmem:[#allocation5 + $0x8] ss:$36 sps:$4 sm:$0xff]  }
  0x6f   : > { %910 = vmatprep.subr.bf16.mxu0 %v6417_v1  ;;  %1100 = vmatprep.subr.bf16.mxu1 %v6419_v2  ;;  %v6423_v5 = vld [vmem:[#allocation5 + $0x4c] ss:$36 sps:$4 sm:$0xff]   ;;  %v6425_v6 = vld [vmem:[#allocation5 + $0x54] ss:$36 sps:$4 sm:$0xff]   ;;  %v6431_v10 = vld [vmem:[#allocation5 + $0x9c] ss:$36 sps:$4 sm:$0xff]  }
  0x70   : > { %911 = vmatpush1.bf16.msra.mxu0 %v6421_v3  ;;  %1101 = vmatpush1.bf16.msra.mxu1 %v6422_v4  ;;  %v6427_v7 = vld [vmem:[#allocation5 + $0x48] ss:$36 sps:$4 sm:$0xff]   ;;  %v6428_v8 = vld [vmem:[#allocation5 + $0x50] ss:$36 sps:$4 sm:$0xff]   ;;  %v6434_v12 = vld [vmem:[#allocation5 + $0x98] ss:$36 sps:$4 sm:$0xff]  }
  0x71   : > { %912 = vmatprep.subr.bf16.mxu0 %v6423_v5  ;;  %1102 = vmatprep.subr.bf16.mxu1 %v6425_v6  ;;  %v6429_v9 = vld [vmem:[#allocation5 + $0x94] ss:$36 sps:$4 sm:$0xff]   ;;  %v6435_v13 = vld [vmem:[#allocation5 + $0xdc] ss:$36 sps:$4 sm:$0xff]   ;;  %v6437_v14 = vld [vmem:[#allocation5 + $0xe4] ss:$36 sps:$4 sm:$0xff]  }
  0x72   : > { %v6433_v11 = vld [vmem:[#allocation5 + $0x90] ss:$36 sps:$4 sm:$0xff]   ;;  %v6439_v15 = vld [vmem:[#allocation5 + $0xd8] ss:$36 sps:$4 sm:$0xff]   ;;  %v6440_v16 = vld [vmem:[#allocation5 + $0xe0] ss:$36 sps:$4 sm:$0xff]  }
  0x73   : > { %v6441_v17 = vld [vmem:[#allocation5 + $0x124] ss:$36 sps:$4 sm:$0xff]   ;;  %v6443_v18 = vld [vmem:[#allocation5 + $0x12c] ss:$36 sps:$4 sm:$0xff]   ;;  %v6449_v22 = vld [vmem:[#allocation5 + $0x174] ss:$36 sps:$4 sm:$0xff]  }
  0x74   : > { %913 = vmatpush1.bf16.msra.mxu0 %v6427_v7  ;;  %1103 = vmatpush1.bf16.msra.mxu1 %v6428_v8  ;;  %v6445_v19 = vld [vmem:[#allocation5 + $0x120] ss:$36 sps:$4 sm:$0xff]   ;;  %v6446_v20 = vld [vmem:[#allocation5 + $0x128] ss:$36 sps:$4 sm:$0xff]   ;;  %v6452_v24 = vld [vmem:[#allocation5 + $0x170] ss:$36 sps:$4 sm:$0xff]  }
  0x75   : > { %914 = vmatprep.subr.bf16.mxu0 %v6429_v9  ;;  %1104 = vmatprep.subr.bf16.mxu1 %v6431_v10  ;;  %v6447_v21 = vld [vmem:[#allocation5 + $0x16c] ss:$36 sps:$4 sm:$0xff]   ;;  %v6453_v25 = vld [vmem:[#allocation5 + $0x1b4] ss:$36 sps:$4 sm:$0xff]   ;;  %v6455_v26 = vld [vmem:[#allocation5 + $0x1bc] ss:$36 sps:$4 sm:$0xff]  }
  0x76   : > { %v6451_v23 = vld [vmem:[#allocation5 + $0x168] ss:$36 sps:$4 sm:$0xff]   ;;  %v6457_v27 = vld [vmem:[#allocation5 + $0x1b0] ss:$36 sps:$4 sm:$0xff]   ;;  %v6458_v28 = vld [vmem:[#allocation5 + $0x1b8] ss:$36 sps:$4 sm:$0xff]  }
  0x77   : > { %v6459_v29 = vld [vmem:[#allocation5 + $0x1fc] ss:$36 sps:$4 sm:$0xff]   ;;  %v6461_v30 = vld [vmem:[#allocation5 + $0x204] ss:$36 sps:$4 sm:$0xff]   ;;  %v6468_v33 = vld [vmem:[#allocation5 + $0x14] ss:$36 sps:$4 sm:$0xff]  }
  0x78   : > { %915 = vmatpush1.bf16.msra.mxu0 %v6433_v11  ;;  %1105 = vmatpush1.bf16.msra.mxu1 %v6434_v12  ;;  %v6463_v31 = vld [vmem:[#allocation5 + $0x1f8] ss:$36 sps:$4 sm:$0xff]   ;;  %v6464_v32 = vld [vmem:[#allocation5 + $0x200] ss:$36 sps:$4 sm:$0xff]   ;;  %v6466_v35 = vld [vmem:[#allocation5 + $0x10] ss:$36 sps:$4 sm:$0xff]  }
  0x79   : > { %916 = vmatprep.subr.bf16.mxu0 %v6435_v13  ;;  %1106 = vmatprep.subr.bf16.mxu1 %v6437_v14  ;;  %v7169_v34 = vld [vmem:[%s7156_s21] sm:$0xff]   ;;  %v6471_v37 = vld [vmem:[#allocation5 + $0x58] ss:$36 sps:$4 sm:$0xff]   ;;  %v7176_v39 = vld [vmem:[%s7156_s21 + $0x8] sm:$0xff]   ;;  %s10080_s12 = scalar_lea.vmem [#allocation8], %s5865_s29  ;;  %s6103_s14 = sshll.u32 %s6999_s28, 11 }
  0x7a   : > { %v6473_v36 = vld [vmem:[#allocation5 + $0x5c] ss:$36 sps:$4 sm:$0xff]   ;;  %v6478_v38 = vld [vmem:[#allocation5 + $0xa4] ss:$36 sps:$4 sm:$0xff]   ;;  %v6483_v41 = vld [vmem:[#allocation5 + $0xec] ss:$36 sps:$4 sm:$0xff]   ;;  %s10452_s30 = scalar_lea.hbm %s10506_s7, %s6103_s14 }
  0x7b   : > { %v6476_v40 = vld [vmem:[#allocation5 + $0xa0] ss:$36 sps:$4 sm:$0xff]   ;;  %v6481_v42 = vld [vmem:[#allocation5 + $0xe8] ss:$36 sps:$4 sm:$0xff]   ;;  %v6499_v43 = vld [vmem:[#allocation5 + $0x18] ss:$36 sps:$4 sm:$0xff]  }
  0x7c   : > { %917 = vmatpush1.bf16.msra.mxu0 %v6439_v15  ;;  %1107 = vmatpush1.bf16.msra.mxu1 %v6440_v16  ;;  %v6501_v44 = vld [vmem:[#allocation5 + $0x1c] ss:$36 sps:$4 sm:$0xff]   ;;  %v6488_v45 = vld [vmem:[#allocation5 + $0x134] ss:$36 sps:$4 sm:$0xff]   ;;  %v6504_v46 = vld [vmem:[#allocation5 + $0x64] ss:$36 sps:$4 sm:$0xff]  }
  0x7d   : > { %918 = vmatprep.subr.bf16.mxu0 %v6441_v17  ;;  %1108 = vmatprep.subr.bf16.mxu1 %v6443_v18  ;;  %v7183_v47 = vld [vmem:[%s7156_s21 + $0x10] sm:$0xff]   ;;  %v6493_v49 = vld [vmem:[#allocation5 + $0x17c] ss:$36 sps:$4 sm:$0xff]   ;;  %v6506_v53 = vld [vmem:[#allocation5 + $0xa8] ss:$36 sps:$4 sm:$0xff]   ;;  %s5764_s29 = sshll.u32 %s10080_s12, 4  ;;  %s10454_s29 = int_to_ptr.vmem [resolvable:$true] %s5764_s29 }
  0x7e   : > { %v6486_v48 = vld [vmem:[#allocation5 + $0x130] ss:$36 sps:$4 sm:$0xff]   ;;  %v6502_v50 = vld [vmem:[#allocation5 + $0x60] ss:$36 sps:$4 sm:$0xff]   ;;  %v6491_v52 = vld [vmem:[#allocation5 + $0x178] ss:$36 sps:$4 sm:$0xff]  }
  0x7f   : > { %v6508_v51 = vld [vmem:[#allocation5 + $0xac] ss:$36 sps:$4 sm:$0xff]   ;;  %v6498_v54 = vld [vmem:[#allocation5 + $0x1c4] ss:$36 sps:$4 sm:$0xff]   ;;  %v6511_v55 = vld [vmem:[#allocation5 + $0xf4] ss:$36 sps:$4 sm:$0xff]  }
  0x80   : > { %919 = vmatpush1.bf16.msra.mxu0 %v6445_v19  ;;  %1109 = vmatpush1.bf16.msra.mxu1 %v6446_v20  ;;  %v6496_v57 = vld [vmem:[#allocation5 + $0x1c0] ss:$36 sps:$4 sm:$0xff]   ;;  %v6509_v58 = vld [vmem:[#allocation5 + $0xf0] ss:$36 sps:$4 sm:$0xff]   ;;  %v6513_v61 = vld [vmem:[#allocation5 + $0x208] ss:$36 sps:$4 sm:$0xff]  }
  0x81   : > { %920 = vmatprep.subr.bf16.mxu0 %v6447_v21  ;;  %1110 = vmatprep.subr.bf16.mxu1 %v6449_v22  ;;  %v6515_v59 = vld [vmem:[#allocation5 + $0x20c] ss:$36 sps:$4 sm:$0xff]   ;;  %v6518_v60 = vld [vmem:[#allocation5 + $0x13c] ss:$36 sps:$4 sm:$0xff]   ;;  %v6521_v63 = vld [vmem:[#allocation5 + $0x184] ss:$36 sps:$4 sm:$0xff]  }
  0x82   : > { %v6516_v62 = vld [vmem:[#allocation5 + $0x138] ss:$36 sps:$4 sm:$0xff]   ;;  %v7196_v1 = vld [vmem:[#allocation5 + $0x20] ss:$36 sps:$4 sm:$0xff]   ;;  %v6525_v4 = vld [vmem:[#allocation5 + $0x1cc] ss:$36 sps:$4 sm:$0xff]  }
  0x83   : > { %v7199_v2 = vld [vmem:[%s7156_s21 + $0x20] sm:$0xff]   ;;  %v6523_v5 = vld [vmem:[#allocation5 + $0x1c8] ss:$36 sps:$4 sm:$0xff]   ;;  %v6528_v6 = vld [vmem:[#allocation5 + $0x214] ss:$36 sps:$4 sm:$0xff]   ;;  %s5751_s9 = scalar_lea.sflag [#allocation4], %s7150_s23 }
  0x84   : > { %921 = vmatpush1.bf16.msra.mxu0 %v6451_v23  ;;  %1111 = vmatpush1.bf16.msra.mxu1 %v6452_v24  ;;  %v6519_v3 = vld [vmem:[#allocation5 + $0x180] ss:$36 sps:$4 sm:$0xff]   ;;  %v7207_v7 = vld [vmem:[%s7156_s21 + $0x28] sm:$0xff]   ;;  %v6526_v8 = vld [vmem:[#allocation5 + $0x210] ss:$36 sps:$4 sm:$0xff]   ;;  %s6855_s20 = scalar_lea.vmem %s10454_s29, 2048 }
  0x85   : > { %922 = vmatprep.subr.bf16.mxu0 %v6453_v25  ;;  %1112 = vmatprep.subr.bf16.mxu1 %v6455_v26  ;;  %v7214_v9 = vld [vmem:[%s7156_s21 + $0x30] sm:$0xff]   ;;  %v7221_v10 = vld [vmem:[%s7156_s21 + $0x38] sm:$0xff]   ;;  %v7228_v11 = vld [vmem:[%s7156_s21 + $0x40] sm:$0xff]   ;;  %v327_v26 = vlaneseq  ;;  %p6856_p11 = scmp.ne.s32.totalorder %s10454_s29, %s6855_s20  ;;  %p10897_p0 = scmp.ne.s32.totalorder %s10537_s16, 0 }
  0x86   : > { %v7235_v12 = vld [vmem:[%s7156_s21 + $0x48] sm:$0xff]   ;;  %v7242_v13 = vld [vmem:[%s7156_s21 + $0x50] sm:$0xff]   ;;  %v7249_v14 = vld [vmem:[%s7156_s21 + $0x58] sm:$0xff]   ;;  %s6935_s28 = smov [#allocation8]  }
  0x87   : > { %v7256_v15 = vld [vmem:[%s7156_s21 + $0x60] sm:$0xff]   ;;  %v7263_v16 = vld [vmem:[%s7156_s21 + $0x68] sm:$0xff]   ;;  %v7270_v17 = vld [vmem:[%s7156_s21 + $0x70] sm:$0xff]   ;;  %p6857_p1 = pnand %p6856_p11, %p10897_p0  ;;  %s6859_s11 = sshll.u32 %s6935_s28, 4  ;;  %s6860_s11 = int_to_ptr.vmem [resolvable:$false] %s6859_s11 }
  0x88   : > { %923 = vmatpush1.bf16.msra.mxu0 %v6457_v27  ;;  %1113 = vmatpush1.bf16.msra.mxu1 %v6458_v28  ;;  %v7277_v18 = vld [vmem:[%s7156_s21 + $0x78] sm:$0xff]   ;;  %v6530_v19 = vld [vmem:[#allocation5 + $0x68] ss:$36 sps:$4 sm:$0xff]   ;;  %v6531_v20 = vld [vmem:[#allocation5 + $0xb0] ss:$36 sps:$4 sm:$0xff]   ;;  %v7328_v27 = vshrl.u32 %v327_v26, 7  ;;  %p6862_p7 = scmp.lt.s32.totalorder %s10454_s29, %s6860_s11 }
  0x89   : > { %924 = vmatprep.subr.bf16.mxu0 %v6459_v29  ;;  %1114 = vmatprep.subr.bf16.mxu1 %v6461_v30  ;;  %v6532_v21 = vld [vmem:[#allocation5 + $0xf8] ss:$36 sps:$4 sm:$0xff]   ;;  %v6533_v22 = vld [vmem:[#allocation5 + $0x140] ss:$36 sps:$4 sm:$0xff]   ;;  %v6534_v23 = vld [vmem:[#allocation5 + $0x188] ss:$36 sps:$4 sm:$0xff]   ;;  %p6858_p3 = pneg %p6857_p1 }
  0x8a   : > { %v6535_v24 = vld [vmem:[#allocation5 + $0x1d0] ss:$36 sps:$4 sm:$0xff]   ;;  %v6536_v25 = vld [vmem:[#allocation5 + $0x218] ss:$36 sps:$4 sm:$0xff]   ;;  %vm1866_vm0 = vcmp.lt.s32.totalorder %v7328_v27, 1  ;;  %vm2026_vm1 = vcmp.lt.s32.totalorder %v7328_v27, 7 }
  0x8b   : > { %vm330_vm2 = vcmp.ne.s32.totalorder %v7328_v27, 0  ;;  %s6861_s22 = scalar_lea.vmem %s6860_s11, 4096 }
  0x8c   : > { %925 = vmatpush1.bf16.msra.mxu0 %v6463_v31  ;;  %1115 = vmatpush1.bf16.msra.mxu1 %v6464_v32  ;;  %p6863_p9 = scmp.lt.s32.totalorder %s6861_s22, %s6855_s20 }
  0x8d   : > { %1292 = vmatprep.subr.bf16.mxu0 %v6468_v33  ;;  %1485 = vmatprep.subr.bf16.mxu1 %v6501_v44 }
  0x8e   : > { %p6864_p12 = por %p6863_p9, %p6862_p7 }
  0x8f   : > { %943 = vmatmul.mubr.bf16.vlgmr.msra.gmra.mrb[0].mxu0 %v7169_v34  ;;  %1133 = vmatmul.mubr.bf16.vlgmr.msra.gmra.mrb[0].mxu1 %v7169_v34 }
  0x90   : > { %1293 = vmatpush1.bf16.msra.mxu0 %v6466_v35  ;;  %952 = vmatprep.mubr.bf16.mxu0 %v10512_v0  ;;  %p6865_p2 = pnand %p6864_p12, %p6858_p3 }
  0x91   : > { %1142 = vmatprep.mubr.bf16.mxu1 %v10512_v0  ;;  %1294 = vmatprep.subr.bf16.mxu0 %v6473_v36 }
  0x92   : > { %1486 = vmatpush1.bf16.msra.mxu1 %v6499_v43 }
  0x93   : > { %1487 = vmatprep.subr.bf16.mxu1 %v6504_v46 }
  0x94   : > { %1295 = vmatpush1.bf16.msra.mxu0 %v6471_v37 }
  0x95   : > { %1296 = vmatprep.subr.bf16.mxu0 %v6478_v38 }
  0x96   : > { %1488 = vmatpush1.bf16.msra.mxu1 %v6502_v50 }
  0x97   : > { %953 = vmatmul.mubr.bf16.gmra.mrb[4].mxu0 %v7176_v39  ;;  %1143 = vmatmul.mubr.bf16.gmra.mrb[4].mxu1 %v7176_v39 }
  0x98   : > { %962 = vmatprep.mubr.bf16.mxu0 %v10512_v0  ;;  %1152 = vmatprep.mubr.bf16.mxu1 %v10512_v0 }
  0x99   : > { %1297 = vmatpush1.bf16.msra.mxu0 %v6476_v40  ;;  %1489 = vmatprep.subr.bf16.mxu1 %v6508_v51 }
  0x9a   : > { %1298 = vmatprep.subr.bf16.mxu0 %v6483_v41  ;;  %1490 = vmatpush1.bf16.msra.mxu1 %v6506_v53 }
  0x9b   : > { %1491 = vmatprep.subr.bf16.mxu1 %v6511_v55 }
  0x9d   : > { %1299 = vmatpush1.bf16.msra.mxu0 %v6481_v42 }
  0x9e   : > { %1300 = vmatprep.subr.bf16.mxu0 %v6488_v45  ;;  %1492 = vmatpush1.bf16.msra.mxu1 %v6509_v58 }
  0x9f   : > { %963 = vmatmul.mubr.bf16.gmra.mrb[8].mxu0 %v7183_v47  ;;  %1153 = vmatmul.mubr.bf16.gmra.mrb[8].mxu1 %v7183_v47 }
  0xa0   : > { %972 = vmatprep.mubr.bf16.mxu0 %v10512_v0  ;;  %1162 = vmatprep.mubr.bf16.mxu1 %v10512_v0 }
  0xa1   : > { %1301 = vmatpush1.bf16.msra.mxu0 %v6486_v48  ;;  %1493 = vmatprep.subr.bf16.mxu1 %v6518_v60 }
  0xa2   : > { %1302 = vmatprep.subr.bf16.mxu0 %v6493_v49  ;;  %1494 = vmatpush1.bf16.msra.mxu1 %v6516_v62 }
  0xa3   : > { %1495 = vmatprep.subr.bf16.mxu1 %v6521_v63 }
  0xa5   : > { %1303 = vmatpush1.bf16.msra.mxu0 %v6491_v52 }
  0xa6   : > { %1304 = vmatprep.subr.bf16.mxu0 %v6498_v54  ;;  %1496 = vmatpush1.bf16.msra.mxu1 %v6519_v3 }
  0xa7   : > { %973 = vmatmul.mubr.bf16.gmra.mrb[12].mxu0 %v7190_v56  ;;  %1163 = vmatmul.mubr.bf16.gmra.mrb[12].mxu1 %v7190_v56 }
  0xa8   : > { %982 = vmatprep.mubr.bf16.mxu0 %v10512_v0  ;;  %1172 = vmatprep.mubr.bf16.mxu1 %v10512_v0 }
  0xa9   : > { %1305 = vmatpush1.bf16.msra.mxu0 %v6496_v57  ;;  %1497 = vmatprep.subr.bf16.mxu1 %v6525_v4 }
  0xaa   : > { %1306 = vmatprep.subr.bf16.mxu0 %v6515_v59  ;;  %1498 = vmatpush1.bf16.msra.mxu1 %v6523_v5 }
  0xab   : > { %1499 = vmatprep.subr.bf16.mxu1 %v6528_v6 }
  0xad   : > { %1307 = vmatpush1.bf16.msra.mxu0 %v6513_v61 }
  0xae   : > { %6247 = vmatprep.subr.bf16.mxu0 %v7196_v1  ;;  %1500 = vmatpush1.bf16.msra.mxu1 %v6526_v8 }
  0xaf   : > { %983 = vmatmul.mubr.bf16.gmra.mrb[16].mxu0 %v7199_v2  ;;  %1173 = vmatmul.mubr.bf16.gmra.mrb[16].mxu1 %v7199_v2 }
  0xb0   : > { %992 = vmatprep.mubr.bf16.mxu0 %v10512_v0  ;;  %1182 = vmatprep.mubr.bf16.mxu1 %v10512_v0 }
  0xb7   : > { %993 = vmatmul.mubr.bf16.gmra.mrb[20].mxu0 %v7207_v7  ;;  %1183 = vmatmul.mubr.bf16.gmra.mrb[20].mxu1 %v7207_v7 }
  0xb8   : > { %1002 = vmatprep.mubr.bf16.mxu0 %v10512_v0  ;;  %1192 = vmatprep.mubr.bf16.mxu1 %v10512_v0 }
  0xbf   : > { %1003 = vmatmul.mubr.bf16.gmra.mrb[24].mxu0 %v7214_v9  ;;  %1193 = vmatmul.mubr.bf16.gmra.mrb[24].mxu1 %v7214_v9 }
  0xc0   : > { %1012 = vmatprep.mubr.bf16.mxu0 %v10512_v0  ;;  %1202 = vmatprep.mubr.bf16.mxu1 %v10512_v0 }
  0xc7   : > { %1013 = vmatmul.mubr.bf16.gmra.mrb[28].mxu0 %v7221_v10  ;;  %1203 = vmatmul.mubr.bf16.gmra.mrb[28].mxu1 %v7221_v10 }
  0xc8   : > { %1022 = vmatprep.mubr.bf16.mxu0 %v10512_v0  ;;  %1212 = vmatprep.mubr.bf16.mxu1 %v10512_v0 }
  0xcf   : > { %1023 = vmatmul.mubr.bf16.gmra.mrb[32].mxu0 %v7228_v11  ;;  %1213 = vmatmul.mubr.bf16.gmra.mrb[32].mxu1 %v7228_v11 }
  0xd0   : > { %1032 = vmatprep.mubr.bf16.mxu0 %v10512_v0  ;;  %1222 = vmatprep.mubr.bf16.mxu1 %v10512_v0 }
  0xd7   : > { %1033 = vmatmul.mubr.bf16.gmra.mrb[36].mxu0 %v7235_v12  ;;  %1223 = vmatmul.mubr.bf16.gmra.mrb[36].mxu1 %v7235_v12 }
  0xd8   : > { %1042 = vmatprep.mubr.bf16.mxu0 %v10512_v0  ;;  %1232 = vmatprep.mubr.bf16.mxu1 %v10512_v0 }
  0xdf   : > { %1043 = vmatmul.mubr.bf16.gmra.mrb[40].mxu0 %v7242_v13  ;;  %1233 = vmatmul.mubr.bf16.gmra.mrb[40].mxu1 %v7242_v13 }
  0xe0   : > { %1052 = vmatprep.mubr.bf16.mxu0 %v10512_v0  ;;  %1242 = vmatprep.mubr.bf16.mxu1 %v10512_v0 }
  0xe7   : > { %1053 = vmatmul.mubr.bf16.gmra.mrb[44].mxu0 %v7249_v14  ;;  %1243 = vmatmul.mubr.bf16.gmra.mrb[44].mxu1 %v7249_v14 }
  0xe8   : > { %1062 = vmatprep.mubr.bf16.mxu0 %v10512_v0  ;;  %1252 = vmatprep.mubr.bf16.mxu1 %v10512_v0 }
  0xef   : > { %1063 = vmatmul.mubr.bf16.gmra.mrb[48].mxu0 %v7256_v15  ;;  %1253 = vmatmul.mubr.bf16.gmra.mrb[48].mxu1 %v7256_v15 }
  0xf0   : > { %1072 = vmatprep.mubr.bf16.mxu0 %v10512_v0  ;;  %1262 = vmatprep.mubr.bf16.mxu1 %v10512_v0 }
  0xf7   : > { %1073 = vmatmul.mubr.bf16.gmra.mrb[52].mxu0 %v7263_v16  ;;  %1263 = vmatmul.mubr.bf16.gmra.mrb[52].mxu1 %v7263_v16 }
  0xf8   : > { %1082 = vmatprep.mubr.bf16.mxu0 %v10512_v0  ;;  %1272 = vmatprep.mubr.bf16.mxu1 %v10512_v0 }
  0xff   : > { %1083 = vmatmul.mubr.bf16.gmra.mrb[56].mxu0 %v7270_v17  ;;  %1273 = vmatmul.mubr.bf16.gmra.mrb[56].mxu1 %v7270_v17 }
 0x100   : > { %1092 = vmatprep.mubr.bf16.mxu0 %v10512_v0  ;;  %1282 = vmatprep.mubr.bf16.mxu1 %v10512_v0 }
 0x107   : > { %1093 = vmatmul.mubr.bf16.gmra.mrb[60].mxu0 %v7277_v18  ;;  %1283 = vmatmul.mubr.bf16.gmra.mrb[60].mxu1 %v7277_v18 }
 0x108   : > { %1324 = vmatprep.mubr.bf16.mxu0 %v10512_v0  ;;  %1517 = vmatprep.mubr.bf16.mxu1 %v10512_v0 }
 0x10f   : > { %1325 = vmatmul.mubr.bf16.vlgmr.msra.gmra.mrb[64].mxu0 %v7169_v34  ;;  %1518 = vmatmul.mubr.bf16.vlgmr.msra.gmra.mrb[64].mxu1 %v7169_v34 }
 0x110   : > { %6248 = vmatpush3.bf16.msra.mxu0 %v7196_v1  ;;  %1334 = vmatprep.mubr.bf16.mxu0 %v10512_v0 }
 0x111   : > { %1524 = vmatprep.mubr.bf16.mxu1 %v10512_v0  ;;  %6249 = vmatprep.subr.bf16.mxu0 %v6530_v19 }
 0x114   : > { %6250 = vmatpush3.bf16.msra.mxu0 %v6530_v19 }
 0x115   : > { %6251 = vmatprep.subr.bf16.mxu0 %v6531_v20 }
 0x117   : > { %1335 = vmatmul.mubr.bf16.gmra.mrb[68].mxu0 %v7176_v39  ;;  %1525 = vmatmul.mubr.bf16.gmra.mrb[68].mxu1 %v7176_v39 }
 0x118   : > { %1344 = vmatprep.mubr.bf16.mxu0 %v10512_v0  ;;  %1534 = vmatprep.mubr.bf16.mxu1 %v10512_v0 }
 0x119   : > { %6252 = vmatpush3.bf16.msra.mxu0 %v6531_v20 }
 0x11a   : > { %6253 = vmatprep.subr.bf16.mxu0 %v6532_v21 }
 0x11d   : > { %6254 = vmatpush3.bf16.msra.mxu0 %v6532_v21 }
 0x11e   : > { %6255 = vmatprep.subr.bf16.mxu0 %v6533_v22 }
 0x11f   : > { %1345 = vmatmul.mubr.bf16.gmra.mrb[72].mxu0 %v7183_v47  ;;  %1535 = vmatmul.mubr.bf16.gmra.mrb[72].mxu1 %v7183_v47 }
 0x120   : > { %1354 = vmatprep.mubr.bf16.mxu0 %v10512_v0  ;;  %1544 = vmatprep.mubr.bf16.mxu1 %v10512_v0 }
 0x121   : > { %6256 = vmatpush3.bf16.msra.mxu0 %v6533_v22 }
 0x122   : > { %6257 = vmatprep.subr.bf16.mxu0 %v6534_v23 }
 0x125   : > { %6258 = vmatpush3.bf16.msra.mxu0 %v6534_v23 }
 0x126   : > { %6259 = vmatprep.subr.bf16.mxu0 %v6535_v24 }
 0x127   : > { %1355 = vmatmul.mubr.bf16.gmra.mrb[76].mxu0 %v7190_v56  ;;  %1545 = vmatmul.mubr.bf16.gmra.mrb[76].mxu1 %v7190_v56 }
 0x128   : > { %1364 = vmatprep.mubr.bf16.mxu0 %v10512_v0  ;;  %1554 = vmatprep.mubr.bf16.mxu1 %v10512_v0 }
 0x129   : > { %6260 = vmatpush3.bf16.msra.mxu0 %v6535_v24 }
 0x12a   : > { %6261 = vmatprep.subr.bf16.mxu0 %v6536_v25 }
 0x12d   : > { %6262 = vmatpush3.bf16.msra.mxu0 %v6536_v25 }
 0x12f   : > { %1365 = vmatmul.mubr.bf16.gmra.mrb[80].mxu0 %v7199_v2  ;;  %1555 = vmatmul.mubr.bf16.gmra.mrb[80].mxu1 %v7199_v2 }
 0x130   : > { %1374 = vmatprep.mubr.bf16.mxu0 %v10512_v0  ;;  %1564 = vmatprep.mubr.bf16.mxu1 %v10512_v0 }
 0x137   : > { %1375 = vmatmul.mubr.bf16.gmra.mrb[84].mxu0 %v7207_v7  ;;  %1565 = vmatmul.mubr.bf16.gmra.mrb[84].mxu1 %v7207_v7 }
 0x138   : > { %1384 = vmatprep.mubr.bf16.mxu0 %v10512_v0  ;;  %1574 = vmatprep.mubr.bf16.mxu1 %v10512_v0 }
 0x13f   : > { %1385 = vmatmul.mubr.bf16.gmra.mrb[88].mxu0 %v7214_v9  ;;  %1575 = vmatmul.mubr.bf16.gmra.mrb[88].mxu1 %v7214_v9 }
 0x140   : > { %1394 = vmatprep.mubr.bf16.mxu0 %v10512_v0  ;;  %1584 = vmatprep.mubr.bf16.mxu1 %v10512_v0 }
 0x147   : > { %1395 = vmatmul.mubr.bf16.gmra.mrb[92].mxu0 %v7221_v10  ;;  %1585 = vmatmul.mubr.bf16.gmra.mrb[92].mxu1 %v7221_v10 }
 0x148   : > { %1404 = vmatprep.mubr.bf16.mxu0 %v10512_v0  ;;  %1594 = vmatprep.mubr.bf16.mxu1 %v10512_v0 }
 0x14f   : > { %1405 = vmatmul.mubr.bf16.gmra.mrb[96].mxu0 %v7228_v11  ;;  %1595 = vmatmul.mubr.bf16.gmra.mrb[96].mxu1 %v7228_v11 }
 0x150   : > { %1414 = vmatprep.mubr.bf16.mxu0 %v10512_v0  ;;  %1604 = vmatprep.mubr.bf16.mxu1 %v10512_v0 }
 0x157   : > { %1415 = vmatmul.mubr.bf16.gmra.mrb[100].mxu0 %v7235_v12  ;;  %1605 = vmatmul.mubr.bf16.gmra.mrb[100].mxu1 %v7235_v12 }
 0x158   : > { %1424 = vmatprep.mubr.bf16.mxu0 %v10512_v0  ;;  %1614 = vmatprep.mubr.bf16.mxu1 %v10512_v0 }
 0x15f   : > { %1425 = vmatmul.mubr.bf16.gmra.mrb[104].mxu0 %v7242_v13  ;;  %1615 = vmatmul.mubr.bf16.gmra.mrb[104].mxu1 %v7242_v13 }
 0x160   : > { %1434 = vmatprep.mubr.bf16.mxu0 %v10512_v0  ;;  %1624 = vmatprep.mubr.bf16.mxu1 %v10512_v0 }
 0x162   : > { %v7330_v28 = vpop.f32.mrb[0].mxu0  ;;  %v1134_v29 = vpop.f32.mrb[0].mxu1 }
 0x163   : > { %v7332_v30 = vpop.f32.mrb[1].mxu0  ;;  %v1995_v31 = vrot.slane %v1134_v29, 1  ;;  %v7334_v32 = vpop.f32.mrb[1].mxu1  ;;  %v10511_v37 = vrot.slane %v7330_v28, 7 }
 0x164   : > { %v948_v33 = vpop.f32.mrb[2].mxu0  ;;  %v10510_v35 = vrot.slane %v7334_v32, 7  ;;  %v1138_v36 = vpop.f32.mrb[2].mxu1 }
 0x165   : > { %v1836_v38 = vrot.slane %v948_v33, 7  ;;  %v7340_v40 = vpop.f32.mrb[3].mxu0  ;;  %v1996_v41 = vrot.slane %v1138_v36, 1  ;;  %v1140_v42 = vpop.f32.mrb[3].mxu1 }
 0x166   : > { %v2124_v43 = vrot.slane %v1140_v42, 7 }
 0x167   : > { %1435 = vmatmul.mubr.bf16.gmra.mrb[108].mxu0 %v7249_v14  ;;  %1625 = vmatmul.mubr.bf16.gmra.mrb[108].mxu1 %v7249_v14  ;;  %v7346_v44 = vsel %vm2026_vm1, %v1995_v31, %v1996_v41  ;;  %v7352_v45 = vsel %vm1866_vm0, %v10511_v37, %v1836_v38 }
 0x168   : > { %1444 = vmatprep.mubr.bf16.mxu0 %v10512_v0  ;;  %1634 = vmatprep.mubr.bf16.mxu1 %v10512_v0  ;;  %v7360_v46 = vsel %vm1866_vm0, %v10510_v35, %v2124_v43 }
 0x16a   : > { %v954_v48 = vpop.f32.mrb[4].mxu0  ;;  %v1144_v49 = vpop.f32.mrb[4].mxu1 }
 0x16b   : > { %v1837_v50 = vrot.slane %v954_v48, 7  ;;  %v7362_v51 = vpop.f32.mrb[5].mxu0  ;;  %v1997_v52 = vrot.slane %v1144_v49, 1  ;;  %v1146_v53 = vpop.f32.mrb[5].mxu1 }
 0x16c   : > { %v958_v54 = vpop.f32.mrb[6].mxu0  ;;  %v2125_v55 = vrot.slane %v1146_v53, 7  ;;  %v1148_v57 = vpop.f32.mrb[6].mxu1 }
 0x16d   : > { %v1838_v58 = vrot.slane %v958_v54, 7  ;;  %v7364_v59 = vpop.f32.mrb[7].mxu0  ;;  %v1998_v60 = vrot.slane %v1148_v57, 1  ;;  %v1150_v61 = vpop.f32.mrb[7].mxu1  ;;  %v7368_v62 = vsel %vm2026_vm1, %v1996_v41, %v1997_v52  ;;  %v7372_v63 = vsel %vm1866_vm0, %v1836_v38, %v1837_v50 }
 0x16e   : > { %v7376_v1 = vsel %vm1866_vm0, %v2124_v43, %v2125_v55  ;;  %v2126_v3 = vrot.slane %v1150_v61, 7 }
 0x16f   : > { %1445 = vmatmul.mubr.bf16.gmra.mrb[112].mxu0 %v7256_v15  ;;  %1635 = vmatmul.mubr.bf16.gmra.mrb[112].mxu1 %v7256_v15  ;;  %v7382_v4 = vsel %vm2026_vm1, %v1997_v52, %v1998_v60  ;;  %v7386_v5 = vsel %vm1866_vm0, %v1837_v50, %v1838_v58 }
 0x170   : > { %1454 = vmatprep.mubr.bf16.mxu0 %v10512_v0  ;;  %1644 = vmatprep.mubr.bf16.mxu1 %v10512_v0  ;;  %v7392_v6 = vsel %vm1866_vm0, %v2125_v55, %v2126_v3 }
 0x172   : > { %v964_v8 = vpop.f32.mrb[8].mxu0  ;;  %v1154_v19 = vpop.f32.mrb[8].mxu1 }
 0x173   : > { %v1839_v20 = vrot.slane %v964_v8, 7  ;;  %v7394_v21 = vpop.f32.mrb[9].mxu0  ;;  %v1999_v22 = vrot.slane %v1154_v19, 1  ;;  %v1156_v23 = vpop.f32.mrb[9].mxu1 }
 0x174   : > { %v968_v24 = vpop.f32.mrb[10].mxu0  ;;  %v2127_v25 = vrot.slane %v1156_v23, 7  ;;  %v1158_v26 = vpop.f32.mrb[10].mxu1 }
 0x175   : > { %v1840_v29 = vrot.slane %v968_v24, 7  ;;  %v7396_v31 = vpop.f32.mrb[11].mxu0  ;;  %v2000_v33 = vrot.slane %v1158_v26, 1  ;;  %v1160_v36 = vpop.f32.mrb[11].mxu1  ;;  %v7400_v38 = vsel %vm2026_vm1, %v1998_v60, %v1999_v22  ;;  %v7404_v41 = vsel %vm1866_vm0, %v1838_v58, %v1839_v20 }
 0x176   : > { %v7408_v42 = vsel %vm1866_vm0, %v2126_v3, %v2127_v25  ;;  %v2128_v43 = vrot.slane %v1160_v36, 7 }
 0x177   : > { %1455 = vmatmul.mubr.bf16.gmra.mrb[116].mxu0 %v7263_v16  ;;  %1645 = vmatmul.mubr.bf16.gmra.mrb[116].mxu1 %v7263_v16  ;;  %v7414_v48 = vsel %vm2026_vm1, %v1999_v22, %v2000_v33  ;;  %v7418_v49 = vsel %vm1866_vm0, %v1839_v20, %v1840_v29 }
 0x178   : > { %1464 = vmatprep.mubr.bf16.mxu0 %v10512_v0  ;;  %1654 = vmatprep.mubr.bf16.mxu1 %v10512_v0  ;;  %v7424_v50 = vsel %vm1866_vm0, %v2127_v25, %v2128_v43 }
 0x17a   : > { %v974_v52 = vpop.f32.mrb[12].mxu0  ;;  %v1164_v53 = vpop.f32.mrb[12].mxu1 }
 0x17b   : > { %v1841_v54 = vrot.slane %v974_v52, 7  ;;  %v7426_v55 = vpop.f32.mrb[13].mxu0  ;;  %v2001_v57 = vrot.slane %v1164_v53, 1  ;;  %v1166_v58 = vpop.f32.mrb[13].mxu1 }
 0x17c   : > { %v978_v60 = vpop.f32.mrb[14].mxu0  ;;  %v2129_v61 = vrot.slane %v1166_v58, 7  ;;  %v1168_v3 = vpop.f32.mrb[14].mxu1 }
 0x17d   : > { %v1842_v8 = vrot.slane %v978_v60, 7  ;;  %v7428_v19 = vpop.f32.mrb[15].mxu0  ;;  %v2002_v20 = vrot.slane %v1168_v3, 1  ;;  %v1170_v22 = vpop.f32.mrb[15].mxu1  ;;  %v7432_v23 = vsel %vm2026_vm1, %v2000_v33, %v2001_v57  ;;  %v7436_v24 = vsel %vm1866_vm0, %v1840_v29, %v1841_v54 }
 0x17e   : > { %10542 = vst [vmem:[#allocation12_spill] sm:$0xff] %v7428_v19  ;;  %v7440_v25 = vsel %vm1866_vm0, %v2128_v43, %v2129_v61  ;;  %v2130_v26 = vrot.slane %v1170_v22, 7 }
 0x17f   : > { %1465 = vmatmul.mubr.bf16.gmra.mrb[120].mxu0 %v7270_v17  ;;  %1655 = vmatmul.mubr.bf16.gmra.mrb[120].mxu1 %v7270_v17  ;;  %v7446_v36 = vsel %vm2026_vm1, %v2001_v57, %v2002_v20  ;;  %v7450_v33 = vsel %vm1866_vm0, %v1841_v54, %v1842_v8 }
 0x180   : > { %10543 = vst [vmem:[#allocation13_spill] sm:$0xff] %v7446_v36  ;;  %1474 = vmatprep.mubr.bf16.mxu0 %v10512_v0  ;;  %1664 = vmatprep.mubr.bf16.mxu1 %v10512_v0  ;;  %v7456_v29 = vsel %vm1866_vm0, %v2129_v61, %v2130_v26 }
 0x182   : > { %v984_v43 = vpop.f32.mrb[16].mxu0  ;;  %v1174_v52 = vpop.f32.mrb[16].mxu1 }
 0x183   : > { %v1843_v53 = vrot.slane %v984_v43, 7  ;;  %v7458_v58 = vpop.f32.mrb[17].mxu0  ;;  %v2003_v60 = vrot.slane %v1174_v52, 1  ;;  %v1176_v57 = vpop.f32.mrb[17].mxu1 }
 0x184   : > { %10544 = vst [vmem:[#allocation14_spill] sm:$0xff] %v7458_v58  ;;  %v988_v3 = vpop.f32.mrb[18].mxu0  ;;  %v2131_v22 = vrot.slane %v1176_v57, 7  ;;  %v1178_v35 = vpop.f32.mrb[18].mxu1 }
 0x185   : > { %v1844_v54 = vrot.slane %v988_v3, 7  ;;  %v7460_v37 = vpop.f32.mrb[19].mxu0  ;;  %v2004_v19 = vrot.slane %v1178_v35, 1  ;;  %v1180_v36 = vpop.f32.mrb[19].mxu1  ;;  %v7464_v0 = vsel %vm2026_vm1, %v2002_v20, %v2003_v60  ;;  %v7468_v61 = vsel %vm1866_vm0, %v1842_v8, %v1843_v53 }
 0x186   : > { %10545 = vst [vmem:[#allocation15_spill] sm:$0xff] %v7460_v37  ;;  %10546 = vst [vmem:[#allocation16_spill] sm:$0xff] %v7464_v0  ;;  %v7472_v43 = vsel %vm1866_vm0, %v2130_v26, %v2131_v22  ;;  %v2132_v52 = vrot.slane %v1180_v36, 7  ;;  %v10552_v26 = vmov 0  }
 0x187   : > { %10547 = vst [vmem:[#allocation17_spill] sm:$0xff] %v7468_v61  ;;  %10548 = vst [vmem:[#allocation18_spill] sm:$0xff] %v7472_v43  ;;  %1475 = vmatmul.mubr.bf16.gmra.mrb[124].mxu0 %v7277_v18  ;;  %1665 = vmatmul.mubr.bf16.gmra.mrb[124].mxu1 %v7277_v18  ;;  %v7478_v35 = vsel %vm2026_vm1, %v2003_v60, %v2004_v19  ;;  %v7482_v20 = vsel %vm1866_vm0, %v1843_v53, %v1844_v54 }
 0x188   : > { %10549 = vst [vmem:[#allocation19_spill] sm:$0xff] %v7478_v35  ;;  %10550 = vst [vmem:[#allocation20_spill] sm:$0xff] %v7482_v20  ;;  %6263 = vmatprep.mubr.bf16.mxu0 %v7169_v34  ;;  %v7487_v8 = vsel %vm1866_vm0, %v2131_v22, %v2132_v52  ;;  %3519 = vmatprep.mubr.bf16.mxu1 %v10552_v26 }
 0x189   : > { %10551 = vst [vmem:[#allocation21_spill] sm:$0xff] %v7487_v8 }
 0x18a   : > { %v994_v36 = vpop.f32.mrb[20].mxu0  ;;  %v1184_v57 = vpop.f32.mrb[20].mxu1 }
 0x18b   : > { %v1845_v3 = vrot.slane %v994_v36, 7  ;;  %v7490_v37 = vpop.f32.mrb[21].mxu0  ;;  %v2005_v58 = vrot.slane %v1184_v57, 1  ;;  %v1186_v60 = vpop.f32.mrb[21].mxu1 }
 0x18c   : > { %10553 = vst [vmem:[#allocation22_spill] sm:$0xff] %v7490_v37  ;;  %v998_v35 = vpop.f32.mrb[22].mxu0  ;;  %v2133_v61 = vrot.slane %v1186_v60, 7  ;;  %v1188_v43 = vpop.f32.mrb[22].mxu1 }
 0x18d   : > { %v1846_v53 = vrot.slane %v998_v35, 7  ;;  %v7492_v20 = vpop.f32.mrb[23].mxu0  ;;  %v2006_v34 = vrot.slane %v1188_v43, 1  ;;  %v1190_v0 = vpop.f32.mrb[23].mxu1  ;;  %v7496_v22 = vsel %vm2026_vm1, %v2004_v19, %v2005_v58  ;;  %v7500_v8 = vsel %vm1866_vm0, %v1844_v54, %v1845_v3 }
 0x18e   : > { %10554 = vst [vmem:[#allocation23_spill] sm:$0xff] %v7492_v20  ;;  %10555 = vst [vmem:[#allocation24_spill] sm:$0xff] %v7500_v8  ;;  %v7504_v36 = vsel %vm1866_vm0, %v2132_v52, %v2133_v61  ;;  %v2134_v57 = vrot.slane %v1190_v0, 7 }
 0x18f   : > { %10556 = vst [vmem:[#allocation25_spill] sm:$0xff] %v7504_v36  ;;  %6264 = vmatmul.mubr.bf16.vlgmr.msra.gmra.mrb[128].mxu0 %v7176_v39  ;;  %v7509_v35 = vsel %vm2026_vm1, %v2005_v58, %v2006_v34  ;;  %v7513_v43 = vsel %vm1866_vm0, %v1845_v3, %v1846_v53 }
 0x190   : > { %10557 = vst [vmem:[#allocation26_spill] sm:$0xff] %v7509_v35  ;;  %10558 = vst [vmem:[#allocation27_spill] sm:$0xff] %v7513_v43  ;;  %6267 = vmatprep.mubr.bf16.mxu0 %v7183_v47  ;;  %v7518_v19 = vsel %vm1866_vm0, %v2133_v61, %v2134_v57 }
 0x192   : > { %v1004_v54 = vpop.f32.mrb[24].mxu0  ;;  %v1194_v52 = vpop.f32.mrb[24].mxu1 }
 0x193   : > { %v1847_v60 = vrot.slane %v1004_v54, 7  ;;  %v7520_v0 = vpop.f32.mrb[25].mxu0  ;;  %v2007_v39 = vrot.slane %v1194_v52, 1  ;;  %v1196_v20 = vpop.f32.mrb[25].mxu1 }
 0x194   : > { %10559 = vst [vmem:[#allocation28_spill] sm:$0xff] %v7520_v0  ;;  %v1008_v37 = vpop.f32.mrb[26].mxu0  ;;  %v2135_v58 = vrot.slane %v1196_v20, 7  ;;  %v1198_v35 = vpop.f32.mrb[26].mxu1  ;;  %v6539_v20 = vld [vmem:[#allocation7 + $0x4] ss:$36 sps:$4 sm:$0xff]  }
 0x195   : > { %v1848_v8 = vrot.slane %v1008_v37, 7  ;;  %v7522_v36 = vpop.f32.mrb[27].mxu0  ;;  %v2008_v3 = vrot.slane %v1198_v35, 1  ;;  %v1200_v43 = vpop.f32.mrb[27].mxu1  ;;  %v7526_v47 = vsel %vm2026_vm1, %v2006_v34, %v2007_v39  ;;  %v7530_v61 = vsel %vm1866_vm0, %v1846_v53, %v1847_v60  ;;  %v6537_v37 = vld [vmem:[#allocation7] ss:$36 sps:$4 sm:$0xff]   ;;  %3487 = vmatprep.subr.bf16.mxu1 %v6539_v20 }
 0x196   : > { %10560 = vst [vmem:[#allocation29_spill] sm:$0xff] %v7522_v36  ;;  %10561 = vst [vmem:[#allocation30_spill] sm:$0xff] %v7526_v47  ;;  %v7534_v54 = vsel %vm1866_vm0, %v2134_v57, %v2135_v58  ;;  %v2136_v52 = vrot.slane %v1200_v43, 7  ;;  %3488 = vmatpush1.bf16.msra.mxu1 %v6537_v37 }
 0x197   : > { %10562 = vst [vmem:[#allocation31_spill] sm:$0xff] %v7530_v61  ;;  %10563 = vst [vmem:[#allocation32_spill] sm:$0xff] %v7534_v54  ;;  %6268 = vmatmul.mubr.bf16.gmra.mrb[132].mxu0 %v7190_v56  ;;  %v7539_v35 = vsel %vm2026_vm1, %v2007_v39, %v2008_v3  ;;  %v7543_v34 = vsel %vm1866_vm0, %v1847_v60, %v1848_v8 }
 0x198   : > { %10564 = vst [vmem:[#allocation33_spill] sm:$0xff] %v7539_v35  ;;  %10565 = vst [vmem:[#allocation34_spill] sm:$0xff] %v7543_v34  ;;  %6271 = vmatprep.mubr.bf16.mxu0 %v7199_v2  ;;  %v7548_v53 = vsel %vm1866_vm0, %v2135_v58, %v2136_v52 }
 0x19a   : > { %v1014_v57 = vpop.f32.mrb[28].mxu0  ;;  %v1204_v43 = vpop.f32.mrb[28].mxu1 }
 0x19b   : > { %v1849_v56 = vrot.slane %v1014_v57, 7  ;;  %v7550_v36 = vpop.f32.mrb[29].mxu0  ;;  %v2009_v0 = vrot.slane %v1204_v43, 1  ;;  %v1206_v39 = vpop.f32.mrb[29].mxu1 }
 0x19c   : > { %10566 = vst [vmem:[#allocation35_spill] sm:$0xff] %v7550_v36  ;;  %v1018_v35 = vpop.f32.mrb[30].mxu0  ;;  %v2137_v61 = vrot.slane %v1206_v39, 7  ;;  %v1208_v54 = vpop.f32.mrb[30].mxu1 }
 0x19d   : > { %v1850_v60 = vrot.slane %v1018_v35, 7  ;;  %v7552_v34 = vpop.f32.mrb[31].mxu0  ;;  %v2010_v2 = vrot.slane %v1208_v54, 1  ;;  %v1210_v47 = vpop.f32.mrb[31].mxu1  ;;  %v7556_v58 = vsel %vm2026_vm1, %v2008_v3, %v2009_v0  ;;  %v7560_v37 = vsel %vm1866_vm0, %v1848_v8, %v1849_v56 }
 0x19e   : > { %10567 = vst [vmem:[#allocation36_spill] sm:$0xff] %v7552_v34  ;;  %10568 = vst [vmem:[#allocation37_spill] sm:$0xff] %v7560_v37  ;;  %v7564_v20 = vsel %vm1866_vm0, %v2136_v52, %v2137_v61  ;;  %v2138_v57 = vrot.slane %v1210_v47, 7 }
 0x19f   : > { %6272 = vmatmul.mubr.bf16.gmra.mrb[136].mxu0 %v7207_v7  ;;  %v7569_v35 = vsel %vm2026_vm1, %v2009_v0, %v2010_v2  ;;  %v7573_v54 = vsel %vm1866_vm0, %v1849_v56, %v1850_v60 }
 0x1a0   : > { %10569 = vst [vmem:[#allocation38_spill] sm:$0xff] %v7569_v35  ;;  %10570 = vst [vmem:[#allocation39_spill] sm:$0xff] %v7573_v54  ;;  %6275 = vmatprep.mubr.bf16.mxu0 %v7214_v9  ;;  %v7578_v8 = vsel %vm1866_vm0, %v2137_v61, %v2138_v57 }
 0x1a2   : > { %v1024_v3 = vpop.f32.mrb[32].mxu0  ;;  %v1214_v52 = vpop.f32.mrb[32].mxu1 }
 0x1a3   : > { %v1851_v43 = vrot.slane %v1024_v3, 7  ;;  %v7580_v47 = vpop.f32.mrb[33].mxu0  ;;  %v2011_v7 = vrot.slane %v1214_v52, 1  ;;  %v1216_v39 = vpop.f32.mrb[33].mxu1 }
 0x1a4   : > { %10571 = vst [vmem:[#allocation40_spill] sm:$0xff] %v7580_v47  ;;  %v1028_v34 = vpop.f32.mrb[34].mxu0  ;;  %v2139_v0 = vrot.slane %v1216_v39, 7  ;;  %v1218_v35 = vpop.f32.mrb[34].mxu1  ;;  %v6540_v39 = vld [vmem:[#allocation7 + $0x48] ss:$36 sps:$4 sm:$0xff]  }
 0x1a5   : > { %v1852_v36 = vrot.slane %v1028_v34, 7  ;;  %v7582_v37 = vpop.f32.mrb[35].mxu0  ;;  %v7586_v9 = vsel %vm2026_vm1, %v2010_v2, %v2011_v7  ;;  %v2012_v56 = vrot.slane %v1218_v35, 1  ;;  %v1220_v61 = vpop.f32.mrb[35].mxu1  ;;  %v7590_v54 = vsel %vm1866_vm0, %v1850_v60, %v1851_v43  ;;  %v6542_v2 = vld [vmem:[#allocation7 + $0x4c] ss:$36 sps:$4 sm:$0xff]  }
 0x1a6   : > { %10572 = vst [vmem:[#allocation41_spill] sm:$0xff] %v7582_v37  ;;  %10573 = vst [vmem:[#allocation42_spill] sm:$0xff] %v7590_v54  ;;  %v7594_v3 = vsel %vm1866_vm0, %v2138_v57, %v2139_v0  ;;  %v2140_v52 = vrot.slane %v1220_v61, 7  ;;  %3489 = vmatprep.subr.bf16.mxu1 %v6542_v2 }
 0x1a7   : > { %10574 = vst [vmem:[#allocation43_spill] sm:$0xff] %v7594_v3  ;;  %6276 = vmatmul.mubr.bf16.gmra.mrb[140].mxu0 %v7221_v10  ;;  %v7599_v34 = vsel %vm2026_vm1, %v2011_v7, %v2012_v56  ;;  %v7603_v35 = vsel %vm1866_vm0, %v1851_v43, %v1852_v36  ;;  %3490 = vmatpush1.bf16.msra.mxu1 %v6540_v39 }
 0x1a8   : > { %10575 = vst [vmem:[#allocation44_spill] sm:$0xff] %v7599_v34  ;;  %10576 = vst [vmem:[#allocation45_spill] sm:$0xff] %v7603_v35  ;;  %6279 = vmatprep.mubr.bf16.mxu0 %v7228_v11  ;;  %v7608_v60 = vsel %vm1866_vm0, %v2139_v0, %v2140_v52 }
 0x1aa   : > { %v1034_v57 = vpop.f32.mrb[36].mxu0  ;;  %v1224_v61 = vpop.f32.mrb[36].mxu1 }
 0x1ab   : > { %v1853_v10 = vrot.slane %v1034_v57, 7  ;;  %v7610_v37 = vpop.f32.mrb[37].mxu0  ;;  %v2013_v7 = vrot.slane %v1224_v61, 1  ;;  %v1226_v34 = vpop.f32.mrb[37].mxu1 }
 0x1ac   : > { %10577 = vst [vmem:[#allocation46_spill] sm:$0xff] %v7610_v37  ;;  %v1038_v47 = vpop.f32.mrb[38].mxu0  ;;  %v2141_v54 = vrot.slane %v1226_v34, 7  ;;  %v1228_v3 = vpop.f32.mrb[38].mxu1 }
 0x1ad   : > { %v1854_v43 = vrot.slane %v1038_v47, 7  ;;  %v7612_v35 = vpop.f32.mrb[39].mxu0  ;;  %v7616_v11 = vsel %vm2026_vm1, %v2012_v56, %v2013_v7  ;;  %v2014_v0 = vrot.slane %v1228_v3, 1  ;;  %v1230_v2 = vpop.f32.mrb[39].mxu1  ;;  %v7620_v39 = vsel %vm1866_vm0, %v1852_v36, %v1853_v10 }
 0x1ae   : > { %10578 = vst [vmem:[#allocation47_spill] sm:$0xff] %v7612_v35  ;;  %10579 = vst [vmem:[#allocation48_spill] sm:$0xff] %v7620_v39  ;;  %v7624_v57 = vsel %vm1866_vm0, %v2140_v52, %v2141_v54  ;;  %v2142_v61 = vrot.slane %v1230_v2, 7 }
 0x1af   : > { %10580 = vst [vmem:[#allocation49_spill] sm:$0xff] %v7624_v57  ;;  %6280 = vmatmul.mubr.bf16.gmra.mrb[144].mxu0 %v7235_v12  ;;  %v7629_v47 = vsel %vm2026_vm1, %v2013_v7, %v2014_v0  ;;  %v7633_v56 = vsel %vm1866_vm0, %v1853_v10, %v1854_v43 }
 0x1b0   : > { %10581 = vst [vmem:[#allocation50_spill] sm:$0xff] %v7629_v47  ;;  %10582 = vst [vmem:[#allocation51_spill] sm:$0xff] %v7633_v56  ;;  %6283 = vmatprep.mubr.bf16.mxu0 %v7242_v13  ;;  %v7638_v36 = vsel %vm1866_vm0, %v2141_v54, %v2142_v61 }
 0x1b2   : > { %v1044_v3 = vpop.f32.mrb[40].mxu0  ;;  %v1234_v52 = vpop.f32.mrb[40].mxu1 }
 0x1b3   : > { %v1855_v34 = vrot.slane %v1044_v3, 7  ;;  %v7640_v2 = vpop.f32.mrb[41].mxu0  ;;  %v2015_v12 = vrot.slane %v1234_v52, 1  ;;  %v1236_v35 = vpop.f32.mrb[41].mxu1 }
 0x1b4   : > { %10583 = vst [vmem:[#allocation52_spill] sm:$0xff] %v7640_v2  ;;  %v1048_v37 = vpop.f32.mrb[42].mxu0  ;;  %v2143_v7 = vrot.slane %v1236_v35, 7  ;;  %v1238_v47 = vpop.f32.mrb[42].mxu1  ;;  %v6543_v35 = vld [vmem:[#allocation7 + $0x90] ss:$36 sps:$4 sm:$0xff]  }
 0x1b5   : > { %v1856_v39 = vrot.slane %v1048_v37, 7  ;;  %v7642_v57 = vpop.f32.mrb[43].mxu0  ;;  %v7646_v13 = vsel %vm2026_vm1, %v2014_v0, %v2015_v12  ;;  %v2016_v10 = vrot.slane %v1238_v47, 1  ;;  %v1240_v54 = vpop.f32.mrb[43].mxu1  ;;  %v7650_v56 = vsel %vm1866_vm0, %v1854_v43, %v1855_v34  ;;  %v6545_v0 = vld [vmem:[#allocation7 + $0x94] ss:$36 sps:$4 sm:$0xff]  }
 0x1b6   : > { %10584 = vst [vmem:[#allocation53_spill] sm:$0xff] %v7642_v57  ;;  %10585 = vst [vmem:[#allocation54_spill] sm:$0xff] %v7650_v56  ;;  %v7654_v3 = vsel %vm1866_vm0, %v2142_v61, %v2143_v7  ;;  %v2144_v52 = vrot.slane %v1240_v54, 7  ;;  %3491 = vmatprep.subr.bf16.mxu1 %v6545_v0 }
 0x1b7   : > { %10586 = vst [vmem:[#allocation55_spill] sm:$0xff] %v7654_v3  ;;  %6284 = vmatmul.mubr.bf16.gmra.mrb[148].mxu0 %v7249_v14  ;;  %v7659_v37 = vsel %vm2026_vm1, %v2015_v12, %v2016_v10  ;;  %v7663_v47 = vsel %vm1866_vm0, %v1855_v34, %v1856_v39  ;;  %3492 = vmatpush1.bf16.msra.mxu1 %v6543_v35 }
 0x1b8   : > { %10587 = vst [vmem:[#allocation56_spill] sm:$0xff] %v7659_v37  ;;  %10588 = vst [vmem:[#allocation57_spill] sm:$0xff] %v7663_v47  ;;  %6287 = vmatprep.mubr.bf16.mxu0 %v7256_v15  ;;  %v7668_v43 = vsel %vm1866_vm0, %v2143_v7, %v2144_v52 }
 0x1ba   : > { %v1054_v61 = vpop.f32.mrb[44].mxu0  ;;  %v1244_v54 = vpop.f32.mrb[44].mxu1 }
 0x1bb   : > { %v1857_v14 = vrot.slane %v1054_v61, 7  ;;  %v7670_v57 = vpop.f32.mrb[45].mxu0  ;;  %v2017_v12 = vrot.slane %v1244_v54, 1  ;;  %v1246_v37 = vpop.f32.mrb[45].mxu1 }
 0x1bc   : > { %10589 = vst [vmem:[#allocation58_spill] sm:$0xff] %v7670_v57  ;;  %v1058_v2 = vpop.f32.mrb[46].mxu0  ;;  %v2145_v56 = vrot.slane %v1246_v37, 7  ;;  %v1248_v3 = vpop.f32.mrb[46].mxu1 }
 0x1bd   : > { %v1858_v34 = vrot.slane %v1058_v2, 7  ;;  %v7672_v47 = vpop.f32.mrb[47].mxu0  ;;  %v7676_v15 = vsel %vm2026_vm1, %v2016_v10, %v2017_v12  ;;  %v2018_v7 = vrot.slane %v1248_v3, 1  ;;  %v1250_v0 = vpop.f32.mrb[47].mxu1  ;;  %v7680_v35 = vsel %vm1866_vm0, %v1856_v39, %v1857_v14 }
 0x1be   : > { %10590 = vst [vmem:[#allocation59_spill] sm:$0xff] %v7672_v47  ;;  %10591 = vst [vmem:[#allocation60_spill] sm:$0xff] %v7680_v35  ;;  %v7684_v61 = vsel %vm1866_vm0, %v2144_v52, %v2145_v56  ;;  %v2146_v54 = vrot.slane %v1250_v0, 7 }
 0x1bf   : > { %10592 = vst [vmem:[#allocation61_spill] sm:$0xff] %v7684_v61  ;;  %6288 = vmatmul.mubr.bf16.gmra.mrb[152].mxu0 %v7263_v16  ;;  %v7689_v2 = vsel %vm2026_vm1, %v2017_v12, %v2018_v7  ;;  %v7693_v10 = vsel %vm1866_vm0, %v1857_v14, %v1858_v34 }
 0x1c0   : > { %10593 = vst [vmem:[#allocation62_spill] sm:$0xff] %v7689_v2  ;;  %10594 = vst [vmem:[#allocation63_spill] sm:$0xff] %v7693_v10  ;;  %6291 = vmatprep.mubr.bf16.mxu0 %v7270_v17  ;;  %v7698_v39 = vsel %vm1866_vm0, %v2145_v56, %v2146_v54 }
 0x1c2   : > { %v1064_v3 = vpop.f32.mrb[48].mxu0  ;;  %v1254_v52 = vpop.f32.mrb[48].mxu1 }
 0x1c3   : > { %v1859_v37 = vrot.slane %v1064_v3, 7  ;;  %v7700_v0 = vpop.f32.mrb[49].mxu0  ;;  %v2019_v16 = vrot.slane %v1254_v52, 1  ;;  %v1256_v47 = vpop.f32.mrb[49].mxu1 }
 0x1c4   : > { %10595 = vst [vmem:[#allocation64_spill] sm:$0xff] %v7700_v0  ;;  %v1068_v57 = vpop.f32.mrb[50].mxu0  ;;  %v2147_v12 = vrot.slane %v1256_v47, 7  ;;  %v1258_v2 = vpop.f32.mrb[50].mxu1  ;;  %v6546_v47 = vld [vmem:[#allocation7 + $0xd8] ss:$36 sps:$4 sm:$0xff]  }
 0x1c5   : > { %v1860_v35 = vrot.slane %v1068_v57, 7  ;;  %v7702_v61 = vpop.f32.mrb[51].mxu0  ;;  %v7706_v17 = vsel %vm2026_vm1, %v2018_v7, %v2019_v16  ;;  %v2020_v14 = vrot.slane %v1258_v2, 1  ;;  %v1260_v56 = vpop.f32.mrb[51].mxu1  ;;  %v7710_v10 = vsel %vm1866_vm0, %v1858_v34, %v1859_v37  ;;  %v6548_v7 = vld [vmem:[#allocation7 + $0xdc] ss:$36 sps:$4 sm:$0xff]  }
 0x1c6   : > { %10596 = vst [vmem:[#allocation65_spill] sm:$0xff] %v7702_v61  ;;  %10597 = vst [vmem:[#allocation66_spill] sm:$0xff] %v7710_v10  ;;  %v7714_v3 = vsel %vm1866_vm0, %v2146_v54, %v2147_v12  ;;  %v2148_v52 = vrot.slane %v1260_v56, 7  ;;  %3493 = vmatprep.subr.bf16.mxu1 %v6548_v7 }
 0x1c7   : > { %10598 = vst [vmem:[#allocation67_spill] sm:$0xff] %v7714_v3  ;;  %6292 = vmatmul.mubr.bf16.gmra.mrb[156].mxu0 %v7277_v18  ;;  %v7719_v57 = vsel %vm2026_vm1, %v2019_v16, %v2020_v14  ;;  %v7723_v2 = vsel %vm1866_vm0, %v1859_v37, %v1860_v35  ;;  %3494 = vmatpush1.bf16.msra.mxu1 %v6546_v47 }
 0x1c8   : > { %10599 = vst [vmem:[#allocation68_spill] sm:$0xff] %v7719_v57  ;;  %10600 = vst [vmem:[#allocation69_spill] sm:$0xff] %v7723_v2  ;;  %v7727_v34 = vsel %vm1866_vm0, %v2147_v12, %v2148_v52  ;;  %3709 = vmatprep.mubr.bf16.mxu0 %v10552_v26 }
 0x1c9   : > { %10601 = vst [vmem:[#allocation70_spill] sm:$0xff] %v7727_v34 }
 0x1ca   : > { %v1074_v54 = vpop.f32.mrb[52].mxu0  ;;  %v1264_v56 = vpop.f32.mrb[52].mxu1 }
 0x1cb   : > { %v1861_v18 = vrot.slane %v1074_v54, 7  ;;  %v7730_v61 = vpop.f32.mrb[53].mxu0  ;;  %v2021_v16 = vrot.slane %v1264_v56, 1  ;;  %v1266_v57 = vpop.f32.mrb[53].mxu1 }
 0x1cc   : > { %10602 = vst [vmem:[#allocation71_spill] sm:$0xff] %v7730_v61  ;;  %v1078_v0 = vpop.f32.mrb[54].mxu0  ;;  %v2149_v10 = vrot.slane %v1266_v57, 7  ;;  %v1268_v3 = vpop.f32.mrb[54].mxu1 }
 0x1cd   : > { %v1862_v37 = vrot.slane %v1078_v0, 7  ;;  %v7732_v2 = vpop.f32.mrb[55].mxu0  ;;  %v7736_v12 = vsel %vm2026_vm1, %v2020_v14, %v2021_v16  ;;  %v2022_v26 = vrot.slane %v1268_v3, 1  ;;  %v1270_v7 = vpop.f32.mrb[55].mxu1  ;;  %v7740_v47 = vsel %vm1866_vm0, %v1860_v35, %v1861_v18 }
 0x1ce   : > { %10603 = vst [vmem:[#allocation72_spill] sm:$0xff] %v7732_v2  ;;  %10604 = vst [vmem:[#allocation73_spill] sm:$0xff] %v7736_v12  ;;  %v7744_v54 = vsel %vm1866_vm0, %v2148_v52, %v2149_v10  ;;  %v2150_v56 = vrot.slane %v1270_v7, 7 }
 0x1cf   : > { %10605 = vst [vmem:[#allocation74_spill] sm:$0xff] %v7740_v47  ;;  %10606 = vst [vmem:[#allocation75_spill] sm:$0xff] %v7744_v54  ;;  %v7748_v0 = vsel %vm2026_vm1, %v2021_v16, %v2022_v26  ;;  %v7752_v57 = vsel %vm1866_vm0, %v1861_v18, %v1862_v37 }
 0x1d0   : > { %10607 = vst [vmem:[#allocation76_spill] sm:$0xff] %v7748_v0  ;;  %10608 = vst [vmem:[#allocation77_spill] sm:$0xff] %v7752_v57  ;;  %v7756_v14 = vsel %vm1866_vm0, %v2149_v10, %v2150_v56 }
 0x1d1   : > { %10609 = vst [vmem:[#allocation78_spill] sm:$0xff] %v7756_v14 }
 0x1d2   : > { %v1084_v3 = vpop.f32.mrb[56].mxu0  ;;  %v1274_v35 = vpop.f32.mrb[56].mxu1 }
 0x1d3   : > { %v1863_v2 = vrot.slane %v1084_v3, 7  ;;  %v7758_v61 = vpop.f32.mrb[57].mxu0  ;;  %v2023_v52 = vrot.slane %v1274_v35, 1  ;;  %v1276_v47 = vpop.f32.mrb[57].mxu1 }
 0x1d4   : > { %10610 = vst [vmem:[#allocation79_spill] sm:$0xff] %v7758_v61  ;;  %v1088_v7 = vpop.f32.mrb[58].mxu0  ;;  %v2151_v54 = vrot.slane %v1276_v47, 7  ;;  %v1278_v12 = vpop.f32.mrb[58].mxu1 }
 0x1d5   : > { %v1864_v16 = vrot.slane %v1088_v7, 7  ;;  %v7760_v0 = vpop.f32.mrb[59].mxu0  ;;  %v7764_v18 = vsel %vm2026_vm1, %v2022_v26, %v2023_v52  ;;  %v2024_v57 = vrot.slane %v1278_v12, 1  ;;  %v1280_v10 = vpop.f32.mrb[59].mxu1  ;;  %v7768_v14 = vsel %vm1866_vm0, %v1862_v37, %v1863_v2  ;;  %v6549_v7 = vld [vmem:[#allocation7 + $0x120] ss:$36 sps:$4 sm:$0xff]  }
 0x1d6   : > { %10611 = vst [vmem:[#allocation80_spill] sm:$0xff] %v7760_v0  ;;  %10612 = vst [vmem:[#allocation81_spill] sm:$0xff] %v7764_v18  ;;  %v7772_v3 = vsel %vm1866_vm0, %v2150_v56, %v2151_v54  ;;  %v2152_v35 = vrot.slane %v1280_v10, 7  ;;  %v6551_v0 = vld [vmem:[#allocation7 + $0x124] ss:$36 sps:$4 sm:$0xff]  }
 0x1d7   : > { %10613 = vst [vmem:[#allocation82_spill] sm:$0xff] %v7768_v14  ;;  %10614 = vst [vmem:[#allocation83_spill] sm:$0xff] %v7772_v3  ;;  %v7776_v47 = vsel %vm2026_vm1, %v2023_v52, %v2024_v57  ;;  %v7780_v26 = vsel %vm1866_vm0, %v1863_v2, %v1864_v16  ;;  %3495 = vmatprep.subr.bf16.mxu1 %v6551_v0 }
 0x1d8   : > { %10615 = vst [vmem:[#allocation84_spill] sm:$0xff] %v7776_v47  ;;  %10616 = vst [vmem:[#allocation85_spill] sm:$0xff] %v7780_v26  ;;  %v7784_v12 = vsel %vm1866_vm0, %v2151_v54, %v2152_v35  ;;  %3496 = vmatpush1.bf16.msra.mxu1 %v6549_v7  ;;  %v10620_v7 = vrot.slane %v7330_v28, 7 }
 0x1d9   : > { %10617 = vst [vmem:[#allocation86_spill] sm:$0xff] %v7784_v12  ;;  %v6552_v12 = vld [vmem:[#allocation7 + $0x168] ss:$36 sps:$4 sm:$0xff]  }
 0x1da   : > { %v1094_v37 = vpop.f32.mrb[60].mxu0  ;;  %v1284_v61 = vpop.f32.mrb[60].mxu1 }
 0x1db   : > { %v1095_v56 = vpop.f32.mrb[61].mxu0  ;;  %v2025_v10 = vrot.slane %v1284_v61, 1  ;;  %v1286_v14 = vpop.f32.mrb[61].mxu1 }
 0x1dc   : > { %v1096_v3 = vpop.f32.mrb[62].mxu0  ;;  %v2153_v52 = vrot.slane %v1286_v14, 7  ;;  %v1288_v47 = vpop.f32.mrb[62].mxu1 }
 0x1dd   : > { %v1865_v18 = vrot.slane %v1096_v3, 7  ;;  %v7788_v34 = vsel %vm2026_vm1, %v2024_v57, %v2025_v10  ;;  %v1098_v2 = vpop.f32.mrb[63].mxu0  ;;  %v1289_v16 = vpop.f32.mrb[63].mxu1  ;;  %v10622_v57 = vrot.slane %v7334_v32, 7 }
 0x1de   : > { %10618 = vst [vmem:[#allocation87_spill] sm:$0xff] %v7788_v34  ;;  %v7792_v54 = vsel %vm1866_vm0, %v2152_v35, %v2153_v52  ;;  %v2154_v0 = vrot.slane %v1289_v16, 7 }
 0x1df   : > { %10619 = vst [vmem:[#allocation88_spill] sm:$0xff] %v7792_v54  ;;  %v1896_v61 = vsel %vm1866_vm0, %v1865_v18, %v10620_v7 }
 0x1e0   : > { %v7801_v14 = vsel %vm1866_vm0, %v2153_v52, %v2154_v0  ;;  %v2186_v3 = vsel %vm1866_vm0, %v2154_v0, %v10622_v57  ;;  %v7814_v0 = vadd.s32 8, %v7328_v27 }
 0x1e1   : > { %10621 = vst [vmem:[#allocation89_spill] sm:$0xff] %v7801_v14  ;;  %v2187_v35 = vsel %vm330_vm2, %v2186_v3, 0.0 }
 0x1e2   : > { %v1326_v47 = vpop.f32.mrb[64].mxu0  ;;  %v1519_v37 = vpop.f32.mrb[64].mxu1  ;;  %vm333_vm3 = vcmp.ne.s32.totalorder %v7814_v0, 15 }
 0x1e3   : > { %v2219_v28 = vadd.f32 %v2187_v35, %v1326_v47  ;;  %v7809_v56 = vpop.f32.mrb[65].mxu0  ;;  %v1520_v18 = vpop.f32.mrb[65].mxu1  ;;  %v1901_v37 = vsel %vm330_vm2, %v1896_v61, 0.0 }
 0x1e4   : > { %10623 = vst [vmem:[#allocation90_spill] sm:$0xff] %v7809_v56  ;;  %v1330_v10 = vpop.f32.mrb[66].mxu0  ;;  %v1521_v2 = vpop.f32.mrb[66].mxu1  ;;  %v10516_v32 = vrot.slane %v7809_v56, 1 }
 0x1e5   : > { %v2220_v16 = vadd.f32 %v7360_v46, %v1330_v10  ;;  %v1332_v52 = vpop.f32.mrb[67].mxu0  ;;  %v1523_v7 = vpop.f32.mrb[67].mxu1  ;;  %v2379_v3 = vrot.slane %v1521_v2, 7 }
 0x1e6   : > { %v2252_v14 = vrot.slane %v1332_v52, 1 }
 0x1e8   : > { %v2313_v57 = vsel %vm2026_vm1, %v10516_v32, %v2252_v14 }
 0x1e9   : > { %v2347_v35 = vadd.f32 %v2313_v57, %v2219_v28 }
 0x1ea   : > { %v1336_v47 = vpop.f32.mrb[68].mxu0  ;;  %v1526_v46 = vpop.f32.mrb[68].mxu1 }
 0x1eb   : > { %v1933_v18 = vadd.f32 %v1901_v37, %v1336_v47  ;;  %v2380_v10 = vrot.slane %v1526_v46, 7  ;;  %v1338_v7 = vpop.f32.mrb[69].mxu0  ;;  %v1528_v52 = vpop.f32.mrb[69].mxu1  ;;  %v2062_v37 = vsel %vm333_vm3, %v7368_v62, 0.0  ;;  %v2189_v62 = vsel %vm330_vm2, %v7376_v1, 0.0 }
 0x1ec   : > { %v2253_v54 = vrot.slane %v1338_v7, 1  ;;  %v1340_v34 = vpop.f32.mrb[70].mxu0  ;;  %v1530_v26 = vpop.f32.mrb[70].mxu1 }
 0x1ed   : > { %v1965_v56 = vadd.f32 %v1933_v18, %v7332_v30  ;;  %v1934_v32 = vadd.f32 %v7352_v45, %v1340_v34  ;;  %v1342_v2 = vpop.f32.mrb[71].mxu0  ;;  %v2439_v28 = vsel %vm1866_vm0, %v2379_v3, %v2380_v10  ;;  %v2381_v57 = vrot.slane %v1530_v26, 7  ;;  %v1532_v61 = vpop.f32.mrb[71].mxu1 }
 0x1ee   : > { %v2312_v47 = vsel %vm2026_vm1, %v2252_v14, %v2253_v54  ;;  %v2254_v46 = vrot.slane %v1342_v2, 1  ;;  %v2440_v7 = vsel %vm330_vm2, %v2439_v28, 0.0 }
 0x1ef   : > { %v2093_v30 = vadd.f32 %v7346_v44, %v1965_v56  ;;  %v1966_v45 = vadd.f32 %v1934_v32, %v7340_v40  ;;  %v2470_v34 = vadd.f32 %v2440_v7, %v2347_v35  ;;  %v2316_v26 = vsel %vm333_vm3, %v2312_v47, 0.0 }
 0x1f0   : > { %v2311_v3 = vsel %vm2026_vm1, %v2253_v54, %v2254_v46  ;;  %v2348_v14 = vadd.f32 %v2316_v26, %v2220_v16  ;;  %v2438_v18 = vsel %vm1866_vm0, %v2380_v10, %v2381_v57  ;;  %v1903_v32 = vsel %vm330_vm2, %v7372_v63, 0.0 }
 0x1f1   : > { %v2094_v2 = vadd.f32 %v2062_v37, %v1966_v45  ;;  %v7845_v28 = vadd.f32 %v2470_v34, %v1528_v52  ;;  %v2221_v44 = vadd.f32 %v2189_v62, %v2093_v30  ;;  %v6554_v45 = vld [vmem:[#allocation7 + $0x16c] ss:$36 sps:$4 sm:$0xff]  }
 0x1f2   : > { %v2471_v40 = vadd.f32 %v2438_v18, %v2348_v14  ;;  %v1346_v56 = vpop.f32.mrb[72].mxu0  ;;  %v1536_v35 = vpop.f32.mrb[72].mxu1  ;;  %3497 = vmatprep.subr.bf16.mxu1 %v6554_v45 }
 0x1f3   : > { %v1935_v54 = vadd.f32 %v1903_v32, %v1346_v56  ;;  %v2382_v16 = vrot.slane %v1536_v35, 7  ;;  %v1348_v47 = vpop.f32.mrb[73].mxu0  ;;  %v1538_v7 = vpop.f32.mrb[73].mxu1  ;;  %v2349_v10 = vadd.f32 %v2311_v3, %v2221_v44  ;;  %v2222_v26 = vadd.f32 %v7392_v6, %v2094_v2  ;;  %v6558_v3 = vld [vmem:[#allocation7 + $0x8] ss:$36 sps:$4 sm:$0xff]   ;;  %3498 = vmatpush1.bf16.msra.mxu1 %v6552_v12 }
 0x1f4   : > { %v7851_v1 = vadd.f32 %v2471_v40, %v1532_v61  ;;  %v2255_v52 = vrot.slane %v1348_v47, 1  ;;  %v1350_v37 = vpop.f32.mrb[74].mxu0  ;;  %v1540_v30 = vpop.f32.mrb[74].mxu1  ;;  %v2064_v61 = vsel %vm333_vm3, %v7400_v38, 0.0 }
 0x1f5   : > { %v1967_v34 = vadd.f32 %v1935_v54, %v7362_v51  ;;  %v1936_v14 = vadd.f32 %v7386_v5, %v1350_v37  ;;  %v1352_v63 = vpop.f32.mrb[75].mxu0  ;;  %v2437_v18 = vsel %vm1866_vm0, %v2381_v57, %v2382_v16  ;;  %v2383_v62 = vrot.slane %v1540_v30, 7  ;;  %v1542_v56 = vpop.f32.mrb[75].mxu1  ;;  %v6560_v5 = vld [vmem:[#allocation7 + $0xc] ss:$36 sps:$4 sm:$0xff]  }
 0x1f6   : > { %v2310_v6 = vsel %vm2026_vm1, %v2254_v46, %v2255_v52  ;;  %v2256_v2 = vrot.slane %v1352_v63, 1  ;;  %v2442_v51 = vsel %vm330_vm2, %v2437_v18, 0.0  ;;  %v2191_v54 = vsel %vm330_vm2, %v7408_v42, 0.0  ;;  %3677 = vmatprep.subr.bf16.mxu0 %v6560_v5  ;;  %v6561_v30 = vld [vmem:[#allocation7 + $0x50] ss:$36 sps:$4 sm:$0xff]  }
 0x1f7   : > { %v2095_v44 = vadd.f32 %v7382_v4, %v1967_v34  ;;  %v1968_v57 = vadd.f32 %v1936_v14, %v7364_v59  ;;  %v2472_v40 = vadd.f32 %v2442_v51, %v2349_v10  ;;  %v2318_v32 = vsel %vm333_vm3, %v2310_v6, 0.0  ;;  %3678 = vmatpush1.bf16.msra.mxu0 %v6558_v3  ;;  %v6563_v10 = vld [vmem:[#allocation7 + $0x54] ss:$36 sps:$4 sm:$0xff]  }
 0x1f8   : > { %v2309_v46 = vsel %vm2026_vm1, %v2255_v52, %v2256_v2  ;;  %v2350_v35 = vadd.f32 %v2318_v32, %v2222_v26  ;;  %v2436_v38 = vsel %vm1866_vm0, %v2382_v16, %v2383_v62  ;;  %v1905_v26 = vsel %vm330_vm2, %v7404_v41, 0.0  ;;  %3679 = vmatprep.subr.bf16.mxu0 %v6563_v10 }
 0x1f9   : > { %v2096_v4 = vadd.f32 %v2064_v61, %v1968_v57  ;;  %v7875_v47 = vadd.f32 %v2472_v40, %v1538_v7  ;;  %v2223_v59 = vadd.f32 %v2191_v54, %v2095_v44  ;;  %v2193_v54 = vsel %vm330_vm2, %v7440_v25, 0.0 }
 0x1fa   : > { %v2473_v37 = vadd.f32 %v2436_v38, %v2350_v35  ;;  %v1356_v12 = vpop.f32.mrb[76].mxu0  ;;  %v1546_v52 = vpop.f32.mrb[76].mxu1  ;;  %v6566_v35 = vld [vmem:[#allocation7 + $0x9c] ss:$36 sps:$4 sm:$0xff]  }
 0x1fb   : > { %v1937_v16 = vadd.f32 %v1905_v26, %v1356_v12  ;;  %v2384_v45 = vrot.slane %v1546_v52, 7  ;;  %v1358_v34 = vpop.f32.mrb[77].mxu0  ;;  %v1548_v14 = vpop.f32.mrb[77].mxu1  ;;  %v2351_v42 = vadd.f32 %v2309_v46, %v2223_v59  ;;  %v2224_v63 = vadd.f32 %v7424_v50, %v2096_v4  ;;  %3680 = vmatpush1.bf16.msra.mxu0 %v6561_v30  ;;  %v6564_v4 = vld [vmem:[#allocation7 + $0x98] ss:$36 sps:$4 sm:$0xff]  }
 0x1fc   : > { %v7881_v7 = vadd.f32 %v2473_v37, %v1542_v56  ;;  %v2257_v18 = vrot.slane %v1358_v34, 1  ;;  %v1360_v3 = vpop.f32.mrb[78].mxu0  ;;  %v1550_v6 = vpop.f32.mrb[78].mxu1  ;;  %v2066_v56 = vsel %vm333_vm3, %v7432_v23, 0.0  ;;  %3681 = vmatprep.subr.bf16.mxu0 %v6566_v35  ;;  %v1907_v12 = vsel %vm330_vm2, %v7436_v24, 0.0 }
 0x1fd   : > { %v1969_v61 = vadd.f32 %v1937_v16, %v7394_v21  ;;  %v1938_v51 = vadd.f32 %v7418_v49, %v1360_v3  ;;  %v1362_v41 = vpop.f32.mrb[79].mxu0  ;;  %v2435_v5 = vsel %vm1866_vm0, %v2383_v62, %v2384_v45  ;;  %v2385_v44 = vrot.slane %v1550_v6, 7  ;;  %v1552_v57 = vpop.f32.mrb[79].mxu1 }
 0x1fe   : > { %v2308_v50 = vsel %vm2026_vm1, %v2256_v2, %v2257_v18  ;;  %v2258_v40 = vrot.slane %v1362_v41, 1  ;;  %v2444_v21 = vsel %vm330_vm2, %v2435_v5, 0.0  ;;  %v6569_v5 = vld [vmem:[#allocation7 + $0xe4] ss:$36 sps:$4 sm:$0xff]  }
 0x1ff   : > { %v2097_v49 = vadd.f32 %v7414_v48, %v1969_v61  ;;  %v1970_v32 = vadd.f32 %v1938_v51, %v7396_v31  ;;  %v2474_v46 = vadd.f32 %v2444_v21, %v2351_v42  ;;  %v2320_v62 = vsel %vm333_vm3, %v2308_v50, 0.0  ;;  %3682 = vmatpush1.bf16.msra.mxu0 %v6564_v4  ;;  %v6567_v21 = vld [vmem:[#allocation7 + $0xe0] ss:$36 sps:$4 sm:$0xff]   ;;  %v6557_v4 = vld [vmem:[#allocation7 + $0x1b4] ss:$36 sps:$4 sm:$0xff]  }
 0x200   : > { %v2307_v2 = vsel %vm2026_vm1, %v2257_v18, %v2258_v40  ;;  %v2352_v38 = vadd.f32 %v2320_v62, %v2224_v63  ;;  %v2434_v23 = vsel %vm1866_vm0, %v2384_v45, %v2385_v44  ;;  %3683 = vmatprep.subr.bf16.mxu0 %v6569_v5  ;;  %3499 = vmatprep.subr.bf16.mxu1 %v6557_v4 }
 0x201   : > { %v2098_v48 = vadd.f32 %v2066_v56, %v1970_v32  ;;  %v7905_v59 = vadd.f32 %v2474_v46, %v1548_v14  ;;  %v2225_v31 = vadd.f32 %v2193_v54, %v2097_v49  ;;  %v10626_v32 = vld [vmem:[#allocation12_spill] sm:$0xff]  ;;  %v6555_v54 = vld [vmem:[#allocation7 + $0x1b0] ss:$36 sps:$4 sm:$0xff]  }
 0x202   : > { %v2475_v10 = vadd.f32 %v2434_v23, %v2352_v38  ;;  %v1366_v37 = vpop.f32.mrb[80].mxu0  ;;  %v1556_v26 = vpop.f32.mrb[80].mxu1  ;;  %v10627_v38 = vld [vmem:[#allocation18_spill] sm:$0xff]  ;;  %3500 = vmatpush1.bf16.msra.mxu1 %v6555_v54 }
 0x203   : > { %v1939_v52 = vadd.f32 %v1907_v12, %v1366_v37  ;;  %v2386_v30 = vrot.slane %v1556_v26, 7  ;;  %v1368_v16 = vpop.f32.mrb[81].mxu0  ;;  %v1558_v45 = vpop.f32.mrb[81].mxu1  ;;  %v2353_v34 = vadd.f32 %v2307_v2, %v2225_v31  ;;  %v2226_v25 = vadd.f32 %v7456_v29, %v2098_v48  ;;  %v10624_v29 = vld [vmem:[#allocation16_spill] sm:$0xff]  ;;  %3684 = vmatpush1.bf16.msra.mxu0 %v6567_v21  ;;  %v6575_v37 = vld [vmem:[#allocation7 + $0x12c] ss:$36 sps:$4 sm:$0xff]  }
 0x204   : > { %v7911_v42 = vadd.f32 %v2475_v10, %v1552_v57  ;;  %v2259_v14 = vrot.slane %v1368_v16, 1  ;;  %v1370_v63 = vpop.f32.mrb[82].mxu0  ;;  %v1560_v18 = vpop.f32.mrb[82].mxu1  ;;  %v2068_v57 = vsel %vm333_vm3, %v10624_v29, 0.0  ;;  %v2195_v23 = vsel %vm330_vm2, %v10627_v38, 0.0  ;;  %3685 = vmatprep.subr.bf16.mxu0 %v6575_v37  ;;  %v10630_v29 = vld [vmem:[#allocation14_spill] sm:$0xff] }
 0x205   : > { %v1971_v3 = vadd.f32 %v1939_v52, %v7426_v55  ;;  %v1940_v6 = vadd.f32 %v7450_v33, %v1370_v63  ;;  %v1372_v61 = vpop.f32.mrb[83].mxu0  ;;  %v2433_v24 = vsel %vm1866_vm0, %v2385_v44, %v2386_v30  ;;  %v2387_v51 = vrot.slane %v1560_v18, 7  ;;  %v1562_v41 = vpop.f32.mrb[83].mxu1  ;;  %v10625_v33 = vld [vmem:[#allocation13_spill] sm:$0xff]  ;;  %v10633_v38 = vld [vmem:[#allocation15_spill] sm:$0xff] }
 0x206   : > { %v2306_v50 = vsel %vm2026_vm1, %v2258_v40, %v2259_v14  ;;  %v2260_v56 = vrot.slane %v1372_v61, 1  ;;  %v2446_v55 = vsel %vm330_vm2, %v2433_v24, 0.0  ;;  %v10628_v52 = vld [vmem:[#allocation17_spill] sm:$0xff]  ;;  %v6578_v37 = vld [vmem:[#allocation7 + $0x174] ss:$36 sps:$4 sm:$0xff]  }
 0x207   : > { %v2099_v49 = vadd.f32 %v10625_v33, %v1971_v3  ;;  %v1972_v46 = vadd.f32 %v1940_v6, %v10626_v32  ;;  %v2476_v44 = vadd.f32 %v2446_v55, %v2353_v34  ;;  %v2322_v62 = vsel %vm333_vm3, %v2306_v50, 0.0  ;;  %v10629_v6 = vld [vmem:[#allocation21_spill] sm:$0xff]  ;;  %v10631_v55 = vld [vmem:[#allocation20_spill] sm:$0xff] }
 0x208   : > { %v2305_v40 = vsel %vm2026_vm1, %v2259_v14, %v2260_v56  ;;  %v2354_v35 = vadd.f32 %v2322_v62, %v2226_v25  ;;  %v2432_v2 = vsel %vm1866_vm0, %v2386_v30, %v2387_v51  ;;  %v1909_v16 = vsel %vm330_vm2, %v10628_v52, 0.0  ;;  %v6573_v30 = vld [vmem:[#allocation7 + $0x128] ss:$36 sps:$4 sm:$0xff]  }
 0x209   : > { %v2100_v48 = vadd.f32 %v2068_v57, %v1972_v46  ;;  %v7935_v31 = vadd.f32 %v2476_v44, %v1558_v45  ;;  %v2227_v10 = vadd.f32 %v2195_v23, %v2099_v49  ;;  %3686 = vmatpush1.bf16.msra.mxu0 %v6573_v30 }
 0x20a   : > { %v2477_v12 = vadd.f32 %v2432_v2, %v2354_v35  ;;  %v1376_v26 = vpop.f32.mrb[84].mxu0  ;;  %v1566_v34 = vpop.f32.mrb[84].mxu1  ;;  %v10632_v35 = vld [vmem:[#allocation19_spill] sm:$0xff]  ;;  %3687 = vmatprep.subr.bf16.mxu0 %v6578_v37 }
 0x20b   : > { %v1941_v25 = vadd.f32 %v1909_v16, %v1376_v26  ;;  %v2388_v14 = vrot.slane %v1566_v34, 7  ;;  %v1378_v63 = vpop.f32.mrb[85].mxu0  ;;  %v1568_v18 = vpop.f32.mrb[85].mxu1  ;;  %v2355_v3 = vadd.f32 %v2305_v40, %v2227_v10  ;;  %v2228_v61 = vadd.f32 %v10629_v6, %v2100_v48  ;;  %v6576_v16 = vld [vmem:[#allocation7 + $0x170] ss:$36 sps:$4 sm:$0xff]   ;;  %v10640_v37 = vld [vmem:[#allocation23_spill] sm:$0xff] }
 0x20c   : > { %v7941_v45 = vadd.f32 %v2477_v12, %v1562_v41  ;;  %v2261_v24 = vrot.slane %v1378_v63, 1  ;;  %v1380_v5 = vpop.f32.mrb[86].mxu0  ;;  %v1570_v50 = vpop.f32.mrb[86].mxu1  ;;  %v2070_v41 = vsel %vm333_vm3, %v7496_v22, 0.0  ;;  %v10634_v22 = vld [vmem:[#allocation25_spill] sm:$0xff] }
 0x20d   : > { %v1973_v57 = vadd.f32 %v1941_v25, %v10630_v29  ;;  %v1942_v21 = vadd.f32 %v10631_v55, %v1380_v5  ;;  %v1382_v33 = vpop.f32.mrb[87].mxu0  ;;  %v2431_v49 = vsel %vm1866_vm0, %v2387_v51, %v2388_v14  ;;  %v2389_v32 = vrot.slane %v1570_v50, 7  ;;  %v1572_v46 = vpop.f32.mrb[87].mxu1  ;;  %v10635_v25 = vld [vmem:[#allocation24_spill] sm:$0xff]  ;;  %3688 = vmatpush1.bf16.msra.mxu0 %v6576_v16  ;;  %v10636_v55 = vld [vmem:[#allocation30_spill] sm:$0xff] }
 0x20e   : > { %v2304_v44 = vsel %vm2026_vm1, %v2260_v56, %v2261_v24  ;;  %v2262_v62 = vrot.slane %v1382_v33, 1  ;;  %v2448_v40 = vsel %vm330_vm2, %v2431_v49, 0.0  ;;  %v2197_v10 = vsel %vm330_vm2, %v10634_v22, 0.0  ;;  %v6581_v49 = vld [vmem:[#allocation7 + $0x1bc] ss:$36 sps:$4 sm:$0xff]   ;;  %v10639_v22 = vld [vmem:[#allocation26_spill] sm:$0xff] }
 0x20f   : > { %v2101_v2 = vadd.f32 %v10632_v35, %v1973_v57  ;;  %v1974_v23 = vadd.f32 %v1942_v21, %v10633_v38  ;;  %v2478_v54 = vadd.f32 %v2448_v40, %v2355_v3  ;;  %v2324_v51 = vsel %vm333_vm3, %v2304_v44, 0.0  ;;  %v10637_v44 = vld [vmem:[#allocation22_spill] sm:$0xff]  ;;  %v10638_v40 = vld [vmem:[#allocation27_spill] sm:$0xff]  ;;  %3689 = vmatprep.subr.bf16.mxu0 %v6581_v49 }
 0x210   : > { %v2303_v4 = vsel %vm2026_vm1, %v2261_v24, %v2262_v62  ;;  %v2356_v56 = vadd.f32 %v2324_v51, %v2228_v61  ;;  %v2430_v48 = vsel %vm1866_vm0, %v2388_v14, %v2389_v32  ;;  %v1911_v63 = vsel %vm330_vm2, %v10635_v25, 0.0 }
 0x211   : > { %v2102_v12 = vadd.f32 %v2070_v41, %v1974_v23  ;;  %v7965_v26 = vadd.f32 %v2478_v54, %v1568_v18  ;;  %v2229_v52 = vadd.f32 %v2197_v10, %v2101_v2  ;;  %v2072_v21 = vsel %vm333_vm3, %v10636_v55, 0.0 }
 0x212   : > { %v2479_v34 = vadd.f32 %v2430_v48, %v2356_v56  ;;  %v1386_v30 = vpop.f32.mrb[88].mxu0  ;;  %v1576_v3 = vpop.f32.mrb[88].mxu1  ;;  %v6570_v56 = vld [vmem:[#allocation7 + $0x1f8] ss:$36 sps:$4 sm:$0xff]  }
 0x213   : > { %v1943_v6 = vadd.f32 %v1911_v63, %v1386_v30  ;;  %v2390_v14 = vrot.slane %v1576_v3, 7  ;;  %v1388_v61 = vpop.f32.mrb[89].mxu0  ;;  %v1578_v24 = vpop.f32.mrb[89].mxu1  ;;  %v2357_v5 = vadd.f32 %v2303_v4, %v2229_v52  ;;  %v2230_v50 = vadd.f32 %v7518_v19, %v2102_v12  ;;  %v6579_v48 = vld [vmem:[#allocation7 + $0x1b8] ss:$36 sps:$4 sm:$0xff]   ;;  %v10641_v30 = vld [vmem:[#allocation32_spill] sm:$0xff] }
 0x214   : > { %v7971_v18 = vadd.f32 %v2479_v34, %v1572_v46  ;;  %v2263_v29 = vrot.slane %v1388_v61, 1  ;;  %v1390_v57 = vpop.f32.mrb[90].mxu0  ;;  %v1580_v33 = vpop.f32.mrb[90].mxu1  ;;  %v6572_v46 = vld [vmem:[#allocation7 + $0x1fc] ss:$36 sps:$4 sm:$0xff]   ;;  %v2199_v25 = vsel %vm330_vm2, %v10641_v30, 0.0  ;;  %3690 = vmatpush1.bf16.msra.mxu0 %v6579_v48 }
 0x215   : > { %v1975_v41 = vadd.f32 %v1943_v6, %v10637_v44  ;;  %v1944_v35 = vadd.f32 %v10638_v40, %v1390_v57  ;;  %v1392_v2 = vpop.f32.mrb[91].mxu0  ;;  %v2429_v38 = vsel %vm1866_vm0, %v2389_v32, %v2390_v14  ;;  %v2391_v19 = vrot.slane %v1580_v33, 7  ;;  %v1582_v23 = vpop.f32.mrb[91].mxu1  ;;  %3501 = vmatprep.subr.bf16.mxu1 %v6572_v46  ;;  %v10642_v57 = vld [vmem:[#allocation31_spill] sm:$0xff]  ;;  %v6584_v40 = vld [vmem:[#allocation7 + $0x204] ss:$36 sps:$4 sm:$0xff]  }
 0x216   : > { %v2302_v54 = vsel %vm2026_vm1, %v2262_v62, %v2263_v29  ;;  %v2264_v51 = vrot.slane %v1392_v2, 1  ;;  %v2450_v4 = vsel %vm330_vm2, %v2429_v38, 0.0  ;;  %3502 = vmatpush1.bf16.msra.mxu1 %v6570_v56  ;;  %v6582_v38 = vld [vmem:[#allocation7 + $0x200] ss:$36 sps:$4 sm:$0xff]   ;;  %3691 = vmatprep.subr.bf16.mxu0 %v6584_v40 }
 0x217   : > { %v2103_v10 = vadd.f32 %v10639_v22, %v1975_v41  ;;  %v1976_v12 = vadd.f32 %v1944_v35, %v10640_v37  ;;  %v2480_v52 = vadd.f32 %v2450_v4, %v2357_v5  ;;  %v2326_v32 = vsel %vm333_vm3, %v2302_v54, 0.0  ;;  %v10643_v46 = vld [vmem:[#allocation28_spill] sm:$0xff]  ;;  %v10644_v4 = vld [vmem:[#allocation34_spill] sm:$0xff] }
 0x218   : > { %v2301_v16 = vsel %vm2026_vm1, %v2263_v29, %v2264_v51  ;;  %v2358_v62 = vadd.f32 %v2326_v32, %v2230_v50  ;;  %v2428_v34 = vsel %vm1866_vm0, %v2390_v14, %v2391_v19  ;;  %v1913_v29 = vsel %vm330_vm2, %v10642_v57, 0.0  ;;  %3692 = vmatpush1.bf16.msra.mxu0 %v6582_v38  ;;  %v10645_v32 = vld [vmem:[#allocation33_spill] sm:$0xff] }
 0x219   : > { %v2104_v63 = vadd.f32 %v2072_v21, %v1976_v12  ;;  %v7995_v3 = vadd.f32 %v2480_v52, %v1578_v24  ;;  %v2231_v6 = vadd.f32 %v2199_v25, %v2103_v10 }
 0x21a   : > { %v2481_v61 = vadd.f32 %v2428_v34, %v2358_v62  ;;  %v1396_v5 = vpop.f32.mrb[92].mxu0  ;;  %v1586_v50 = vpop.f32.mrb[92].mxu1  ;;  %v10646_v62 = vld [vmem:[#allocation29_spill] sm:$0xff] }
 0x21b   : > { %v1945_v55 = vadd.f32 %v1913_v29, %v1396_v5  ;;  %v2392_v33 = vrot.slane %v1586_v50, 7  ;;  %v1398_v14 = vpop.f32.mrb[93].mxu0  ;;  %v1588_v49 = vpop.f32.mrb[93].mxu1  ;;  %v2359_v44 = vadd.f32 %v2301_v16, %v2231_v6  ;;  %v2232_v41 = vadd.f32 %v7548_v53, %v2104_v63  ;;  %v10647_v50 = vld [vmem:[#allocation37_spill] sm:$0xff] }
 0x21c   : > { %v8001_v35 = vadd.f32 %v2481_v61, %v1582_v23  ;;  %v2265_v24 = vrot.slane %v1398_v14, 1  ;;  %v1400_v21 = vpop.f32.mrb[94].mxu0  ;;  %v1590_v2 = vpop.f32.mrb[94].mxu1  ;;  %v2074_v23 = vsel %vm333_vm3, %v7556_v58, 0.0  ;;  %v2201_v63 = vsel %vm330_vm2, %v7564_v20, 0.0 }
 0x21d   : > { %v1977_v54 = vadd.f32 %v1945_v55, %v10643_v46  ;;  %v1946_v56 = vadd.f32 %v10644_v4, %v1400_v21  ;;  %v1402_v48 = vpop.f32.mrb[95].mxu0  ;;  %v2427_v22 = vsel %vm1866_vm0, %v2391_v19, %v2392_v33  ;;  %v2393_v10 = vrot.slane %v1590_v2, 7  ;;  %v1592_v37 = vpop.f32.mrb[95].mxu1  ;;  %v10648_v46 = vld [vmem:[#allocation35_spill] sm:$0xff] }
 0x21e   : > { %v2300_v53 = vsel %vm2026_vm1, %v2264_v51, %v2265_v24  ;;  %v2266_v12 = vrot.slane %v1402_v48, 1  ;;  %v2452_v52 = vsel %vm330_vm2, %v2427_v22, 0.0  ;;  %v1915_v55 = vsel %vm330_vm2, %v10647_v50, 0.0  ;;  %v10649_v4 = vld [vmem:[#allocation39_spill] sm:$0xff]  ;;  %v10653_v50 = vld [vmem:[#allocation42_spill] sm:$0xff] }
 0x21f   : > { %v2105_v16 = vadd.f32 %v10645_v32, %v1977_v54  ;;  %v1978_v34 = vadd.f32 %v1946_v56, %v10646_v62  ;;  %v2482_v19 = vadd.f32 %v2452_v52, %v2359_v44  ;;  %v2328_v30 = vsel %vm333_vm3, %v2300_v53, 0.0 }
 0x220   : > { %v2299_v51 = vsel %vm2026_vm1, %v2265_v24, %v2266_v12  ;;  %v2360_v25 = vadd.f32 %v2328_v30, %v2232_v41  ;;  %v2426_v58 = vsel %vm1866_vm0, %v2392_v33, %v2393_v10 }
 0x221   : > { %v2106_v6 = vadd.f32 %v2074_v23, %v1978_v34  ;;  %v8025_v61 = vadd.f32 %v2482_v19, %v1588_v49  ;;  %v2233_v5 = vadd.f32 %v2201_v63, %v2105_v16  ;;  %v10650_v16 = vld [vmem:[#allocation38_spill] sm:$0xff]  ;;  %v10651_v34 = vld [vmem:[#allocation36_spill] sm:$0xff] }
 0x222   : > { %v2483_v57 = vadd.f32 %v2426_v58, %v2360_v25  ;;  %v1406_v29 = vpop.f32.mrb[96].mxu0  ;;  %v1596_v14 = vpop.f32.mrb[96].mxu1 }
 0x223   : > { %v1947_v44 = vadd.f32 %v1915_v55, %v1406_v29  ;;  %v2394_v41 = vrot.slane %v1596_v14, 7  ;;  %v1408_v40 = vpop.f32.mrb[97].mxu0  ;;  %v1598_v24 = vpop.f32.mrb[97].mxu1  ;;  %v2361_v33 = vadd.f32 %v2299_v51, %v2233_v5  ;;  %v2234_v21 = vadd.f32 %v7578_v8, %v2106_v6  ;;  %v10652_v51 = vld [vmem:[#allocation43_spill] sm:$0xff] }
 0x224   : > { %v8031_v2 = vadd.f32 %v2483_v57, %v1592_v37  ;;  %v2267_v20 = vrot.slane %v1408_v40, 1  ;;  %v1410_v49 = vpop.f32.mrb[98].mxu0  ;;  %v1600_v38 = vpop.f32.mrb[98].mxu1  ;;  %v2076_v8 = vsel %vm333_vm3, %v7586_v9, 0.0  ;;  %v1917_v55 = vsel %vm330_vm2, %v10653_v50, 0.0  ;;  %v10659_v50 = vld [vmem:[#allocation48_spill] sm:$0xff] }
 0x225   : > { %v1979_v54 = vadd.f32 %v1947_v44, %v10648_v46  ;;  %v1948_v56 = vadd.f32 %v10649_v4, %v1410_v49  ;;  %v1412_v48 = vpop.f32.mrb[99].mxu0  ;;  %v2425_v22 = vsel %vm1866_vm0, %v2393_v10, %v2394_v41  ;;  %v2395_v53 = vrot.slane %v1600_v38, 7  ;;  %v1602_v23 = vpop.f32.mrb[99].mxu1 }
 0x226   : > { %v2298_v52 = vsel %vm2026_vm1, %v2266_v12, %v2267_v20  ;;  %v2268_v37 = vrot.slane %v1412_v48, 1  ;;  %v2454_v32 = vsel %vm330_vm2, %v2425_v22, 0.0  ;;  %v2203_v12 = vsel %vm330_vm2, %v10652_v51, 0.0 }
 0x227   : > { %v2107_v62 = vadd.f32 %v10650_v16, %v1979_v54  ;;  %v1980_v19 = vadd.f32 %v1948_v56, %v10651_v34  ;;  %v2484_v30 = vadd.f32 %v2454_v32, %v2361_v33  ;;  %v2330_v10 = vsel %vm333_vm3, %v2298_v52, 0.0  ;;  %v10654_v54 = vld [vmem:[#allocation40_spill] sm:$0xff]  ;;  %v10655_v56 = vld [vmem:[#allocation45_spill] sm:$0xff] }
 0x228   : > { %v2297_v25 = vsel %vm2026_vm1, %v2267_v20, %v2268_v37  ;;  %v2362_v9 = vadd.f32 %v2330_v10, %v2234_v21  ;;  %v2424_v58 = vsel %vm1866_vm0, %v2394_v41, %v2395_v53  ;;  %v10656_v34 = vld [vmem:[#allocation44_spill] sm:$0xff] }
 0x229   : > { %v2108_v63 = vadd.f32 %v2076_v8, %v1980_v19  ;;  %v8055_v6 = vadd.f32 %v2484_v30, %v1598_v24  ;;  %v2235_v5 = vadd.f32 %v2203_v12, %v2107_v62  ;;  %v10657_v30 = vld [vmem:[#allocation41_spill] sm:$0xff] }
 0x22a   : > { %v2485_v57 = vadd.f32 %v2424_v58, %v2362_v9  ;;  %v1416_v29 = vpop.f32.mrb[100].mxu0  ;;  %v1606_v14 = vpop.f32.mrb[100].mxu1  ;;  %v10658_v12 = vld [vmem:[#allocation49_spill] sm:$0xff] }
 0x22b   : > { %v1949_v44 = vadd.f32 %v1917_v55, %v1416_v29  ;;  %v2396_v40 = vrot.slane %v1606_v14, 7  ;;  %v1418_v33 = vpop.f32.mrb[101].mxu0  ;;  %v1608_v49 = vpop.f32.mrb[101].mxu1  ;;  %v2363_v20 = vadd.f32 %v2297_v25, %v2235_v5  ;;  %v2236_v21 = vadd.f32 %v7608_v60, %v2108_v63 }
 0x22c   : > { %v8061_v38 = vadd.f32 %v2485_v57, %v1602_v23  ;;  %v2269_v41 = vrot.slane %v1418_v33, 1  ;;  %v1420_v24 = vpop.f32.mrb[102].mxu0  ;;  %v1610_v46 = vpop.f32.mrb[102].mxu1  ;;  %v2078_v60 = vsel %vm333_vm3, %v7616_v11, 0.0  ;;  %v1919_v55 = vsel %vm330_vm2, %v10659_v50, 0.0 }
 0x22d   : > { %v1981_v4 = vadd.f32 %v1949_v44, %v10654_v54  ;;  %v1950_v48 = vadd.f32 %v10655_v56, %v1420_v24  ;;  %v1422_v22 = vpop.f32.mrb[103].mxu0  ;;  %v2423_v52 = vsel %vm1866_vm0, %v2395_v53, %v2396_v40  ;;  %v2397_v8 = vrot.slane %v1610_v46, 7  ;;  %v1612_v32 = vpop.f32.mrb[103].mxu1 }
 0x22e   : > { %v2296_v16 = vsel %vm2026_vm1, %v2268_v37, %v2269_v41  ;;  %v2270_v23 = vrot.slane %v1422_v22, 1  ;;  %v2456_v62 = vsel %vm330_vm2, %v2423_v52, 0.0  ;;  %v2205_v37 = vsel %vm330_vm2, %v10658_v12, 0.0 }
 0x22f   : > { %v2109_v19 = vadd.f32 %v10656_v34, %v1981_v4  ;;  %v1982_v10 = vadd.f32 %v1950_v48, %v10657_v30  ;;  %v2486_v51 = vadd.f32 %v2456_v62, %v2363_v20  ;;  %v2332_v53 = vsel %vm333_vm3, %v2296_v16, 0.0  ;;  %v10660_v4 = vld [vmem:[#allocation46_spill] sm:$0xff]  ;;  %v10661_v48 = vld [vmem:[#allocation51_spill] sm:$0xff] }
 0x230   : > { %v2295_v25 = vsel %vm2026_vm1, %v2269_v41, %v2270_v23  ;;  %v2364_v11 = vadd.f32 %v2332_v53, %v2236_v21  ;;  %v2422_v9 = vsel %vm1866_vm0, %v2396_v40, %v2397_v8  ;;  %v6587_v30 = vld [vmem:[#allocation7 + $0x14] ss:$36 sps:$4 sm:$0xff]  }
 0x231   : > { %v2110_v58 = vadd.f32 %v2078_v60, %v1982_v10  ;;  %v8085_v63 = vadd.f32 %v2486_v51, %v1608_v49  ;;  %v2237_v5 = vadd.f32 %v2205_v37, %v2109_v19  ;;  %v10662_v10 = vld [vmem:[#allocation50_spill] sm:$0xff]  ;;  %v10663_v53 = vld [vmem:[#allocation47_spill] sm:$0xff]  ;;  %3869 = vmatprep.subr.bf16.mxu1 %v6587_v30 }
 0x232   : > { %v2487_v57 = vadd.f32 %v2422_v9, %v2364_v11  ;;  %v1426_v29 = vpop.f32.mrb[104].mxu0  ;;  %v1616_v14 = vpop.f32.mrb[104].mxu1 }
 0x233   : > { %v1951_v44 = vadd.f32 %v1919_v55, %v1426_v29  ;;  %v2398_v33 = vrot.slane %v1616_v14, 7  ;;  %v1428_v20 = vpop.f32.mrb[105].mxu0  ;;  %v1618_v24 = vpop.f32.mrb[105].mxu1  ;;  %v2365_v41 = vadd.f32 %v2295_v25, %v2237_v5  ;;  %v2238_v21 = vadd.f32 %v7638_v36, %v2110_v58  ;;  %v10664_v25 = vld [vmem:[#allocation55_spill] sm:$0xff]  ;;  %v10665_v55 = vld [vmem:[#allocation54_spill] sm:$0xff] }
 0x234   : > { %v8091_v46 = vadd.f32 %v2487_v57, %v1612_v32  ;;  %v2271_v40 = vrot.slane %v1428_v20, 1  ;;  %v1430_v49 = vpop.f32.mrb[106].mxu0  ;;  %v1620_v54 = vpop.f32.mrb[106].mxu1  ;;  %v2080_v36 = vsel %vm333_vm3, %v7646_v13, 0.0  ;;  %v1921_v14 = vsel %vm330_vm2, %v10665_v55, 0.0  ;;  %v10671_v55 = vld [vmem:[#allocation60_spill] sm:$0xff] }
 0x235   : > { %v1983_v56 = vadd.f32 %v1951_v44, %v10660_v4  ;;  %v1952_v22 = vadd.f32 %v10661_v48, %v1430_v49  ;;  %v1432_v52 = vpop.f32.mrb[107].mxu0  ;;  %v2421_v16 = vsel %vm1866_vm0, %v2397_v8, %v2398_v33  ;;  %v2399_v60 = vrot.slane %v1620_v54, 7  ;;  %v1622_v62 = vpop.f32.mrb[107].mxu1  ;;  %v10666_v48 = vld [vmem:[#allocation52_spill] sm:$0xff] }
 0x236   : > { %v2294_v34 = vsel %vm2026_vm1, %v2270_v23, %v2271_v40  ;;  %v2272_v32 = vrot.slane %v1432_v52, 1  ;;  %v2458_v19 = vsel %vm330_vm2, %v2421_v16, 0.0  ;;  %v2207_v23 = vsel %vm330_vm2, %v10664_v25, 0.0  ;;  %v10667_v52 = vld [vmem:[#allocation57_spill] sm:$0xff] }
 0x237   : > { %v2111_v51 = vadd.f32 %v10662_v10, %v1983_v56  ;;  %v1984_v12 = vadd.f32 %v1952_v22, %v10663_v53  ;;  %v2488_v37 = vadd.f32 %v2458_v19, %v2365_v41  ;;  %v2334_v8 = vsel %vm333_vm3, %v2294_v34, 0.0  ;;  %v10668_v53 = vld [vmem:[#allocation56_spill] sm:$0xff] }
 0x238   : > { %v2293_v13 = vsel %vm2026_vm1, %v2271_v40, %v2272_v32  ;;  %v2366_v11 = vadd.f32 %v2334_v8, %v2238_v21  ;;  %v2420_v9 = vsel %vm1866_vm0, %v2398_v33, %v2399_v60 }
 0x239   : > { %v2112_v58 = vadd.f32 %v2080_v36, %v1984_v12  ;;  %v8115_v5 = vadd.f32 %v2488_v37, %v1618_v24  ;;  %v2239_v57 = vadd.f32 %v2207_v23, %v2111_v51  ;;  %v10669_v37 = vld [vmem:[#allocation53_spill] sm:$0xff] }
 0x23a   : > { %v2489_v29 = vadd.f32 %v2420_v9, %v2366_v11  ;;  %v1436_v50 = vpop.f32.mrb[108].mxu0  ;;  %v1626_v44 = vpop.f32.mrb[108].mxu1  ;;  %v10670_v23 = vld [vmem:[#allocation61_spill] sm:$0xff] }
 0x23b   : > { %v1953_v20 = vadd.f32 %v1921_v14, %v1436_v50  ;;  %v2400_v41 = vrot.slane %v1626_v44, 7  ;;  %v1438_v49 = vpop.f32.mrb[109].mxu0  ;;  %v1628_v40 = vpop.f32.mrb[109].mxu1  ;;  %v2367_v21 = vadd.f32 %v2293_v13, %v2239_v57  ;;  %v2240_v54 = vadd.f32 %v7668_v43, %v2112_v58 }
 0x23c   : > { %v8121_v33 = vadd.f32 %v2489_v29, %v1622_v62  ;;  %v2273_v4 = vrot.slane %v1438_v49, 1  ;;  %v1440_v24 = vpop.f32.mrb[110].mxu0  ;;  %v1630_v56 = vpop.f32.mrb[110].mxu1  ;;  %v2082_v43 = vsel %vm333_vm3, %v7676_v15, 0.0  ;;  %v1923_v14 = vsel %vm330_vm2, %v10671_v55, 0.0  ;;  %v10677_v55 = vld [vmem:[#allocation66_spill] sm:$0xff] }
 0x23d   : > { %v1985_v22 = vadd.f32 %v1953_v20, %v10666_v48  ;;  %v1954_v16 = vadd.f32 %v10667_v52, %v1440_v24  ;;  %v1442_v34 = vpop.f32.mrb[111].mxu0  ;;  %v2419_v36 = vsel %vm1866_vm0, %v2399_v60, %v2400_v41  ;;  %v2401_v19 = vrot.slane %v1630_v56, 7  ;;  %v1632_v30 = vpop.f32.mrb[111].mxu1 }
 0x23e   : > { %v2292_v10 = vsel %vm2026_vm1, %v2272_v32, %v2273_v4  ;;  %v2274_v62 = vrot.slane %v1442_v34, 1  ;;  %v2460_v51 = vsel %vm330_vm2, %v2419_v36, 0.0  ;;  %v2209_v32 = vsel %vm330_vm2, %v10670_v23, 0.0 }
 0x23f   : > { %v2113_v12 = vadd.f32 %v10668_v53, %v1985_v22  ;;  %v1986_v8 = vadd.f32 %v1954_v16, %v10669_v37  ;;  %v2490_v25 = vadd.f32 %v2460_v51, %v2367_v21  ;;  %v2336_v60 = vsel %vm333_vm3, %v2292_v10, 0.0  ;;  %v10672_v22 = vld [vmem:[#allocation58_spill] sm:$0xff]  ;;  %v10673_v16 = vld [vmem:[#allocation63_spill] sm:$0xff] }
 0x240   : > { %v2291_v13 = vsel %vm2026_vm1, %v2273_v4, %v2274_v62  ;;  %v2368_v15 = vadd.f32 %v2336_v60, %v2240_v54  ;;  %v2418_v11 = vsel %vm1866_vm0, %v2400_v41, %v2401_v19  ;;  %v10674_v37 = vld [vmem:[#allocation62_spill] sm:$0xff] }
 0x241   : > { %v2114_v9 = vadd.f32 %v2082_v43, %v1986_v8  ;;  %v8145_v58 = vadd.f32 %v2490_v25, %v1628_v40  ;;  %v2241_v57 = vadd.f32 %v2209_v32, %v2113_v12  ;;  %v10675_v25 = vld [vmem:[#allocation59_spill] sm:$0xff] }
 0x242   : > { %v2491_v29 = vadd.f32 %v2418_v11, %v2368_v15  ;;  %v1446_v50 = vpop.f32.mrb[112].mxu0  ;;  %v1636_v44 = vpop.f32.mrb[112].mxu1  ;;  %v10676_v32 = vld [vmem:[#allocation67_spill] sm:$0xff] }
 0x243   : > { %v1955_v20 = vadd.f32 %v1923_v14, %v1446_v50  ;;  %v2402_v49 = vrot.slane %v1636_v44, 7  ;;  %v1448_v21 = vpop.f32.mrb[113].mxu0  ;;  %v1638_v24 = vpop.f32.mrb[113].mxu1  ;;  %v2369_v4 = vadd.f32 %v2291_v13, %v2241_v57  ;;  %v2242_v54 = vadd.f32 %v7698_v39, %v2114_v9 }
 0x244   : > { %v8151_v56 = vadd.f32 %v2491_v29, %v1632_v30  ;;  %v2275_v41 = vrot.slane %v1448_v21, 1  ;;  %v1450_v40 = vpop.f32.mrb[114].mxu0  ;;  %v1640_v48 = vpop.f32.mrb[114].mxu1  ;;  %v2084_v39 = vsel %vm333_vm3, %v7706_v17, 0.0  ;;  %v1925_v14 = vsel %vm330_vm2, %v10677_v55, 0.0 }
 0x245   : > { %v1987_v52 = vadd.f32 %v1955_v20, %v10672_v22  ;;  %v1956_v34 = vadd.f32 %v10673_v16, %v1450_v40  ;;  %v1452_v36 = vpop.f32.mrb[115].mxu0  ;;  %v2417_v10 = vsel %vm1866_vm0, %v2401_v19, %v2402_v49  ;;  %v2403_v43 = vrot.slane %v1640_v48, 7  ;;  %v1642_v51 = vpop.f32.mrb[115].mxu1  ;;  %v10679_v16 = vld [vmem:[#allocation64_spill] sm:$0xff] }
 0x246   : > { %v2290_v53 = vsel %vm2026_vm1, %v2274_v62, %v2275_v41  ;;  %v2276_v30 = vrot.slane %v1452_v36, 1  ;;  %v2462_v12 = vsel %vm330_vm2, %v2417_v10, 0.0  ;;  %v2211_v62 = vsel %vm330_vm2, %v10676_v32, 0.0  ;;  %v10680_v36 = vld [vmem:[#allocation69_spill] sm:$0xff] }
 0x247   : > { %v2115_v8 = vadd.f32 %v10674_v37, %v1987_v52  ;;  %v1988_v60 = vadd.f32 %v1956_v34, %v10675_v25  ;;  %v2492_v23 = vadd.f32 %v2462_v12, %v2369_v4  ;;  %v2338_v19 = vsel %vm333_vm3, %v2290_v53, 0.0  ;;  %v10681_v25 = vld [vmem:[#allocation73_spill] sm:$0xff] }
 0x248   : > { %v2289_v13 = vsel %vm2026_vm1, %v2275_v41, %v2276_v30  ;;  %v2370_v17 = vadd.f32 %v2338_v19, %v2242_v54  ;;  %v2416_v15 = vsel %vm1866_vm0, %v2402_v49, %v2403_v43  ;;  %v10678_v54 = vld [vmem:[#allocation70_spill] sm:$0xff]  ;;  %v10682_v19 = vld [vmem:[#allocation68_spill] sm:$0xff] }
 0x249   : > { %v2116_v11 = vadd.f32 %v2084_v39, %v1988_v60  ;;  %v8175_v9 = vadd.f32 %v2492_v23, %v1638_v24  ;;  %v2243_v57 = vadd.f32 %v2211_v62, %v2115_v8  ;;  %v10683_v62 = vld [vmem:[#allocation65_spill] sm:$0xff] }
 0x24a   : > { %v2493_v29 = vadd.f32 %v2416_v15, %v2370_v17  ;;  %v1456_v50 = vpop.f32.mrb[116].mxu0  ;;  %v1646_v44 = vpop.f32.mrb[116].mxu1  ;;  %v10684_v15 = vld [vmem:[#allocation75_spill] sm:$0xff] }
 0x24b   : > { %v1957_v20 = vadd.f32 %v1925_v14, %v1456_v50  ;;  %v2404_v21 = vrot.slane %v1646_v44, 7  ;;  %v1458_v4 = vpop.f32.mrb[117].mxu0  ;;  %v1648_v40 = vpop.f32.mrb[117].mxu1  ;;  %v2371_v41 = vadd.f32 %v2289_v13, %v2243_v57  ;;  %v2244_v48 = vadd.f32 %v10678_v54, %v2116_v11 }
 0x24c   : > { %v8181_v22 = vadd.f32 %v2493_v29, %v1642_v51  ;;  %v2277_v49 = vrot.slane %v1458_v4, 1  ;;  %v1460_v24 = vpop.f32.mrb[118].mxu0  ;;  %v1650_v52 = vpop.f32.mrb[118].mxu1  ;;  %v2086_v51 = vsel %vm333_vm3, %v10681_v25, 0.0  ;;  %v10685_v4 = vld [vmem:[#allocation74_spill] sm:$0xff]  ;;  %v10688_v25 = vld [vmem:[#allocation77_spill] sm:$0xff] }
 0x24d   : > { %v1989_v34 = vadd.f32 %v1957_v20, %v10679_v16  ;;  %v1958_v10 = vadd.f32 %v10680_v36, %v1460_v24  ;;  %v1462_v53 = vpop.f32.mrb[119].mxu0  ;;  %v2415_v39 = vsel %vm1866_vm0, %v2403_v43, %v2404_v21  ;;  %v2405_v12 = vrot.slane %v1650_v52, 7  ;;  %v1652_v37 = vpop.f32.mrb[119].mxu1 }
 0x24e   : > { %v2288_v8 = vsel %vm2026_vm1, %v2276_v30, %v2277_v49  ;;  %v2278_v60 = vrot.slane %v1462_v53, 1  ;;  %v2464_v23 = vsel %vm330_vm2, %v2415_v39, 0.0  ;;  %v2213_v30 = vsel %vm330_vm2, %v10684_v15, 0.0  ;;  %v10687_v39 = vld [vmem:[#allocation71_spill] sm:$0xff] }
 0x24f   : > { %v2117_v32 = vadd.f32 %v10682_v19, %v1989_v34  ;;  %v1990_v13 = vadd.f32 %v1958_v10, %v10683_v62  ;;  %v2494_v17 = vadd.f32 %v2464_v23, %v2371_v41  ;;  %v2340_v43 = vsel %vm333_vm3, %v2288_v8, 0.0 }
 0x250   : > { %v2287_v11 = vsel %vm2026_vm1, %v2277_v49, %v2278_v60  ;;  %v2372_v57 = vadd.f32 %v2340_v43, %v2244_v48  ;;  %v2414_v29 = vsel %vm1866_vm0, %v2404_v21, %v2405_v12  ;;  %v1927_v41 = vsel %vm330_vm2, %v10685_v4, 0.0  ;;  %v10686_v48 = vld [vmem:[#allocation78_spill] sm:$0xff] }
 0x251   : > { %v2118_v50 = vadd.f32 %v2086_v51, %v1990_v13  ;;  %v8205_v55 = vadd.f32 %v2494_v17, %v1648_v40  ;;  %v2245_v14 = vadd.f32 %v2213_v30, %v2117_v32  ;;  %v10689_v17 = vld [vmem:[#allocation81_spill] sm:$0xff]  ;;  %v10690_v30 = vld [vmem:[#allocation76_spill] sm:$0xff] }
 0x252   : > { %v2495_v44 = vadd.f32 %v2414_v29, %v2372_v57  ;;  %v1466_v20 = vpop.f32.mrb[120].mxu0  ;;  %v1656_v54 = vpop.f32.mrb[120].mxu1  ;;  %v10691_v57 = vld [vmem:[#allocation72_spill] sm:$0xff] }
 0x253   : > { %v1959_v24 = vadd.f32 %v1927_v41, %v1466_v20  ;;  %v2406_v52 = vrot.slane %v1656_v54, 7  ;;  %v1468_v16 = vpop.f32.mrb[121].mxu0  ;;  %v1658_v34 = vpop.f32.mrb[121].mxu1  ;;  %v2373_v49 = vadd.f32 %v2287_v11, %v2245_v14  ;;  %v2246_v36 = vadd.f32 %v10686_v48, %v2118_v50  ;;  %v10692_v14 = vld [vmem:[#allocation83_spill] sm:$0xff]  ;;  %v10693_v48 = vld [vmem:[#allocation82_spill] sm:$0xff] }
 0x254   : > { %v8211_v10 = vadd.f32 %v2495_v44, %v1652_v37  ;;  %v2279_v21 = vrot.slane %v1468_v16, 1  ;;  %v1470_v40 = vpop.f32.mrb[122].mxu0  ;;  %v1660_v53 = vpop.f32.mrb[122].mxu1  ;;  %v2088_v37 = vsel %vm333_vm3, %v10689_v17, 0.0  ;;  %v10695_v17 = vld [vmem:[#allocation79_spill] sm:$0xff] }
 0x255   : > { %v1991_v8 = vadd.f32 %v1959_v24, %v10687_v39  ;;  %v1960_v51 = vadd.f32 %v10688_v25, %v1470_v40  ;;  %v1472_v23 = vpop.f32.mrb[123].mxu0  ;;  %v2413_v19 = vsel %vm1866_vm0, %v2405_v12, %v2406_v52  ;;  %v2407_v32 = vrot.slane %v1660_v53, 7  ;;  %v1662_v62 = vpop.f32.mrb[123].mxu1 }
 0x256   : > { %v2286_v13 = vsel %vm2026_vm1, %v2278_v60, %v2279_v21  ;;  %v2280_v43 = vrot.slane %v1472_v23, 1  ;;  %v2466_v15 = vsel %vm330_vm2, %v2413_v19, 0.0  ;;  %v2215_v60 = vsel %vm330_vm2, %v10692_v14, 0.0  ;;  %v10697_v14 = vld [vmem:[#allocation87_spill] sm:$0xff] }
 0x257   : > { %v2119_v11 = vadd.f32 %v10690_v30, %v1991_v8  ;;  %v1992_v29 = vadd.f32 %v1960_v51, %v10691_v57  ;;  %v2496_v50 = vadd.f32 %v2466_v15, %v2373_v49  ;;  %v2342_v12 = vsel %vm333_vm3, %v2286_v13, 0.0  ;;  %v10696_v15 = vld [vmem:[#allocation85_spill] sm:$0xff] }
 0x258   : > { %v2285_v44 = vsel %vm2026_vm1, %v2279_v21, %v2280_v43  ;;  %v2374_v20 = vadd.f32 %v2342_v12, %v2246_v36  ;;  %v2412_v4 = vsel %vm1866_vm0, %v2406_v52, %v2407_v32  ;;  %v1929_v40 = vsel %vm330_vm2, %v10693_v48, 0.0  ;;  %v10694_v36 = vld [vmem:[#allocation86_spill] sm:$0xff] }
 0x259   : > { %v2120_v41 = vadd.f32 %v2088_v37, %v1992_v29  ;;  %v8235_v54 = vadd.f32 %v2496_v50, %v1658_v34  ;;  %v2247_v24 = vadd.f32 %v2215_v60, %v2119_v11 }
 0x25a   : > { %v2497_v16 = vadd.f32 %v2412_v4, %v2374_v20  ;;  %v1476_v49 = vpop.f32.mrb[124].mxu0  ;;  %v1666_v53 = vpop.f32.mrb[124].mxu1  ;;  %v10698_v20 = vld [vmem:[#allocation84_spill] sm:$0xff] }
 0x25b   : > { %v1961_v39 = vadd.f32 %v1929_v40, %v1476_v49  ;;  %v2408_v8 = vrot.slane %v1666_v53, 7  ;;  %v1478_v25 = vpop.f32.mrb[125].mxu0  ;;  %v1668_v51 = vpop.f32.mrb[125].mxu1  ;;  %v2375_v21 = vadd.f32 %v2285_v44, %v2247_v24  ;;  %v2248_v23 = vadd.f32 %v10694_v36, %v2120_v41  ;;  %v10699_v41 = vld [vmem:[#allocation80_spill] sm:$0xff]  ;;  %v10701_v36 = vld [vmem:[#allocation90_spill] sm:$0xff] }
 0x25c   : > { %v8241_v19 = vadd.f32 %v2497_v16, %v1662_v62  ;;  %v2281_v52 = vrot.slane %v1478_v25, 1  ;;  %v1480_v34 = vpop.f32.mrb[126].mxu0  ;;  %v1670_v13 = vpop.f32.mrb[126].mxu1  ;;  %v2090_v62 = vsel %vm333_vm3, %v10697_v14, 0.0  ;;  %v10700_v49 = vld [vmem:[#allocation88_spill] sm:$0xff] }
 0x25d   : > { %v1993_v37 = vadd.f32 %v1961_v39, %v10695_v17  ;;  %v1962_v30 = vadd.f32 %v10696_v15, %v1480_v34  ;;  %v1482_v11 = vpop.f32.mrb[127].mxu0  ;;  %v2411_v57 = vsel %vm1866_vm0, %v2407_v32, %v2408_v8  ;;  %v2409_v29 = vrot.slane %v1670_v13, 7  ;;  %v1672_v50 = vpop.f32.mrb[127].mxu1  ;;  %v8274_v17 = vld [vmem:[%s10501_s2] ss:$0 sm:$0xff] }
 0x25e   : > { %v2284_v12 = vsel %vm2026_vm1, %v2280_v43, %v2281_v52  ;;  %v2282_v60 = vrot.slane %v1482_v11, 1  ;;  %v2468_v44 = vsel %vm330_vm2, %v2411_v57, 0.0  ;;  %v2217_v43 = vsel %vm330_vm2, %v10700_v49, 0.0 }
 0x25f   : > { %v2121_v4 = vadd.f32 %v10698_v20, %v1993_v37  ;;  %v1994_v24 = vadd.f32 %v1962_v30, %v10699_v41  ;;  %v2498_v16 = vadd.f32 %v2468_v44, %v2375_v21  ;;  %v2344_v32 = vsel %vm333_vm3, %v2284_v12, 0.0 }
 0x260   : > { %v2283_v48 = vsel %vm2026_vm1, %v2281_v52, %v2282_v60  ;;  %v2376_v40 = vadd.f32 %v2344_v32, %v2248_v23  ;;  %v2410_v53 = vsel %vm1866_vm0, %v2408_v8, %v2409_v29  ;;  %v10702_v34 = vrot.slane %v10701_v36, 1  ;;  %v10703_v23 = vld [vmem:[#allocation89_spill] sm:$0xff] }
 0x261   : > { %v2249_v39 = vadd.f32 %v2217_v43, %v2121_v4  ;;  %v2122_v25 = vadd.f32 %v2090_v62, %v1994_v24  ;;  %v8269_v13 = vadd.f32 %v2498_v16, %v1668_v51  ;;  %v8284_v51 = vld [vmem:[%s10502_s3] ss:$0 sm:$0xff] }
 0x262   : > { %v2314_v21 = vsel %vm2026_vm1, %v2282_v60, %v10702_v34  ;;  %v6265_v37 = vpop.f32.mrb[128].mxu0  ;;  %v2499_v52 = vadd.f32 %v2410_v53, %v2376_v40 }
 0x263   : > { %v2250_v15 = vadd.f32 %v10703_v23, %v2122_v25  ;;  %v2377_v30 = vadd.f32 %v2283_v48, %v2249_v39  ;;  %v8277_v8 = vpop.f32.mrb[129].mxu0  ;;  %v2346_v11 = vsel %vm333_vm3, %v2314_v21, 0.0  ;;  %v2535_v62 = vrot.slane %v6265_v37, 1 }
 0x264   : > { %v8286_v57 = vadd.f32 %v2499_v52, %v1672_v50  ;;  %v6266_v29 = vpop.f32.mrb[130].mxu0 }
 0x265   : > { %v2378_v12 = vadd.f32 %v2346_v11, %v2250_v15  ;;  %v2694_v14 = vmul.f32 %v8274_v17, %v2377_v30  ;;  %v2536_v60 = vrot.slane %v6266_v29, 1  ;;  %v1712_v44 = vpop.f32.mrb[131].mxu0 }
 0x267   : > { %v2695_v20 = vmul.f32 %v8274_v17, %v2378_v12  ;;  %v8291_v4 = vadd.f32 %v8284_v51, %v2694_v14  ;;  %v2593_v41 = vsel %vm2026_vm1, %v2535_v62, %v2536_v60 }
 0x268   : > { %v2625_v24 = vadd.f32 %v2593_v41, %v7845_v28 }
 0x269   : > { %10704 = vst [vmem:[#allocation16_spill] sm:$0xff] %v8291_v4  ;;  %v8297_v50 = vadd.f32 %v8284_v51, %v2695_v20  ;;  %v2765_v16 = vmul.f32 %v8291_v4, %v8291_v4 }
 0x26a   : > { %v2664_v32 = vmul.f32 %v8274_v17, %v2625_v24  ;;  %v6269_v49 = vpop.f32.mrb[132].mxu0 }
 0x26b   : > { %10705 = vst [vmem:[#allocation13_spill] sm:$0xff] %v8297_v50  ;;  %v2766_v43 = vmul.f32 %v8297_v50, %v8297_v50  ;;  %v2797_v48 = vmul.f32 %v2765_v16, %v8291_v4  ;;  %v1724_v40 = vpop.f32.mrb[133].mxu0  ;;  %v2539_v36 = vrot.slane %v6269_v49, 1 }
 0x26c   : > { %v8306_v53 = vadd.f32 %v8284_v51, %v2664_v32  ;;  %v2537_v39 = vrot.slane %v1724_v40, 1  ;;  %v6270_v28 = vpop.f32.mrb[134].mxu0 }
 0x26d   : > { %v2798_v25 = vmul.f32 %v2766_v43, %v8297_v50  ;;  %v2540_v34 = vrot.slane %v6270_v28, 1  ;;  %v1727_v21 = vpop.f32.mrb[135].mxu0  ;;  %v2829_v37 = vmul.f32 0.044715, %v2797_v48 }
 0x26e   : > { %v2592_v52 = vsel %vm2026_vm1, %v2536_v60, %v2537_v39  ;;  %v2538_v23 = vrot.slane %v1727_v21, 1  ;;  %v2735_v11 = vmul.f32 %v8306_v53, %v8306_v53 }
 0x26f   : > { %v2596_v15 = vsel %vm333_vm3, %v2592_v52, 0.0  ;;  %v2589_v30 = vsel %vm2026_vm1, %v2539_v36, %v2540_v34  ;;  %v2830_v62 = vmul.f32 0.044715, %v2798_v25  ;;  %v2861_v20 = vadd.f32 %v2829_v37, %v8291_v4  ;;  %v6599_v25 = vld [vmem:[#allocation7 + $0x1c] ss:$36 sps:$4 sm:$0xff]  }
 0x270   : > { %v2626_v29 = vadd.f32 %v2596_v15, %v7851_v1  ;;  %v2629_v12 = vadd.f32 %v2589_v30, %v7905_v59  ;;  %v2590_v14 = vsel %vm2026_vm1, %v2538_v23, %v2539_v36  ;;  %v2591_v60 = vsel %vm2026_vm1, %v2537_v39, %v2538_v23  ;;  %4062 = vmatprep.subr.bf16.mxu0 %v6599_v25 }
 0x271   : > { %v2598_v44 = vsel %vm333_vm3, %v2590_v14, 0.0  ;;  %v2627_v1 = vadd.f32 %v2591_v60, %v7875_v47  ;;  %v2767_v43 = vmul.f32 %v2735_v11, %v8306_v53  ;;  %v2862_v47 = vadd.f32 %v2830_v62, %v8297_v50 }
 0x272   : > { %v2665_v41 = vmul.f32 %v8274_v17, %v2626_v29  ;;  %v2668_v24 = vmul.f32 %v8274_v17, %v2629_v12  ;;  %v6273_v16 = vpop.f32.mrb[136].mxu0  ;;  %v2628_v59 = vadd.f32 %v2598_v44, %v7881_v7  ;;  %v2893_v52 = vmul.f32 0.7978846, %v2861_v20 }
 0x273   : > { %v2543_v32 = vrot.slane %v6273_v16, 1  ;;  %v1740_v49 = vpop.f32.mrb[137].mxu0  ;;  %v2666_v39 = vmul.f32 %v8274_v17, %v2627_v1  ;;  %v2799_v62 = vmul.f32 0.044715, %v2767_v43  ;;  %v2894_v16 = vmul.f32 0.7978846, %v2862_v47 }
 0x274   : > { %v8332_v48 = vadd.f32 %v8284_v51, %v2665_v41  ;;  %v8335_v40 = vadd.f32 %v8284_v51, %v2668_v24  ;;  %v8338_v28 = vpop.f32.mrb[138].mxu0  ;;  %v2667_v36 = vmul.f32 %v8274_v17, %v2628_v59  ;;  %v2541_v7 = vrot.slane %v1740_v49, 1 }
 0x275   : > { %v2544_v21 = vrot.slane %v8338_v28, 1  ;;  %v1743_v37 = vpop.f32.mrb[139].mxu0  ;;  %v8348_v30 = vadd.f32 %v8284_v51, %v2666_v39  ;;  %v2831_v47 = vadd.f32 %v2799_v62, %v8306_v53  ;;  %6641 = vtanh.f32 %v2893_v52 }
 0x276   : > { %v2736_v23 = vmul.f32 %v8332_v48, %v8332_v48  ;;  %v2739_v15 = vmul.f32 %v8335_v40, %v8335_v40  ;;  %v8351_v11 = vadd.f32 %v8284_v51, %v2667_v36  ;;  %v2588_v29 = vsel %vm2026_vm1, %v2540_v34, %v2541_v7 }
 0x277   : > { %v2585_v12 = vsel %vm2026_vm1, %v2543_v32, %v2544_v21  ;;  %v2542_v14 = vrot.slane %v1743_v37, 1  ;;  %v2737_v20 = vmul.f32 %v8348_v30, %v8348_v30  ;;  %v2600_v34 = vsel %vm333_vm3, %v2588_v29, 0.0 }
 0x278   : > { %v2768_v60 = vmul.f32 %v2736_v23, %v8332_v48  ;;  %v2771_v44 = vmul.f32 %v2739_v15, %v8335_v40  ;;  %v2738_v41 = vmul.f32 %v8351_v11, %v8351_v11  ;;  %v2633_v24 = vadd.f32 %v2585_v12, %v7965_v26 }
 0x279   : > { %v2586_v1 = vsel %vm2026_vm1, %v2542_v14, %v2543_v32  ;;  %v2769_v49 = vmul.f32 %v2737_v20, %v8348_v30  ;;  %v2630_v43 = vadd.f32 %v2600_v34, %v7911_v42  ;;  %v2587_v37 = vsel %vm2026_vm1, %v2541_v7, %v2542_v14 }
 0x27a   : > { %v2803_v59 = vmul.f32 0.044715, %v2771_v44  ;;  %v6277_v39 = vpop.f32.mrb[140].mxu0  ;;  %v2770_v25 = vmul.f32 %v2738_v41, %v8351_v11  ;;  %v2672_v36 = vmul.f32 %v8274_v17, %v2633_v24  ;;  %v2602_v26 = vsel %vm333_vm3, %v2586_v1, 0.0 }
 0x27b   : > { %v1756_v23 = vpop.f32.mrb[141].mxu0  ;;  %v2801_v15 = vmul.f32 0.044715, %v2769_v49  ;;  %v2669_v29 = vmul.f32 %v8274_v17, %v2630_v43  ;;  %v2800_v12 = vmul.f32 0.044715, %v2768_v60  ;;  %v2631_v20 = vadd.f32 %v2587_v37, %v7935_v31 }
 0x27c   : > { %v8381_v42 = vpop.f32.mrb[142].mxu0  ;;  %v8384_v44 = vadd.f32 %v8284_v51, %v2672_v36  ;;  %v2632_v7 = vadd.f32 %v2602_v26, %v7941_v45  ;;  %v2835_v41 = vadd.f32 %v2803_v59, %v8335_v40  ;;  %v2802_v34 = vmul.f32 0.044715, %v2770_v25 }
 0x27d   : > { %v1759_v14 = vpop.f32.mrb[143].mxu0  ;;  %v8390_v62 = vadd.f32 %v8284_v51, %v2669_v29  ;;  %v2670_v60 = vmul.f32 %v8274_v17, %v2631_v20  ;;  %6643 = vtanh.f32 %v2894_v16  ;;  %v2863_v49 = vmul.f32 0.7978846, %v2831_v47 }
 0x27e   : > { %10706 = vst [vmem:[#allocation12_spill] sm:$0xff] %v8384_v44  ;;  %v2743_v24 = vmul.f32 %v8384_v44, %v8384_v44  ;;  %v2671_v1 = vmul.f32 %v8274_v17, %v2632_v7  ;;  %v2833_v31 = vadd.f32 %v2801_v15, %v8348_v30  ;;  %v2547_v52 = vrot.slane %v6277_v39, 1 }
 0x27f   : > { %v2740_v45 = vmul.f32 %v8390_v62, %v8390_v62  ;;  %v2832_v59 = vadd.f32 %v2800_v12, %v8332_v48  ;;  %v8402_v25 = vadd.f32 %v8284_v51, %v2670_v60  ;;  %v2867_v37 = vmul.f32 0.7978846, %v2835_v41 }
 0x280   : > { %v2775_v43 = vmul.f32 %v2743_v24, %v8384_v44  ;;  %v8405_v36 = vadd.f32 %v8284_v51, %v2671_v1  ;;  %v2834_v16 = vadd.f32 %v2802_v34, %v8351_v11  ;;  %v2545_v26 = vrot.slane %v1756_v23, 1 }
 0x281   : > { %10707 = vst [vmem:[#allocation18_spill] sm:$0xff] %v8402_v25  ;;  %v2548_v47 = vrot.slane %v8381_v42, 1  ;;  %v2772_v39 = vmul.f32 %v2740_v45, %v8390_v62  ;;  %v2741_v29 = vmul.f32 %v8402_v25, %v8402_v25  ;;  %v2546_v20 = vrot.slane %v1759_v14, 1 }
 0x282   : > { %10708 = vst [vmem:[#allocation17_spill] sm:$0xff] %v8405_v36  ;;  %v8409_v15 = vpop.f32.mrb[144].mxu0  ;;  %v2742_v12 = vmul.f32 %v8405_v36, %v8405_v36  ;;  %6645 = vtanh.f32 %v2863_v49  ;;  %v2865_v41 = vmul.f32 0.7978846, %v2833_v31  ;;  %v2584_v23 = vsel %vm2026_vm1, %v2544_v21, %v2545_v26 }
 0x283   : > { %v8416_v7 = vpop.f32.mrb[145].mxu0  ;;  %v2581_v42 = vsel %vm2026_vm1, %v2547_v52, %v2548_v47  ;;  %v8426_v24 = vmul.f32 0.7978846, %v2832_v59  ;;  %v2807_v60 = vmul.f32 0.044715, %v2775_v43  ;;  %v2773_v1 = vmul.f32 %v2741_v29, %v8402_v25  ;;  %v8440_v29 = vpop.eup %6641 }
 0x284   : > { %v8424_v34 = vpop.f32.mrb[146].mxu0  ;;  %v2604_v14 = vsel %vm333_vm3, %v2584_v23, 0.0  ;;  %6647 = vtanh.f32 %v2867_v37  ;;  %v2637_v31 = vadd.f32 %v2581_v42, %v8025_v61  ;;  %v2582_v21 = vsel %vm2026_vm1, %v2546_v20, %v2547_v52  ;;  %10709 = vst [vmem:[#allocation21_spill] sm:$0xff] %v8440_v29 }
 0x285   : > { %v1775_v49 = vpop.f32.mrb[147].mxu0  ;;  %v2634_v28 = vadd.f32 %v2604_v14, %v7971_v18  ;;  %v8435_v45 = vmul.f32 0.7978846, %v2834_v16  ;;  %v2804_v32 = vmul.f32 0.044715, %v2772_v39  ;;  %v2774_v59 = vmul.f32 %v2742_v12, %v8405_v36 }
 0x286   : > { %v2583_v43 = vsel %vm2026_vm1, %v2545_v26, %v2546_v20  ;;  %6649 = vtanh.f32 %v2865_v41  ;;  %v2676_v18 = vmul.f32 %v8274_v17, %v2637_v31  ;;  %v2606_v61 = vsel %vm333_vm3, %v2582_v21, 0.0 }
 0x287   : > { %v2673_v37 = vmul.f32 %v8274_v17, %v2634_v28  ;;  %v8446_v23 = vpop.eup %6643  ;;  %v2839_v52 = vadd.f32 %v2807_v60, %v8384_v44  ;;  %v2805_v16 = vmul.f32 0.044715, %v2773_v1  ;;  %v2635_v39 = vadd.f32 %v2583_v43, %v7995_v3 }
 0x288   : > { %10710 = vst [vmem:[#allocation14_spill] sm:$0xff] %v8446_v23  ;;  %v2551_v12 = vrot.slane %v8409_v15, 1  ;;  %v8455_v20 = vadd.f32 %v8284_v51, %v2676_v18  ;;  %v2636_v41 = vadd.f32 %v2606_v61, %v8001_v35  ;;  %v2549_v42 = vrot.slane %v8416_v7, 1 }
 0x289   : > { %v8452_v26 = vadd.f32 %v8284_v51, %v2673_v37  ;;  %v2836_v28 = vadd.f32 %v2804_v32, %v8390_v62  ;;  %v2806_v60 = vmul.f32 0.044715, %v2774_v59  ;;  %v2674_v1 = vmul.f32 %v8274_v17, %v2635_v39 }
 0x28a   : > { %10712 = vst [vmem:[#allocation19_spill] sm:$0xff] %v8455_v20  ;;  %v8459_v14 = vpop.f32.mrb[148].mxu0  ;;  %v2552_v3 = vrot.slane %v8424_v34, 1  ;;  %v2747_v21 = vmul.f32 %v8455_v20, %v8455_v20  ;;  %v2675_v35 = vmul.f32 %v8274_v17, %v2636_v41  ;;  %v2580_v7 = vsel %vm2026_vm1, %v2548_v47, %v2549_v42 }
 0x28b   : > { %10711 = vst [vmem:[#allocation20_spill] sm:$0xff] %v8452_v26  ;;  %v8464_v15 = vpop.f32.mrb[149].mxu0  ;;  %v2744_v31 = vmul.f32 %v8452_v26, %v8452_v26  ;;  %v2871_v32 = vmul.f32 0.7978846, %v2839_v52  ;;  %v8476_v59 = vadd.f32 %v8284_v51, %v2674_v1  ;;  %v2608_v34 = vsel %vm333_vm3, %v2580_v7, 0.0 }
 0x28c   : > { %v8473_v43 = vpop.f32.mrb[150].mxu0  ;;  %v2577_v37 = vsel %vm2026_vm1, %v2551_v12, %v2552_v3  ;;  %v8484_v61 = vpop.eup %6645  ;;  %v2837_v39 = vadd.f32 %v2805_v16, %v8402_v25  ;;  %v2779_v47 = vmul.f32 %v2747_v21, %v8455_v20  ;;  %v8489_v41 = vadd.f32 %v8284_v51, %v2675_v35 }
 0x28d   : > { %10713 = vst [vmem:[#allocation15_spill] sm:$0xff] %v8476_v59  ;;  %v8482_v18 = vpop.f32.mrb[151].mxu0  ;;  %v2638_v52 = vadd.f32 %v2608_v34, %v8031_v2  ;;  %v2838_v1 = vadd.f32 %v2806_v60, %v8405_v36  ;;  %v2745_v7 = vmul.f32 %v8476_v59, %v8476_v59  ;;  %v2641_v50 = vadd.f32 %v2577_v37, %v8085_v63 }
 0x28e   : > { %10714 = vst [vmem:[#allocation25_spill] sm:$0xff] %v8489_v41  ;;  %v2550_v4 = vrot.slane %v1775_v49, 1  ;;  %v8496_v23 = vpop.eup %6647  ;;  %v2776_v29 = vmul.f32 %v2744_v31, %v8452_v26  ;;  %v2811_v16 = vmul.f32 0.044715, %v2779_v47  ;;  %v2746_v21 = vmul.f32 %v8489_v41, %v8489_v41 }
 0x28f   : > { %v2677_v35 = vmul.f32 %v8274_v17, %v2638_v52  ;;  %v2777_v2 = vmul.f32 %v2745_v7, %v8476_v59  ;;  %v2680_v60 = vmul.f32 %v8274_v17, %v2641_v50  ;;  %v8510_v37 = vmul.f32 0.7978846, %v2836_v28 }
 0x290   : > { %v2578_v34 = vsel %vm2026_vm1, %v2550_v4, %v2551_v12  ;;  %v2579_v63 = vsel %vm2026_vm1, %v2549_v42, %v2550_v4  ;;  %v8508_v49 = vpop.eup %6649  ;;  %v2869_v31 = vmul.f32 0.7978846, %v2837_v39  ;;  %v2778_v47 = vmul.f32 %v2746_v21, %v8489_v41 }
 0x291   : > { %v8514_v44 = vadd.f32 %v8284_v51, %v2677_v35  ;;  %6651 = vtanh.f32 %v2871_v32  ;;  %v8519_v50 = vadd.f32 %v8284_v51, %v2680_v60  ;;  %v2610_v12 = vsel %vm333_vm3, %v2578_v34, 0.0 }
 0x292   : > { %v8516_v52 = vpop.f32.mrb[152].mxu0  ;;  %v2639_v4 = vadd.f32 %v2579_v63, %v8055_v6  ;;  %v8526_v28 = vmul.f32 0.7978846, %v2838_v1  ;;  %v2808_v39 = vmul.f32 0.044715, %v2776_v29  ;;  %v2843_v7 = vadd.f32 %v2811_v16, %v8455_v20 }
 0x293   : > { %10715 = vst [vmem:[#allocation24_spill] sm:$0xff] %v8514_v44  ;;  %10716 = vst [vmem:[#allocation30_spill] sm:$0xff] %v8519_v50  ;;  %v8524_v42 = vpop.f32.mrb[153].mxu0  ;;  %v2748_v21 = vmul.f32 %v8514_v44, %v8514_v44  ;;  %v2809_v35 = vmul.f32 0.044715, %v2777_v2  ;;  %v2751_v32 = vmul.f32 %v8519_v50, %v8519_v50  ;;  %v2640_v60 = vadd.f32 %v2610_v12, %v8061_v38 }
 0x294   : > { %v2678_v34 = vmul.f32 %v8274_v17, %v2639_v4  ;;  %v8535_v36 = vpop.f32.mrb[154].mxu0  ;;  %6653 = vtanh.f32 %v2869_v31  ;;  %v2810_v6 = vmul.f32 0.044715, %v2778_v47  ;;  %v2555_v1 = vrot.slane %v8459_v14, 1 }
 0x295   : > { %v2553_v29 = vrot.slane %v8464_v15, 1  ;;  %v8539_v16 = vpop.f32.mrb[155].mxu0  ;;  %v2780_v63 = vmul.f32 %v2748_v21, %v8514_v44  ;;  %v2783_v2 = vmul.f32 %v2751_v32, %v8519_v50  ;;  %v2679_v20 = vmul.f32 %v8274_v17, %v2640_v60 }
 0x296   : > { %v8545_v38 = vadd.f32 %v8284_v51, %v2678_v34  ;;  %v2840_v12 = vadd.f32 %v2808_v39, %v8452_v26  ;;  %v2875_v4 = vmul.f32 0.7978846, %v2843_v7  ;;  %v2556_v14 = vrot.slane %v8473_v43, 1 }
 0x297   : > { %v2576_v31 = vsel %vm2026_vm1, %v2552_v3, %v2553_v29  ;;  %v2841_v15 = vadd.f32 %v2809_v35, %v8476_v59  ;;  %v2815_v47 = vmul.f32 0.044715, %v2783_v2  ;;  %v8553_v21 = vadd.f32 %v8284_v51, %v2679_v20 }
 0x298   : > { %v2749_v32 = vmul.f32 %v8545_v38, %v8545_v38  ;;  %v2842_v60 = vadd.f32 %v2810_v6, %v8489_v41  ;;  %v2612_v39 = vsel %vm333_vm3, %v2576_v31, 0.0  ;;  %v2573_v7 = vsel %vm2026_vm1, %v2555_v1, %v2556_v14 }
 0x299   : > { %v2554_v3 = vrot.slane %v8482_v18, 1  ;;  %v2812_v35 = vmul.f32 0.044715, %v2780_v63  ;;  %v2750_v20 = vmul.f32 %v8553_v21, %v8553_v21  ;;  %v2642_v2 = vadd.f32 %v2612_v39, %v8091_v46 }
 0x29a   : > { %v8563_v43 = vpop.f32.mrb[156].mxu0  ;;  %v2781_v34 = vmul.f32 %v2749_v32, %v8545_v38  ;;  %v8571_v6 = vmul.f32 0.7978846, %v2840_v12  ;;  %v2645_v31 = vadd.f32 %v2573_v7, %v8145_v58  ;;  %6655 = vtanh.f32 %v2875_v4 }
 0x29b   : > { %v8569_v26 = vpop.f32.mrb[157].mxu0  ;;  %v2574_v41 = vsel %vm2026_vm1, %v2554_v3, %v2555_v1  ;;  %v2575_v18 = vsel %vm2026_vm1, %v2553_v29, %v2554_v3  ;;  %v8580_v59 = vpop.eup %6651  ;;  %v2847_v32 = vadd.f32 %v2815_v47, %v8519_v50  ;;  %v2782_v46 = vmul.f32 %v2750_v20, %v8553_v21 }
 0x29c   : > { %v8578_v63 = vpop.f32.mrb[158].mxu0  ;;  %v2681_v12 = vmul.f32 %v8274_v17, %v2642_v2  ;;  %v2873_v58 = vmul.f32 0.7978846, %v2841_v15  ;;  %v2684_v7 = vmul.f32 %v8274_v17, %v2645_v31  ;;  %v2614_v1 = vsel %vm333_vm3, %v2574_v41, 0.0 }
 0x29d   : > { %v8585_v39 = vpop.f32.mrb[159].mxu0  ;;  %v2643_v29 = vadd.f32 %v2575_v18, %v8115_v5  ;;  %v8591_v3 = vmul.f32 0.7978846, %v2842_v60  ;;  %v2844_v4 = vadd.f32 %v2812_v35, %v8514_v44  ;;  %v2813_v25 = vmul.f32 0.044715, %v2781_v34 }
 0x29e   : > { %v8595_v47 = vadd.f32 %v8284_v51, %v2681_v12  ;;  %v8597_v20 = vpop.eup %6653  ;;  %v8600_v2 = vadd.f32 %v8284_v51, %v2684_v7  ;;  %v2644_v15 = vadd.f32 %v2614_v1, %v8121_v33  ;;  %v2557_v41 = vrot.slane %v8524_v42, 1 }
 0x29f   : > { %v2682_v31 = vmul.f32 %v8274_v17, %v2643_v29  ;;  %v2879_v5 = vmul.f32 0.7978846, %v2847_v32  ;;  %v2814_v60 = vmul.f32 0.044715, %v2782_v46  ;;  %6657 = vtanh.f32 %v8426_v24 }
 0x2a0   : > { %v2752_v35 = vmul.f32 %v8595_v47, %v8595_v47  ;;  %v2755_v34 = vmul.f32 %v8600_v2, %v8600_v2  ;;  %v2683_v18 = vmul.f32 %v8274_v17, %v2644_v15  ;;  %v2572_v33 = vsel %vm2026_vm1, %v2556_v14, %v2557_v41 }
 0x2a1   : > { %v8612_v12 = vadd.f32 %v8284_v51, %v2682_v31  ;;  %v2845_v42 = vadd.f32 %v2813_v25, %v8545_v38  ;;  %v2559_v46 = vrot.slane %v8516_v52, 1  ;;  %v2616_v24 = vsel %vm333_vm3, %v2572_v33, 0.0 }
 0x2a2   : > { %v2784_v32 = vmul.f32 %v2752_v35, %v8595_v47  ;;  %v2787_v7 = vmul.f32 %v2755_v34, %v8600_v2  ;;  %v8623_v1 = vadd.f32 %v8284_v51, %v2683_v18  ;;  %v2646_v15 = vadd.f32 %v2616_v24, %v8151_v56 }
 0x2a3   : > { %v2753_v29 = vmul.f32 %v8612_v12, %v8612_v12  ;;  %v2846_v14 = vadd.f32 %v2814_v60, %v8553_v21  ;;  %v2927_v25 = vadd.f32 1.0, %v8484_v61  ;;  %v2560_v31 = vrot.slane %v8535_v36, 1 }
 0x2a4   : > { %v2558_v52 = vrot.slane %v8539_v16, 1  ;;  %v2819_v35 = vmul.f32 0.044715, %v2787_v7  ;;  %v2754_v34 = vmul.f32 %v8623_v1, %v8623_v1  ;;  %v2685_v33 = vmul.f32 %v8274_v17, %v2646_v15  ;;  %v8636_v44 = vpop.eup %6655 }
 0x2a5   : > { %v2785_v18 = vmul.f32 %v2753_v29, %v8612_v12  ;;  %v2877_v50 = vmul.f32 0.7978846, %v2845_v42  ;;  %v2816_v56 = vmul.f32 0.044715, %v2784_v32  ;;  %v2569_v60 = vsel %vm2026_vm1, %v2559_v46, %v2560_v31 }
 0x2a6   : > { %v2570_v36 = vsel %vm2026_vm1, %v2558_v52, %v2559_v46  ;;  %v2851_v61 = vadd.f32 %v2819_v35, %v8600_v2  ;;  %v8644_v24 = vadd.f32 %v8284_v51, %v2685_v33  ;;  %v2959_v7 = vmul.f32 0.5, %v2927_v25 }
 0x2a7   : > { %v2817_v16 = vmul.f32 0.044715, %v2785_v18  ;;  %6659 = vtanh.f32 %v2873_v58  ;;  %v8646_v29 = vmul.f32 0.7978846, %v2844_v4  ;;  %v2649_v15 = vadd.f32 %v2569_v60, %v8205_v55 }
 0x2a8   : > { %v2571_v42 = vsel %vm2026_vm1, %v2557_v41, %v2558_v52  ;;  %6661 = vtanh.f32 %v2879_v5  ;;  %v8651_v32 = vmul.f32 0.7978846, %v2846_v14  ;;  %v2786_v46 = vmul.f32 %v2754_v34, %v8623_v1 }
 0x2a9   : > { %v2849_v35 = vadd.f32 %v2817_v16, %v8612_v12  ;;  %v6658_v18 = vpop.eup %6657  ;;  %6663 = vtanh.f32 %v2877_v50  ;;  %v2688_v33 = vmul.f32 %v8274_v17, %v2649_v15  ;;  %v2618_v58 = vsel %vm333_vm3, %v2570_v36, 0.0 }
 0x2aa   : > { %v2647_v4 = vadd.f32 %v2571_v42, %v8175_v9  ;;  %v2848_v55 = vadd.f32 %v2816_v56, %v8595_v47  ;;  %v2883_v25 = vmul.f32 0.7978846, %v2851_v61  ;;  %v2756_v41 = vmul.f32 %v8644_v24, %v8644_v24 }
 0x2ab   : > { %v2991_v5 = vmul.f32 %v2959_v7, %v8306_v53  ;;  %v2928_v14 = vadd.f32 1.0, %v6658_v18  ;;  %v8664_v52 = vadd.f32 %v8284_v51, %v2688_v33  ;;  %v2648_v50 = vadd.f32 %v2618_v58, %v8181_v22  ;;  %v6585_v33 = vld [vmem:[#allocation7 + $0x10] ss:$36 sps:$4 sm:$0xff]  }
 0x2ac   : > { %v2686_v34 = vmul.f32 %v8274_v17, %v2647_v4  ;;  %v2818_v60 = vmul.f32 0.044715, %v2786_v46  ;;  %v2881_v36 = vmul.f32 0.7978846, %v2849_v35  ;;  %v2563_v9 = vrot.slane %v8563_v43, 1 }
 0x2ad   : > { %v2561_v56 = vrot.slane %v8569_v26, 1  ;;  %v2960_v61 = vmul.f32 0.5, %v2928_v14  ;;  %v2759_v16 = vmul.f32 %v8664_v52, %v8664_v52  ;;  %v2687_v53 = vmul.f32 %v8274_v17, %v2648_v50 }
 0x2ae   : > { %v8674_v7 = vadd.f32 %v8284_v51, %v2686_v34  ;;  %v2788_v15 = vmul.f32 %v2756_v41, %v8644_v24  ;;  %6665 = vtanh.f32 %v8435_v45  ;;  %v2929_v43 = vadd.f32 1.0, %v8508_v49  ;;  %v6597_v34 = vld [vmem:[#allocation7 + $0x18] ss:$36 sps:$4 sm:$0xff]  }
 0x2af   : > { %v2568_v22 = vsel %vm2026_vm1, %v2560_v31, %v2561_v56  ;;  %v2992_v26 = vmul.f32 %v2960_v61, %v8332_v48  ;;  %v2791_v42 = vmul.f32 %v2759_v16, %v8664_v52  ;;  %v8684_v46 = vadd.f32 %v8284_v51, %v2687_v53 }
 0x2b0   : > { %v2757_v35 = vmul.f32 %v8674_v7, %v8674_v7  ;;  %v8688_v18 = vmul.f32 0.7978846, %v2848_v55  ;;  %6667 = vtanh.f32 %v2883_v25  ;;  %v2620_v31 = vsel %vm333_vm3, %v2568_v22, 0.0  ;;  %v6590_v55 = vld [vmem:[#allocation7 + $0x5c] ss:$36 sps:$4 sm:$0xff]  }
 0x2b1   : > { %v2564_v45 = vrot.slane %v8578_v63, 1  ;;  %v8693_v49 = vpop.eup %6659  ;;  %v2850_v48 = vadd.f32 %v2818_v60, %v8623_v1  ;;  %v8696_v58 = vpack.c.bf16 %v2992_v26, %v2991_v5  ;;  %v2758_v4 = vmul.f32 %v8684_v46, %v8684_v46  ;;  %v6605_v60 = vld [vmem:[#allocation7 + $0x64] ss:$36 sps:$4 sm:$0xff]  }
 0x2b2   : > { %v2789_v41 = vmul.f32 %v2757_v35, %v8674_v7  ;;  %v8701_v14 = vpop.eup %6661  ;;  %6669 = vtanh.f32 %v2881_v36  ;;  %v2650_v25 = vadd.f32 %v2620_v31, %v8211_v10  ;;  %v10717_v50 = vrot.slane %v8277_v8, 1  ;;  %v6588_v31 = vld [vmem:[#allocation7 + $0x58] ss:$36 sps:$4 sm:$0xff]  }
 0x2b3   : > { %v2565_v63 = vsel %vm2026_vm1, %v2563_v9, %v2564_v45  ;;  %v8710_v61 = vpop.eup %6663  ;;  %v2820_v16 = vmul.f32 0.044715, %v2788_v15  ;;  %3520 = vmatmul.mubr.bf16.vlgmr.msra.gmra.mrb[128].mxu1 %v8696_v58  ;;  %3710 = vmatmul.mubr.bf16.vlgmr.msra.gmra.mrb[160].mxu0 %v8696_v58  ;;  %v2823_v36 = vmul.f32 0.044715, %v2791_v42  ;;  %v2961_v53 = vmul.f32 0.5, %v2929_v43 }
 0x2b4   : > { %v2594_v5 = vsel %vm2026_vm1, %v2564_v45, %v10717_v50  ;;  %3870 = vmatpush1.bf16.msra.mxu1 %v6585_v33  ;;  %v10718_v22 = vmov 0   ;;  %v2689_v8 = vmul.f32 %v8274_v17, %v2650_v25  ;;  %v2653_v26 = vadd.f32 %v2565_v63, %v8269_v13  ;;  %v6593_v33 = vld [vmem:[#allocation7 + $0xa4] ss:$36 sps:$4 sm:$0xff]   ;;  %4063 = vmatpush1.bf16.msra.mxu0 %v6597_v34  ;;  %v6611_v63 = vld [vmem:[#allocation7 + $0xac] ss:$36 sps:$4 sm:$0xff]  }
 0x2b5   : > { %v2624_v10 = vsel %vm333_vm3, %v2594_v5, 0.0  ;;  %3529 = vmatprep.mubr.bf16.mxu1 %v10718_v22  ;;  %v2562_v15 = vrot.slane %v8585_v39, 1  ;;  %v8721_v45 = vmul.f32 0.7978846, %v2850_v48  ;;  %v2790_v42 = vmul.f32 %v2758_v4, %v8684_v46  ;;  %3719 = vmatprep.mubr.bf16.mxu0 %v10718_v22  ;;  %v6603_v48 = vld [vmem:[#allocation7 + $0x60] ss:$36 sps:$4 sm:$0xff]  }
 0x2b6   : > { %v2654_v35 = vadd.f32 %v2624_v10, %v8286_v57  ;;  %v2821_v43 = vmul.f32 0.044715, %v2789_v41  ;;  %6671 = vtanh.f32 %v8510_v37  ;;  %3871 = vmatprep.subr.bf16.mxu1 %v6590_v55  ;;  %v8727_v25 = vadd.f32 %v8284_v51, %v2689_v8  ;;  %4064 = vmatprep.subr.bf16.mxu0 %v6605_v60 }
 0x2b7   : > { %v2692_v13 = vmul.f32 %v8274_v17, %v2653_v26  ;;  %v2566_v39 = vsel %vm2026_vm1, %v2562_v15, %v2563_v9  ;;  %v2852_v4 = vadd.f32 %v2820_v16, %v8644_v24  ;;  %v2855_v41 = vadd.f32 %v2823_v36, %v8664_v52 }
 0x2b8   : > { %v2693_v57 = vmul.f32 %v8274_v17, %v2654_v35  ;;  %v2993_v37 = vmul.f32 %v2961_v53, %v8348_v30  ;;  %v2567_v55 = vsel %vm2026_vm1, %v2561_v56, %v2562_v15  ;;  %v6666_v50 = vpop.eup %6665  ;;  %v2760_v5 = vmul.f32 %v8727_v25, %v8727_v25  ;;  %3872 = vmatpush1.bf16.msra.mxu1 %v6588_v31  ;;  %v6591_v30 = vld [vmem:[#allocation7 + $0xa0] ss:$36 sps:$4 sm:$0xff]   ;;  %v6596_v53 = vld [vmem:[#allocation7 + $0xec] ss:$36 sps:$4 sm:$0xff]  }
 0x2b9   : > { %v8741_v10 = vadd.f32 %v8284_v51, %v2692_v13  ;;  %v2622_v34 = vsel %vm333_vm3, %v2566_v39, 0.0  ;;  %v2822_v16 = vmul.f32 0.044715, %v2790_v42  ;;  %v2853_v56 = vadd.f32 %v2821_v43, %v8674_v7  ;;  %3873 = vmatprep.subr.bf16.mxu1 %v6593_v33  ;;  %4065 = vmatpush1.bf16.msra.mxu0 %v6603_v48  ;;  %v6609_v42 = vld [vmem:[#allocation7 + $0xa8] ss:$36 sps:$4 sm:$0xff]  }
 0x2ba   : > { %v8744_v9 = vadd.f32 %v8284_v51, %v2693_v57  ;;  %v2930_v60 = vadd.f32 1.0, %v6666_v50  ;;  %v2651_v36 = vadd.f32 %v2567_v55, %v8235_v54  ;;  %v8750_v8 = vpop.eup %6667  ;;  %v2792_v26 = vmul.f32 %v2760_v5, %v8727_v25  ;;  %4066 = vmatprep.subr.bf16.mxu0 %v6611_v63  ;;  %v6617_v33 = vld [vmem:[#allocation7 + $0xf4] ss:$36 sps:$4 sm:$0xff]  }
 0x2bb   : > { %v2763_v35 = vmul.f32 %v8741_v10, %v8741_v10  ;;  %v2652_v31 = vadd.f32 %v2622_v34, %v8241_v19  ;;  %v2887_v43 = vmul.f32 0.7978846, %v2855_v41  ;;  %6673 = vtanh.f32 %v8526_v28  ;;  %v6594_v19 = vld [vmem:[#allocation7 + $0xe8] ss:$36 sps:$4 sm:$0xff]  }
 0x2bc   : > { %v2764_v15 = vmul.f32 %v8744_v9, %v8744_v9  ;;  %v2962_v13 = vmul.f32 0.5, %v2930_v60  ;;  %v2690_v54 = vmul.f32 %v8274_v17, %v2651_v36  ;;  %v8760_v57 = vpop.eup %6669  ;;  %v2824_v39 = vmul.f32 0.044715, %v2792_v26  ;;  %3874 = vmatpush1.bf16.msra.mxu1 %v6591_v30  ;;  %v6615_v26 = vld [vmem:[#allocation7 + $0xf0] ss:$36 sps:$4 sm:$0xff]  }
 0x2bd   : > { %v2795_v55 = vmul.f32 %v2763_v35, %v8741_v10  ;;  %v2691_v50 = vmul.f32 %v8274_v17, %v2652_v31  ;;  %v2931_v5 = vadd.f32 1.0, %v8496_v23  ;;  %v8765_v48 = vmul.f32 0.7978846, %v2852_v4  ;;  %3875 = vmatprep.subr.bf16.mxu1 %v6596_v53  ;;  %4067 = vmatpush1.bf16.msra.mxu0 %v6609_v42 }
 0x2be   : > { %v2854_v41 = vadd.f32 %v2822_v16, %v8684_v46  ;;  %v2994_v34 = vmul.f32 %v2962_v13, %v8351_v11  ;;  %v8770_v28 = vadd.f32 %v8284_v51, %v2690_v54  ;;  %v2885_v63 = vmul.f32 0.7978846, %v2853_v56  ;;  %v6602_v16 = vld [vmem:[#allocation7 + $0x134] ss:$36 sps:$4 sm:$0xff]   ;;  %4068 = vmatprep.subr.bf16.mxu0 %v6617_v33 }
 0x2bf   : > { %v2796_v60 = vmul.f32 %v2764_v15, %v8744_v9  ;;  %v2827_v36 = vmul.f32 0.044715, %v2795_v55  ;;  %v8774_v17 = vadd.f32 %v8284_v51, %v2691_v50  ;;  %6675 = vtanh.f32 %v2887_v43  ;;  %v6600_v15 = vld [vmem:[#allocation7 + $0x130] ss:$36 sps:$4 sm:$0xff]   ;;  %v6608_v43 = vld [vmem:[#allocation7 + $0x17c] ss:$36 sps:$4 sm:$0xff]  }
 0x2c0   : > { %v6672_v23 = vpop.eup %6671  ;;  %v8776_v4 = vpack.c.bf16 %v2994_v34, %v2993_v37  ;;  %v2761_v30 = vmul.f32 %v8770_v28, %v8770_v28  ;;  %v2933_v11 = vadd.f32 1.0, %v8597_v20  ;;  %v2856_v56 = vadd.f32 %v2824_v39, %v8727_v25  ;;  %3876 = vmatpush1.bf16.msra.mxu1 %v6594_v19  ;;  %v6623_v37 = vld [vmem:[#allocation7 + $0x13c] ss:$36 sps:$4 sm:$0xff]  }
 0x2c1   : > { %v2859_v53 = vadd.f32 %v2827_v36, %v8741_v10  ;;  %v2762_v51 = vmul.f32 %v8774_v17, %v8774_v17  ;;  %v2963_v35 = vmul.f32 0.5, %v2931_v5  ;;  %v8785_v31 = vmul.f32 0.7978846, %v2854_v41  ;;  %v6606_v39 = vld [vmem:[#allocation7 + $0x178] ss:$36 sps:$4 sm:$0xff]   ;;  %3877 = vmatprep.subr.bf16.mxu1 %v6602_v16  ;;  %4069 = vmatpush1.bf16.msra.mxu0 %v6615_v26 }
 0x2c2   : > { %3530 = vmatmul.mubr.bf16.gmra.mrb[132].mxu1 %v8776_v4  ;;  %3720 = vmatmul.mubr.bf16.gmra.mrb[164].mxu0 %v8776_v4  ;;  %v2793_v20 = vmul.f32 %v2761_v30, %v8770_v28  ;;  %v2932_v42 = vadd.f32 1.0, %v6672_v23  ;;  %6677 = vtanh.f32 %v8571_v6  ;;  %v2828_v13 = vmul.f32 0.044715, %v2796_v60  ;;  %v6621_v55 = vld [vmem:[#allocation7 + $0x138] ss:$36 sps:$4 sm:$0xff]  }
 0x2c3   : > { %6679 = vtanh.f32 %v2885_v63  ;;  %v2794_v54 = vmul.f32 %v2762_v51, %v8774_v17  ;;  %3539 = vmatprep.mubr.bf16.mxu1 %v10718_v22  ;;  %3729 = vmatprep.mubr.bf16.mxu0 %v10718_v22  ;;  %v2935_v33 = vadd.f32 1.0, %v8580_v59  ;;  %v2965_v19 = vmul.f32 0.5, %v2933_v11  ;;  %v6626_v6 = vld [vmem:[#allocation7 + $0x184] ss:$36 sps:$4 sm:$0xff]  }
 0x2c4   : > { %v2825_v50 = vmul.f32 0.044715, %v2793_v20  ;;  %v2964_v5 = vmul.f32 0.5, %v2932_v42  ;;  %6681 = vtanh.f32 %v8591_v3  ;;  %v8796_v41 = vmul.f32 0.7978846, %v2856_v56  ;;  %3878 = vmatpush1.bf16.msra.mxu1 %v6600_v15  ;;  %4070 = vmatprep.subr.bf16.mxu0 %v6623_v37 }
 0x2c5   : > { %v2891_v34 = vmul.f32 0.7978846, %v2859_v53  ;;  %v2826_v63 = vmul.f32 0.044715, %v2794_v54  ;;  %v2995_v60 = vmul.f32 %v2963_v35, %v8335_v40  ;;  %v6674_v36 = vpop.eup %6673  ;;  %v2937_v30 = vadd.f32 1.0, %v8693_v49  ;;  %3879 = vmatprep.subr.bf16.mxu1 %v6608_v43  ;;  %4071 = vmatpush1.bf16.msra.mxu0 %v6621_v55 }
 0x2c6   : > { %v2857_v59 = vadd.f32 %v2825_v50, %v8770_v28  ;;  %v2996_v23 = vmul.f32 %v2964_v5, %v8390_v62  ;;  %6683 = vtanh.f32 %v8646_v29  ;;  %v2860_v3 = vadd.f32 %v2828_v13, %v8744_v9  ;;  %v6614_v51 = vld [vmem:[#allocation7 + $0x1c4] ss:$36 sps:$4 sm:$0xff]   ;;  %v10719_v29 = vld [vmem:[#allocation18_spill] sm:$0xff]  ;;  %4072 = vmatprep.subr.bf16.mxu0 %v6626_v6 }
 0x2c7   : > { %v2934_v11 = vadd.f32 1.0, %v6674_v36  ;;  %v2967_v16 = vmul.f32 0.5, %v2935_v33  ;;  %v2939_v26 = vadd.f32 1.0, %v8636_v44  ;;  %v2858_v40 = vadd.f32 %v2826_v63, %v8774_v17  ;;  %v6624_v62 = vld [vmem:[#allocation7 + $0x180] ss:$36 sps:$4 sm:$0xff]  }
 0x2c8   : > { %v2889_v56 = vmul.f32 0.7978846, %v2857_v59  ;;  %v8806_v53 = vpack.c.bf16 %v2996_v23, %v2995_v60  ;;  %6685 = vtanh.f32 %v8651_v32  ;;  %v2997_v35 = vmul.f32 %v2965_v19, %v10719_v29  ;;  %3880 = vmatpush1.bf16.msra.mxu1 %v6606_v39  ;;  %v6612_v37 = vld [vmem:[#allocation7 + $0x1c0] ss:$36 sps:$4 sm:$0xff]   ;;  %v6629_v44 = vld [vmem:[#allocation7 + $0x1cc] ss:$36 sps:$4 sm:$0xff]  }
 0x2c9   : > { %6687 = vtanh.f32 %v2891_v34  ;;  %v2966_v49 = vmul.f32 0.5, %v2934_v11  ;;  %v2941_v15 = vadd.f32 1.0, %v8710_v61  ;;  %v8811_v20 = vpop.eup %6675  ;;  %v2969_v32 = vmul.f32 0.5, %v2937_v30  ;;  %v6620_v13 = vld [vmem:[#allocation7 + $0x20c] ss:$36 sps:$4 sm:$0xff]   ;;  %v10721_v5 = vld [vmem:[#allocation12_spill] sm:$0xff]  ;;  %3881 = vmatprep.subr.bf16.mxu1 %v6614_v51  ;;  %4073 = vmatpush1.bf16.msra.mxu0 %v6624_v62 }
 0x2ca   : > { %6689 = vtanh.f32 %v2889_v56  ;;  %3540 = vmatmul.mubr.bf16.gmra.mrb[136].mxu1 %v8806_v53  ;;  %3730 = vmatmul.mubr.bf16.gmra.mrb[168].mxu0 %v8806_v53  ;;  %v2943_v42 = vadd.f32 1.0, %v8701_v14  ;;  %v2945_v43 = vadd.f32 1.0, %v8760_v57  ;;  %v2892_v54 = vmul.f32 0.7978846, %v2860_v3  ;;  %v10720_v61 = vld [vmem:[#allocation17_spill] sm:$0xff]  ;;  %v10722_v23 = vld [vmem:[#allocation15_spill] sm:$0xff] }
 0x2cb   : > { %3549 = vmatprep.mubr.bf16.mxu1 %v10718_v22  ;;  %3739 = vmatprep.mubr.bf16.mxu0 %v10718_v22  ;;  %v2998_v33 = vmul.f32 %v2966_v49, %v10720_v61  ;;  %v2971_v39 = vmul.f32 0.5, %v2939_v26  ;;  %6691 = vtanh.f32 %v8688_v18  ;;  %v2890_v50 = vmul.f32 0.7978846, %v2858_v40  ;;  %v6627_v57 = vld [vmem:[#allocation7 + $0x1c8] ss:$36 sps:$4 sm:$0xff]  }
 0x2cc   : > { %v6678_v55 = vpop.eup %6677  ;;  %v2999_v19 = vmul.f32 %v2967_v16, %v10721_v5  ;;  %6693 = vtanh.f32 %v8721_v45  ;;  %v2947_v14 = vadd.f32 1.0, %v8750_v8  ;;  %v2973_v60 = vmul.f32 0.5, %v2941_v15  ;;  %3882 = vmatpush1.bf16.msra.mxu1 %v6612_v37  ;;  %v6618_v18 = vld [vmem:[#allocation7 + $0x208] ss:$36 sps:$4 sm:$0xff]   ;;  %4074 = vmatprep.subr.bf16.mxu0 %v6629_v44  ;;  %v6632_v36 = vld [vmem:[#allocation7 + $0x214] ss:$36 sps:$4 sm:$0xff]  }
 0x2cd   : > { %v6680_v6 = vpop.eup %6679  ;;  %v8824_v34 = vpack.c.bf16 %v2998_v33, %v2997_v35  ;;  %v2936_v63 = vadd.f32 1.0, %v6678_v55  ;;  %6695 = vtanh.f32 %v8765_v48  ;;  %v3001_v30 = vmul.f32 %v2969_v32, %v10722_v23  ;;  %3883 = vmatprep.subr.bf16.mxu1 %v6620_v13  ;;  %v10723_v16 = vld [vmem:[#allocation19_spill] sm:$0xff]  ;;  %v6630_v40 = vld [vmem:[#allocation7 + $0x210] ss:$36 sps:$4 sm:$0xff]   ;;  %v10724_v62 = vld [vmem:[#allocation21_spill] sm:$0xff]  ;;  %4075 = vmatpush1.bf16.msra.mxu0 %v6627_v57 }
 0x2ce   : > { %v6682_v59 = vpop.eup %6681  ;;  %v2975_v45 = vmul.f32 0.5, %v2943_v42  ;;  %v2977_v3 = vmul.f32 0.5, %v2945_v43  ;;  %6697 = vtanh.f32 %v8785_v31  ;;  %v3003_v26 = vmul.f32 %v2971_v39, %v10723_v16  ;;  %v8832_v29 = vld [vmem:[#allocation7 + $0x20] ss:$36 sps:$4 sm:$0xff]   ;;  %4076 = vmatprep.subr.bf16.mxu0 %v6632_v36  ;;  %v10727_v13 = vld [vmem:[#allocation14_spill] sm:$0xff]  ;;  %v10728_v39 = vld [vmem:[#allocation25_spill] sm:$0xff] }
 0x2cf   : > { %v2968_v8 = vmul.f32 0.5, %v2936_v63  ;;  %v2938_v11 = vadd.f32 1.0, %v6682_v59  ;;  %6699 = vtanh.f32 %v8796_v41  ;;  %v2979_v56 = vmul.f32 0.5, %v2947_v14  ;;  %v10725_v35 = vld [vmem:[#allocation20_spill] sm:$0xff]  ;;  %v10726_v41 = vld [vmem:[#allocation30_spill] sm:$0xff] }
 0x2d0   : > { %v6684_v48 = vpop.eup %6683  ;;  %v2949_v51 = vadd.f32 1.0, %v6680_v6  ;;  %6701 = vtanh.f32 %v2890_v50  ;;  %v2957_v49 = vadd.f32 1.0, %v10724_v62  ;;  %v3005_v44 = vmul.f32 %v2973_v60, %v8545_v38  ;;  %3884 = vmatpush1.bf16.msra.mxu1 %v6618_v18  ;;  %v10729_v18 = vld [vmem:[#allocation24_spill] sm:$0xff] }
 0x2d1   : > { %v3000_v15 = vmul.f32 %v2968_v8, %v10725_v35  ;;  %v2970_v31 = vmul.f32 0.5, %v2938_v11  ;;  %v2940_v37 = vadd.f32 1.0, %v6684_v48  ;;  %v3007_v42 = vmul.f32 %v2975_v45, %v10726_v41  ;;  %4077 = vmatpush1.bf16.msra.mxu0 %v6630_v40  ;;  %6295 = vmatprep.subr.bf16.mxu1 %v8832_v29  ;;  %v10730_v8 = vld [vmem:[#allocation16_spill] sm:$0xff] }
 0x2d2   : > { %v6686_v32 = vpop.eup %6685  ;;  %3550 = vmatmul.mubr.bf16.gmra.mrb[140].mxu1 %v8824_v34  ;;  %3740 = vmatmul.mubr.bf16.gmra.mrb[172].mxu0 %v8824_v34  ;;  %v3009_v43 = vmul.f32 %v2977_v3, %v8612_v12  ;;  %6703 = vtanh.f32 %v2892_v54  ;;  %v2958_v61 = vadd.f32 1.0, %v10727_v13  ;;  %v3011_v57 = vmul.f32 %v2979_v56, %v8600_v2  ;;  %v10731_v2 = vld [vmem:[#allocation13_spill] sm:$0xff] }
 0x2d3   : > { %v6688_v33 = vpop.eup %6687  ;;  %3559 = vmatprep.mubr.bf16.mxu1 %v10718_v22  ;;  %3749 = vmatprep.mubr.bf16.mxu0 %v10718_v22  ;;  %v8843_v38 = vpack.c.bf16 %v3000_v15, %v2999_v19  ;;  %v3002_v55 = vmul.f32 %v2970_v31, %v10728_v39  ;;  %v2972_v50 = vmul.f32 0.5, %v2940_v37  ;;  %v2942_v5 = vadd.f32 1.0, %v6686_v32 }
 0x2d4   : > { %v6690_v14 = vpop.eup %6689  ;;  %v2981_v6 = vmul.f32 0.5, %v2949_v51  ;;  %v2989_v63 = vmul.f32 0.5, %v2957_v49  ;;  %v2990_v12 = vmul.f32 0.5, %v2958_v61  ;;  %v2951_v3 = vadd.f32 1.0, %v8811_v20 }
 0x2d5   : > { %v6692_v54 = vpop.eup %6691  ;;  %v8848_v60 = vpack.c.bf16 %v3002_v55, %v3001_v30  ;;  %v3004_v36 = vmul.f32 %v2972_v50, %v10729_v18  ;;  %v2974_v19 = vmul.f32 0.5, %v2942_v5  ;;  %v2953_v59 = vadd.f32 1.0, %v6690_v14 }
 0x2d6   : > { %v6694_v23 = vpop.eup %6693  ;;  %v2944_v45 = vadd.f32 1.0, %v6692_v54  ;;  %v3021_v11 = vmul.f32 %v2989_v63, %v10730_v8  ;;  %v3022_v16 = vmul.f32 %v2990_v12, %v10731_v2  ;;  %v2955_v30 = vadd.f32 1.0, %v6688_v33 }
 0x2d7   : > { %v6696_v48 = vpop.eup %6695  ;;  %v8854_v56 = vpack.c.bf16 %v3004_v36, %v3003_v26  ;;  %v3006_v40 = vmul.f32 %v2974_v19, %v8553_v21  ;;  %v2946_v51 = vadd.f32 1.0, %v6694_v23  ;;  %v2985_v15 = vmul.f32 0.5, %v2953_v59 }
 0x2d8   : > { %v6698_v62 = vpop.eup %6697  ;;  %v2976_v49 = vmul.f32 0.5, %v2944_v45  ;;  %v2948_v35 = vadd.f32 1.0, %v6696_v48  ;;  %v8857_v31 = vpack.c.bf16 %v3022_v16, %v3021_v11  ;;  %v3013_v13 = vmul.f32 %v2981_v6, %v8674_v7 }
 0x2d9   : > { %v6700_v37 = vpop.eup %6699  ;;  %v8859_v32 = vpack.c.bf16 %v3006_v40, %v3005_v44  ;;  %v2978_v20 = vmul.f32 0.5, %v2946_v51  ;;  %v2950_v41 = vadd.f32 1.0, %v6698_v62  ;;  %v2983_v39 = vmul.f32 0.5, %v2951_v3  ;;  %v6640_v3 = vld [vmem:[#allocation7 + $0x218] ss:$36 sps:$4 sm:$0xff]  }
 0x2da   : > { %v6702_v61 = vpop.eup %6701  ;;  %3560 = vmatmul.mubr.bf16.gmra.mrb[144].mxu1 %v8843_v38  ;;  %3750 = vmatmul.mubr.bf16.gmra.mrb[176].mxu0 %v8843_v38  ;;  %v3008_v21 = vmul.f32 %v2976_v49, %v8595_v47  ;;  %v2980_v26 = vmul.f32 0.5, %v2948_v35  ;;  %v2952_v33 = vadd.f32 1.0, %v6700_v37  ;;  %v2987_v5 = vmul.f32 0.5, %v2955_v30 }
 0x2db   : > { %3569 = vmatprep.mubr.bf16.mxu1 %v10718_v22  ;;  %3759 = vmatprep.mubr.bf16.mxu0 %v10718_v22  ;;  %v3010_v44 = vmul.f32 %v2978_v20, %v8623_v1  ;;  %v2982_v55 = vmul.f32 0.5, %v2950_v41  ;;  %v2954_v50 = vadd.f32 1.0, %v6702_v61  ;;  %v3017_v47 = vmul.f32 %v2985_v15, %v8770_v28 }
 0x2dc   : > { %v6704_v7 = vpop.eup %6703  ;;  %v8868_v14 = vpack.c.bf16 %v3008_v21, %v3007_v42  ;;  %v3012_v6 = vmul.f32 %v2980_v26, %v8644_v24  ;;  %v2984_v63 = vmul.f32 0.5, %v2952_v33  ;;  %v3015_v1 = vmul.f32 %v2983_v39, %v8664_v52 }
 0x2dd   : > { %v8872_v12 = vpack.c.bf16 %v3010_v44, %v3009_v43  ;;  %v3014_v54 = vmul.f32 %v2982_v55, %v8684_v46  ;;  %v2986_v18 = vmul.f32 0.5, %v2954_v50  ;;  %v2956_v36 = vadd.f32 1.0, %v6704_v7 }
 0x2de   : > { %v8875_v19 = vpack.c.bf16 %v3012_v6, %v3011_v57  ;;  %v3016_v59 = vmul.f32 %v2984_v63, %v8727_v25  ;;  %v3019_v45 = vmul.f32 %v2987_v5, %v8741_v10  ;;  %v6634_v25 = vld [vmem:[#allocation7 + $0x68] ss:$36 sps:$4 sm:$0xff]   ;;  %v6635_v10 = vld [vmem:[#allocation7 + $0xb0] ss:$36 sps:$4 sm:$0xff]  }
 0x2df   : > { %v8879_v23 = vpack.c.bf16 %v3014_v54, %v3013_v13  ;;  %v3018_v42 = vmul.f32 %v2986_v18, %v8774_v17  ;;  %v2988_v24 = vmul.f32 0.5, %v2956_v36  ;;  %v6637_v17 = vld [vmem:[#allocation7 + $0x140] ss:$36 sps:$4 sm:$0xff]   ;;  %v6639_v57 = vld [vmem:[#allocation7 + $0x1d0] ss:$36 sps:$4 sm:$0xff]  }
 0x2e0   : > { %v8883_v28 = vpack.c.bf16 %v3016_v59, %v3015_v1 }
 0x2e1   : > { %v8885_v43 = vpack.c.bf16 %v3018_v42, %v3017_v47  ;;  %v3020_v46 = vmul.f32 %v2988_v24, %v8744_v9  ;;  %v6636_v9 = vld [vmem:[#allocation7 + $0xf8] ss:$36 sps:$4 sm:$0xff]  }
 0x2e2   : > { %3570 = vmatmul.mubr.bf16.gmra.mrb[148].mxu1 %v8848_v60  ;;  %3760 = vmatmul.mubr.bf16.gmra.mrb[180].mxu0 %v8848_v60 }
 0x2e3   : > { %3579 = vmatprep.mubr.bf16.mxu1 %v10718_v22  ;;  %3769 = vmatprep.mubr.bf16.mxu0 %v10718_v22  ;;  %v8892_v52 = vpack.c.bf16 %v3020_v46, %v3019_v45 }
 0x2ea   : > { %3580 = vmatmul.mubr.bf16.gmra.mrb[152].mxu1 %v8854_v56  ;;  %3770 = vmatmul.mubr.bf16.gmra.mrb[184].mxu0 %v8854_v56 }
 0x2eb   : > { %3589 = vmatprep.mubr.bf16.mxu1 %v10718_v22  ;;  %3779 = vmatprep.mubr.bf16.mxu0 %v10718_v22 }
 0x2f2   : > { %3590 = vmatmul.mubr.bf16.gmra.mrb[156].mxu1 %v8859_v32  ;;  %3780 = vmatmul.mubr.bf16.gmra.mrb[188].mxu0 %v8859_v32 }
 0x2f3   : > { %3599 = vmatprep.mubr.bf16.mxu1 %v10718_v22  ;;  %3789 = vmatprep.mubr.bf16.mxu0 %v10718_v22 }
 0x2fa   : > { %3600 = vmatmul.mubr.bf16.gmra.mrb[160].mxu1 %v8868_v14  ;;  %3790 = vmatmul.mubr.bf16.gmra.mrb[192].mxu0 %v8868_v14 }
 0x2fb   : > { %3609 = vmatprep.mubr.bf16.mxu1 %v10718_v22  ;;  %3799 = vmatprep.mubr.bf16.mxu0 %v10718_v22 }
 0x302   : > { %3610 = vmatmul.mubr.bf16.gmra.mrb[164].mxu1 %v8872_v12  ;;  %3800 = vmatmul.mubr.bf16.gmra.mrb[196].mxu0 %v8872_v12 }
 0x303   : > { %3619 = vmatprep.mubr.bf16.mxu1 %v10718_v22  ;;  %3809 = vmatprep.mubr.bf16.mxu0 %v10718_v22 }
 0x30a   : > { %3620 = vmatmul.mubr.bf16.gmra.mrb[168].mxu1 %v8875_v19  ;;  %3810 = vmatmul.mubr.bf16.gmra.mrb[200].mxu0 %v8875_v19 }
 0x30b   : > { %3629 = vmatprep.mubr.bf16.mxu1 %v10718_v22  ;;  %3819 = vmatprep.mubr.bf16.mxu0 %v10718_v22 }
 0x312   : > { %3630 = vmatmul.mubr.bf16.gmra.mrb[172].mxu1 %v8879_v23  ;;  %3820 = vmatmul.mubr.bf16.gmra.mrb[204].mxu0 %v8879_v23 }
 0x313   : > { %3639 = vmatprep.mubr.bf16.mxu1 %v10718_v22  ;;  %3829 = vmatprep.mubr.bf16.mxu0 %v10718_v22 }
 0x31a   : > { %3640 = vmatmul.mubr.bf16.gmra.mrb[176].mxu1 %v8883_v28  ;;  %3830 = vmatmul.mubr.bf16.gmra.mrb[208].mxu0 %v8883_v28 }
 0x31b   : > { %3649 = vmatprep.mubr.bf16.mxu1 %v10718_v22  ;;  %3839 = vmatprep.mubr.bf16.mxu0 %v10718_v22 }
 0x322   : > { %3650 = vmatmul.mubr.bf16.gmra.mrb[180].mxu1 %v8885_v43  ;;  %3840 = vmatmul.mubr.bf16.gmra.mrb[212].mxu0 %v8885_v43 }
 0x323   : > { %3659 = vmatprep.mubr.bf16.mxu1 %v10718_v22  ;;  %3849 = vmatprep.mubr.bf16.mxu0 %v10718_v22 }
 0x32a   : > { %3660 = vmatmul.mubr.bf16.gmra.mrb[184].mxu1 %v8892_v52  ;;  %3850 = vmatmul.mubr.bf16.gmra.mrb[216].mxu0 %v8892_v52 }
 0x32b   : > { %3669 = vmatprep.mubr.bf16.mxu1 %v10718_v22  ;;  %3859 = vmatprep.mubr.bf16.mxu0 %v10718_v22 }
 0x332   : > { %3670 = vmatmul.mubr.bf16.gmra.mrb[188].mxu1 %v8857_v31  ;;  %3860 = vmatmul.mubr.bf16.gmra.mrb[220].mxu0 %v8857_v31 }
 0x333   : > { %3901 = vmatprep.mubr.bf16.mxu1 %v10718_v22  ;;  %4094 = vmatprep.mubr.bf16.mxu0 %v10718_v22 }
 0x33a   : > { %3902 = vmatmul.mubr.bf16.vlgmr.msra.gmra.mrb[192].mxu1 %v8696_v58  ;;  %4095 = vmatmul.mubr.bf16.vlgmr.msra.gmra.mrb[224].mxu0 %v8696_v58 }
 0x33b   : > { %6296 = vmatpush3.bf16.msra.mxu1 %v8832_v29  ;;  %3911 = vmatprep.mubr.bf16.mxu1 %v10718_v22  ;;  %v6638_v29 = vld [vmem:[#allocation7 + $0x188] ss:$36 sps:$4 sm:$0xff]  }
 0x33c   : > { %4101 = vmatprep.mubr.bf16.mxu0 %v10718_v22  ;;  %6297 = vmatprep.subr.bf16.mxu1 %v6634_v25 }
 0x33f   : > { %6298 = vmatpush3.bf16.msra.mxu1 %v6634_v25 }
 0x340   : > { %6299 = vmatprep.subr.bf16.mxu1 %v6635_v10 }
 0x342   : > { %3912 = vmatmul.mubr.bf16.gmra.mrb[196].mxu1 %v8776_v4  ;;  %4102 = vmatmul.mubr.bf16.gmra.mrb[228].mxu0 %v8776_v4 }
 0x343   : > { %3921 = vmatprep.mubr.bf16.mxu1 %v10718_v22  ;;  %4111 = vmatprep.mubr.bf16.mxu0 %v10718_v22 }
 0x344   : > { %6300 = vmatpush3.bf16.msra.mxu1 %v6635_v10 }
 0x345   : > { %6301 = vmatprep.subr.bf16.mxu1 %v6636_v9 }
 0x348   : > { %6302 = vmatpush3.bf16.msra.mxu1 %v6636_v9 }
 0x349   : > { %6303 = vmatprep.subr.bf16.mxu1 %v6637_v17 }
 0x34a   : > { %3922 = vmatmul.mubr.bf16.gmra.mrb[200].mxu1 %v8806_v53  ;;  %4112 = vmatmul.mubr.bf16.gmra.mrb[232].mxu0 %v8806_v53 }
 0x34b   : > { %3931 = vmatprep.mubr.bf16.mxu1 %v10718_v22  ;;  %4121 = vmatprep.mubr.bf16.mxu0 %v10718_v22 }
 0x34c   : > { %6304 = vmatpush3.bf16.msra.mxu1 %v6637_v17 }
 0x34d   : > { %6305 = vmatprep.subr.bf16.mxu1 %v6638_v29 }
 0x350   : > { %6306 = vmatpush3.bf16.msra.mxu1 %v6638_v29 }
 0x351   : > { %6307 = vmatprep.subr.bf16.mxu1 %v6639_v57 }
 0x352   : > { %3932 = vmatmul.mubr.bf16.gmra.mrb[204].mxu1 %v8824_v34  ;;  %4122 = vmatmul.mubr.bf16.gmra.mrb[236].mxu0 %v8824_v34 }
 0x353   : > { %3941 = vmatprep.mubr.bf16.mxu1 %v10718_v22  ;;  %4131 = vmatprep.mubr.bf16.mxu0 %v10718_v22 }
 0x354   : > { %6308 = vmatpush3.bf16.msra.mxu1 %v6639_v57 }
 0x355   : > { %6309 = vmatprep.subr.bf16.mxu1 %v6640_v3 }
 0x358   : > { %6310 = vmatpush3.bf16.msra.mxu1 %v6640_v3 }
 0x35a   : > { %3942 = vmatmul.mubr.bf16.gmra.mrb[208].mxu1 %v8843_v38  ;;  %4132 = vmatmul.mubr.bf16.gmra.mrb[240].mxu0 %v8843_v38 }
 0x35b   : > { %3951 = vmatprep.mubr.bf16.mxu1 %v10718_v22  ;;  %4141 = vmatprep.mubr.bf16.mxu0 %v10718_v22 }
 0x362   : > { %3952 = vmatmul.mubr.bf16.gmra.mrb[212].mxu1 %v8848_v60  ;;  %4142 = vmatmul.mubr.bf16.gmra.mrb[244].mxu0 %v8848_v60 }
 0x363   : > { %3961 = vmatprep.mubr.bf16.mxu1 %v10718_v22  ;;  %4151 = vmatprep.mubr.bf16.mxu0 %v10718_v22 }
 0x36a   : > { %3962 = vmatmul.mubr.bf16.gmra.mrb[216].mxu1 %v8854_v56  ;;  %4152 = vmatmul.mubr.bf16.gmra.mrb[248].mxu0 %v8854_v56 }
 0x36b   : > { %3971 = vmatprep.mubr.bf16.mxu1 %v10718_v22  ;;  %4161 = vmatprep.mubr.bf16.mxu0 %v10718_v22 }
 0x372   : > { %3972 = vmatmul.mubr.bf16.gmra.mrb[220].mxu1 %v8859_v32  ;;  %4162 = vmatmul.mubr.bf16.gmra.mrb[252].mxu0 %v8859_v32 }
 0x373   : > { %3981 = vmatprep.mubr.bf16.mxu1 %v10718_v22  ;;  %4171 = vmatprep.mubr.bf16.mxu0 %v10718_v22 }
 0x37a   : > { %3982 = vmatmul.mubr.bf16.gmra.mrb[224].mxu1 %v8868_v14  ;;  %4172 = vmatmul.mubr.bf16.gmra.mrb[0].mxu0 %v8868_v14 }
 0x37b   : > { %3991 = vmatprep.mubr.bf16.mxu1 %v10718_v22  ;;  %4181 = vmatprep.mubr.bf16.mxu0 %v10718_v22 }
 0x382   : > { %3992 = vmatmul.mubr.bf16.gmra.mrb[228].mxu1 %v8872_v12  ;;  %4182 = vmatmul.mubr.bf16.gmra.mrb[4].mxu0 %v8872_v12 }
 0x383   : > { %4001 = vmatprep.mubr.bf16.mxu1 %v10718_v22  ;;  %4191 = vmatprep.mubr.bf16.mxu0 %v10718_v22 }
 0x386   : > { %v8975_v8 = vpop.f32.mrb[128].mxu1  ;;  %v3711_v11 = vpop.f32.mrb[160].mxu0 }
 0x387   : > { %v8977_v2 = vpop.f32.mrb[129].mxu1  ;;  %v8979_v16 = vpop.f32.mrb[161].mxu0  ;;  %v10529_v51 = vrot.slane %v8975_v8, 7  ;;  %v4567_v30 = vrot.slane %v3711_v11, 1 }
 0x388   : > { %v3525_v48 = vpop.f32.mrb[130].mxu1  ;;  %v3715_v40 = vpop.f32.mrb[162].mxu0  ;;  %v10528_v37 = vrot.slane %v8979_v16, 7 }
 0x389   : > { %v4413_v62 = vrot.slane %v3525_v48, 7  ;;  %v4568_v49 = vrot.slane %v3715_v40, 1  ;;  %v8984_v35 = vpop.f32.mrb[131].mxu1  ;;  %v3717_v15 = vpop.f32.mrb[163].mxu0 }
 0x38a   : > { %4002 = vmatmul.mubr.bf16.gmra.mrb[232].mxu1 %v8875_v19  ;;  %4192 = vmatmul.mubr.bf16.gmra.mrb[8].mxu0 %v8875_v19  ;;  %v4691_v20 = vrot.slane %v3717_v15, 7 }
 0x38b   : > { %4011 = vmatprep.mubr.bf16.mxu1 %v10718_v22  ;;  %4201 = vmatprep.mubr.bf16.mxu0 %v10718_v22  ;;  %v8991_v41 = vsel %vm2026_vm1, %v4567_v30, %v4568_v49  ;;  %v8997_v13 = vsel %vm1866_vm0, %v10529_v51, %v4413_v62 }
 0x38c   : > { %v9003_v61 = vsel %vm1866_vm0, %v10528_v37, %v4691_v20 }
 0x392   : > { %4012 = vmatmul.mubr.bf16.gmra.mrb[236].mxu1 %v8879_v23  ;;  %4202 = vmatmul.mubr.bf16.gmra.mrb[12].mxu0 %v8879_v23 }
 0x393   : > { %4021 = vmatprep.mubr.bf16.mxu1 %v10718_v22  ;;  %4211 = vmatprep.mubr.bf16.mxu0 %v10718_v22 }
 0x395   : > { %v3531_v21 = vpop.f32.mrb[132].mxu1  ;;  %v3721_v26 = vpop.f32.mrb[164].mxu0 }
 0x396   : > { %v4414_v33 = vrot.slane %v3531_v21, 7  ;;  %v4569_v39 = vrot.slane %v3721_v26, 1  ;;  %v9009_v44 = vpop.f32.mrb[133].mxu1  ;;  %v3723_v55 = vpop.f32.mrb[165].mxu0 }
 0x397   : > { %v4692_v50 = vrot.slane %v3723_v55, 7  ;;  %v3535_v5 = vpop.f32.mrb[134].mxu1  ;;  %v3725_v7 = vpop.f32.mrb[166].mxu0 }
 0x398   : > { %v9013_v6 = vsel %vm2026_vm1, %v4568_v49, %v4569_v39  ;;  %v4415_v63 = vrot.slane %v3535_v5, 7  ;;  %v4570_v47 = vrot.slane %v3725_v7, 1  ;;  %v9015_v54 = vpop.f32.mrb[135].mxu1  ;;  %v3727_v18 = vpop.f32.mrb[167].mxu0  ;;  %v9019_v36 = vsel %vm1866_vm0, %v4413_v62, %v4414_v33 }
 0x399   : > { %v9023_v1 = vsel %vm1866_vm0, %v4691_v20, %v4692_v50  ;;  %v4693_v59 = vrot.slane %v3727_v18, 7 }
 0x39a   : > { %v9027_v42 = vsel %vm2026_vm1, %v4569_v39, %v4570_v47  ;;  %4022 = vmatmul.mubr.bf16.gmra.mrb[240].mxu1 %v8883_v28  ;;  %4212 = vmatmul.mubr.bf16.gmra.mrb[16].mxu0 %v8883_v28  ;;  %v9033_v24 = vsel %vm1866_vm0, %v4414_v33, %v4415_v63 }
 0x39b   : > { %v9037_v45 = vsel %vm1866_vm0, %v4692_v50, %v4693_v59  ;;  %4031 = vmatprep.mubr.bf16.mxu1 %v10718_v22  ;;  %4221 = vmatprep.mubr.bf16.mxu0 %v10718_v22 }
 0x39d   : > { %v3541_v46 = vpop.f32.mrb[136].mxu1  ;;  %v3731_v25 = vpop.f32.mrb[168].mxu0 }
 0x39e   : > { %v4416_v10 = vrot.slane %v3541_v46, 7  ;;  %v4571_v9 = vrot.slane %v3731_v25, 1  ;;  %v9041_v17 = vpop.f32.mrb[137].mxu1  ;;  %v3733_v29 = vpop.f32.mrb[169].mxu0 }
 0x39f   : > { %v4694_v57 = vrot.slane %v3733_v29, 7  ;;  %v3545_v3 = vpop.f32.mrb[138].mxu1  ;;  %v3735_v11 = vpop.f32.mrb[170].mxu0 }
 0x3a0   : > { %v9045_v48 = vsel %vm2026_vm1, %v4570_v47, %v4571_v9  ;;  %v4417_v40 = vrot.slane %v3545_v3, 7  ;;  %v4572_v30 = vrot.slane %v3735_v11, 1  ;;  %v9047_v62 = vpop.f32.mrb[139].mxu1  ;;  %v3737_v49 = vpop.f32.mrb[171].mxu0  ;;  %v9051_v15 = vsel %vm1866_vm0, %v4415_v63, %v4416_v10 }
 0x3a1   : > { %v9055_v20 = vsel %vm1866_vm0, %v4693_v59, %v4694_v57  ;;  %v4695_v21 = vrot.slane %v3737_v49, 7 }
 0x3a2   : > { %v9059_v26 = vsel %vm2026_vm1, %v4571_v9, %v4572_v30  ;;  %4032 = vmatmul.mubr.bf16.gmra.mrb[244].mxu1 %v8885_v43  ;;  %4222 = vmatmul.mubr.bf16.gmra.mrb[20].mxu0 %v8885_v43  ;;  %v9065_v33 = vsel %vm1866_vm0, %v4416_v10, %v4417_v40 }
 0x3a3   : > { %v9069_v39 = vsel %vm1866_vm0, %v4694_v57, %v4695_v21  ;;  %4041 = vmatprep.mubr.bf16.mxu1 %v10718_v22  ;;  %4231 = vmatprep.mubr.bf16.mxu0 %v10718_v22 }
 0x3a5   : > { %v3551_v55 = vpop.f32.mrb[140].mxu1  ;;  %v3741_v50 = vpop.f32.mrb[172].mxu0 }
 0x3a6   : > { %v4418_v5 = vrot.slane %v3551_v55, 7  ;;  %v4573_v7 = vrot.slane %v3741_v50, 1  ;;  %v9073_v63 = vpop.f32.mrb[141].mxu1  ;;  %v3743_v47 = vpop.f32.mrb[173].mxu0 }
 0x3a7   : > { %v4696_v18 = vrot.slane %v3743_v47, 7  ;;  %v3555_v59 = vpop.f32.mrb[142].mxu1  ;;  %v3745_v46 = vpop.f32.mrb[174].mxu0 }
 0x3a8   : > { %v9077_v25 = vsel %vm2026_vm1, %v4572_v30, %v4573_v7  ;;  %v4419_v10 = vrot.slane %v3555_v59, 7  ;;  %v4574_v9 = vrot.slane %v3745_v46, 1  ;;  %v9079_v29 = vpop.f32.mrb[143].mxu1  ;;  %v3747_v57 = vpop.f32.mrb[175].mxu0  ;;  %v9083_v3 = vsel %vm1866_vm0, %v4417_v40, %v4418_v5 }
 0x3a9   : > { %10732 = vst [vmem:[#allocation22_spill] sm:$0xff] %v9079_v29  ;;  %v9087_v11 = vsel %vm1866_vm0, %v4695_v21, %v4696_v18  ;;  %v4697_v49 = vrot.slane %v3747_v57, 7 }
 0x3aa   : > { %v9091_v55 = vsel %vm2026_vm1, %v4573_v7, %v4574_v9  ;;  %4042 = vmatmul.mubr.bf16.gmra.mrb[248].mxu1 %v8892_v52  ;;  %4232 = vmatmul.mubr.bf16.gmra.mrb[24].mxu0 %v8892_v52  ;;  %v9097_v30 = vsel %vm1866_vm0, %v4418_v5, %v4419_v10 }
 0x3ab   : > { %10733 = vst [vmem:[#allocation27_spill] sm:$0xff] %v9091_v55  ;;  %10734 = vst [vmem:[#allocation26_spill] sm:$0xff] %v9097_v30  ;;  %v9101_v40 = vsel %vm1866_vm0, %v4696_v18, %v4697_v49  ;;  %4051 = vmatprep.mubr.bf16.mxu1 %v10718_v22  ;;  %4241 = vmatprep.mubr.bf16.mxu0 %v10718_v22 }
 0x3ad   : > { %v3561_v21 = vpop.f32.mrb[144].mxu1  ;;  %v3751_v50 = vpop.f32.mrb[176].mxu0 }
 0x3ae   : > { %v4420_v7 = vrot.slane %v3561_v21, 7  ;;  %v4575_v47 = vrot.slane %v3751_v50, 1  ;;  %v9105_v59 = vpop.f32.mrb[145].mxu1  ;;  %v3753_v46 = vpop.f32.mrb[177].mxu0 }
 0x3af   : > { %10735 = vst [vmem:[#allocation23_spill] sm:$0xff] %v9105_v59  ;;  %v4698_v57 = vrot.slane %v3753_v46, 7  ;;  %v3565_v37 = vpop.f32.mrb[146].mxu1  ;;  %v3755_v51 = vpop.f32.mrb[178].mxu0 }
 0x3b0   : > { %v9109_v5 = vsel %vm2026_vm1, %v4574_v9, %v4575_v47  ;;  %v4421_v18 = vrot.slane %v3565_v37, 7  ;;  %v4576_v29 = vrot.slane %v3755_v51, 1  ;;  %v9111_v55 = vpop.f32.mrb[147].mxu1  ;;  %v3757_v30 = vpop.f32.mrb[179].mxu0  ;;  %v9115_v22 = vsel %vm1866_vm0, %v4419_v10, %v4420_v7 }
 0x3b1   : > { %10736 = vst [vmem:[#allocation32_spill] sm:$0xff] %v9111_v55  ;;  %10737 = vst [vmem:[#allocation31_spill] sm:$0xff] %v9115_v22  ;;  %v9119_v21 = vsel %vm1866_vm0, %v4697_v49, %v4698_v57  ;;  %v4699_v50 = vrot.slane %v3757_v30, 7 }
 0x3b2   : > { %10738 = vst [vmem:[#allocation28_spill] sm:$0xff] %v9119_v21  ;;  %v9123_v46 = vsel %vm2026_vm1, %v4575_v47, %v4576_v29  ;;  %4052 = vmatmul.mubr.bf16.gmra.mrb[252].mxu1 %v8857_v31  ;;  %4242 = vmatmul.mubr.bf16.gmra.mrb[28].mxu0 %v8857_v31  ;;  %v9129_v51 = vsel %vm1866_vm0, %v4420_v7, %v4421_v18 }
 0x3b3   : > { %10739 = vst [vmem:[#allocation34_spill] sm:$0xff] %v9123_v46  ;;  %10740 = vst [vmem:[#allocation33_spill] sm:$0xff] %v9129_v51  ;;  %v9133_v37 = vsel %vm1866_vm0, %v4698_v57, %v4699_v50  ;;  %6311 = vmatprep.mubr.bf16.mxu1 %v8696_v58 }
 0x3b4   : > { %10741 = vst [vmem:[#allocation29_spill] sm:$0xff] %v9133_v37 }
 0x3b5   : > { %v3571_v10 = vpop.f32.mrb[148].mxu1  ;;  %v3761_v9 = vpop.f32.mrb[180].mxu0 }
 0x3b6   : > { %v4422_v49 = vrot.slane %v3571_v10, 7  ;;  %v4577_v30 = vrot.slane %v3761_v9, 1  ;;  %v9136_v47 = vpop.f32.mrb[149].mxu1  ;;  %v3763_v55 = vpop.f32.mrb[181].mxu0 }
 0x3b7   : > { %10742 = vst [vmem:[#allocation37_spill] sm:$0xff] %v9136_v47  ;;  %v4700_v46 = vrot.slane %v3763_v55, 7  ;;  %v3575_v59 = vpop.f32.mrb[150].mxu1  ;;  %v3765_v22 = vpop.f32.mrb[182].mxu0 }
 0x3b8   : > { %v9140_v7 = vsel %vm2026_vm1, %v4576_v29, %v4577_v30  ;;  %v4423_v51 = vrot.slane %v3575_v59, 7  ;;  %v4578_v21 = vrot.slane %v3765_v22, 1  ;;  %v9142_v57 = vpop.f32.mrb[151].mxu1  ;;  %v3767_v37 = vpop.f32.mrb[183].mxu0  ;;  %v9146_v58 = vsel %vm1866_vm0, %v4421_v18, %v4422_v49 }
 0x3b9   : > { %10743 = vst [vmem:[#allocation35_spill] sm:$0xff] %v9142_v57  ;;  %10744 = vst [vmem:[#allocation39_spill] sm:$0xff] %v9146_v58  ;;  %v9150_v10 = vsel %vm1866_vm0, %v4699_v50, %v4700_v46  ;;  %v4701_v55 = vrot.slane %v3767_v37, 7 }
 0x3ba   : > { %v9154_v9 = vsel %vm2026_vm1, %v4577_v30, %v4578_v21  ;;  %6312 = vmatmul.mubr.bf16.vlgmr.msra.gmra.mrb[0].mxu1 %v8776_v4  ;;  %v9159_v29 = vsel %vm1866_vm0, %v4422_v49, %v4423_v51 }
 0x3bb   : > { %10745 = vst [vmem:[#allocation38_spill] sm:$0xff] %v9154_v9  ;;  %10746 = vst [vmem:[#allocation36_spill] sm:$0xff] %v9159_v29  ;;  %v9163_v59 = vsel %vm1866_vm0, %v4700_v46, %v4701_v55  ;;  %6315 = vmatprep.mubr.bf16.mxu1 %v8806_v53 }
 0x3bc   : > { %10747 = vst [vmem:[#allocation43_spill] sm:$0xff] %v9163_v59 }
 0x3bd   : > { %v3581_v18 = vpop.f32.mrb[152].mxu1  ;;  %v3771_v22 = vpop.f32.mrb[184].mxu0 }
 0x3be   : > { %v4424_v50 = vrot.slane %v3581_v18, 7  ;;  %v4579_v37 = vrot.slane %v3771_v22, 1  ;;  %v9166_v57 = vpop.f32.mrb[153].mxu1  ;;  %v3773_v30 = vpop.f32.mrb[185].mxu0 }
 0x3bf   : > { %10748 = vst [vmem:[#allocation42_spill] sm:$0xff] %v9166_v57  ;;  %v4702_v9 = vrot.slane %v3773_v30, 7  ;;  %v3585_v47 = vpop.f32.mrb[154].mxu1  ;;  %v3775_v4 = vpop.f32.mrb[186].mxu0 }
 0x3c0   : > { %v9170_v49 = vsel %vm2026_vm1, %v4578_v21, %v4579_v37  ;;  %v4425_v29 = vrot.slane %v3585_v47, 7  ;;  %v4580_v58 = vrot.slane %v3775_v4, 1  ;;  %v9172_v46 = vpop.f32.mrb[155].mxu1  ;;  %v3777_v59 = vpop.f32.mrb[187].mxu0  ;;  %v9176_v53 = vsel %vm1866_vm0, %v4423_v51, %v4424_v50 }
 0x3c1   : > { %10749 = vst [vmem:[#allocation40_spill] sm:$0xff] %v9172_v46  ;;  %10750 = vst [vmem:[#allocation45_spill] sm:$0xff] %v9176_v53  ;;  %v9180_v18 = vsel %vm1866_vm0, %v4701_v55, %v4702_v9  ;;  %v4703_v22 = vrot.slane %v3777_v59, 7 }
 0x3c2   : > { %v9184_v30 = vsel %vm2026_vm1, %v4579_v37, %v4580_v58  ;;  %6316 = vmatmul.mubr.bf16.gmra.mrb[4].mxu1 %v8824_v34  ;;  %v9189_v21 = vsel %vm1866_vm0, %v4424_v50, %v4425_v29 }
 0x3c3   : > { %10751 = vst [vmem:[#allocation44_spill] sm:$0xff] %v9184_v30  ;;  %10752 = vst [vmem:[#allocation41_spill] sm:$0xff] %v9189_v21  ;;  %v9193_v47 = vsel %vm1866_vm0, %v4702_v9, %v4703_v22  ;;  %6319 = vmatprep.mubr.bf16.mxu1 %v8843_v38 }
 0x3c4   : > { %10753 = vst [vmem:[#allocation49_spill] sm:$0xff] %v9193_v47 }
 0x3c5   : > { %v3591_v51 = vpop.f32.mrb[156].mxu1  ;;  %v3781_v55 = vpop.f32.mrb[188].mxu0 }
 0x3c6   : > { %v4426_v4 = vrot.slane %v3591_v51, 7  ;;  %v4581_v59 = vrot.slane %v3781_v55, 1  ;;  %v9196_v46 = vpop.f32.mrb[157].mxu1  ;;  %v3783_v37 = vpop.f32.mrb[189].mxu0 }
 0x3c7   : > { %10754 = vst [vmem:[#allocation48_spill] sm:$0xff] %v9196_v46  ;;  %v4704_v30 = vrot.slane %v3783_v37, 7  ;;  %v3595_v57 = vpop.f32.mrb[158].mxu1  ;;  %v3785_v34 = vpop.f32.mrb[190].mxu0 }
 0x3c8   : > { %v9200_v50 = vsel %vm2026_vm1, %v4580_v58, %v4581_v59  ;;  %v4427_v21 = vrot.slane %v3595_v57, 7  ;;  %v4582_v53 = vrot.slane %v3785_v34, 1  ;;  %v9202_v9 = vpop.f32.mrb[159].mxu1  ;;  %v3787_v47 = vpop.f32.mrb[191].mxu0  ;;  %v9206_v38 = vsel %vm1866_vm0, %v4425_v29, %v4426_v4 }
 0x3c9   : > { %10755 = vst [vmem:[#allocation46_spill] sm:$0xff] %v9202_v9  ;;  %10756 = vst [vmem:[#allocation51_spill] sm:$0xff] %v9206_v38  ;;  %v9210_v51 = vsel %vm1866_vm0, %v4703_v22, %v4704_v30  ;;  %v4705_v55 = vrot.slane %v3787_v47, 7 }
 0x3ca   : > { %v9214_v37 = vsel %vm2026_vm1, %v4581_v59, %v4582_v53  ;;  %6320 = vmatmul.mubr.bf16.gmra.mrb[8].mxu1 %v8848_v60  ;;  %v9219_v57 = vsel %vm1866_vm0, %v4426_v4, %v4427_v21 }
 0x3cb   : > { %10757 = vst [vmem:[#allocation50_spill] sm:$0xff] %v9214_v37  ;;  %10758 = vst [vmem:[#allocation47_spill] sm:$0xff] %v9219_v57  ;;  %v9223_v58 = vsel %vm1866_vm0, %v4704_v30, %v4705_v55  ;;  %6323 = vmatprep.mubr.bf16.mxu1 %v8854_v56 }
 0x3cc   : > { %10759 = vst [vmem:[#allocation55_spill] sm:$0xff] %v9223_v58 }
 0x3cd   : > { %v3601_v29 = vpop.f32.mrb[160].mxu1  ;;  %v3791_v22 = vpop.f32.mrb[192].mxu0 }
 0x3ce   : > { %v4428_v34 = vrot.slane %v3601_v29, 7  ;;  %v4583_v47 = vrot.slane %v3791_v22, 1  ;;  %v9226_v9 = vpop.f32.mrb[161].mxu1  ;;  %v3793_v59 = vpop.f32.mrb[193].mxu0 }
 0x3cf   : > { %10760 = vst [vmem:[#allocation54_spill] sm:$0xff] %v9226_v9  ;;  %v4706_v37 = vrot.slane %v3793_v59, 7  ;;  %v3605_v46 = vpop.f32.mrb[162].mxu1  ;;  %v3795_v60 = vpop.f32.mrb[194].mxu0 }
 0x3d0   : > { %v9230_v4 = vsel %vm2026_vm1, %v4582_v53, %v4583_v47  ;;  %v4429_v57 = vrot.slane %v3605_v46, 7  ;;  %v4584_v38 = vrot.slane %v3795_v60, 1  ;;  %v9232_v30 = vpop.f32.mrb[163].mxu1  ;;  %v3797_v58 = vpop.f32.mrb[195].mxu0  ;;  %v9236_v56 = vsel %vm1866_vm0, %v4427_v21, %v4428_v34 }
 0x3d1   : > { %10761 = vst [vmem:[#allocation52_spill] sm:$0xff] %v9232_v30  ;;  %10762 = vst [vmem:[#allocation57_spill] sm:$0xff] %v9236_v56  ;;  %v9240_v29 = vsel %vm1866_vm0, %v4705_v55, %v4706_v37  ;;  %v4707_v22 = vrot.slane %v3797_v58, 7 }
 0x3d2   : > { %v9244_v59 = vsel %vm2026_vm1, %v4583_v47, %v4584_v38  ;;  %6324 = vmatmul.mubr.bf16.gmra.mrb[12].mxu1 %v8859_v32  ;;  %v9249_v46 = vsel %vm1866_vm0, %v4428_v34, %v4429_v57 }
 0x3d3   : > { %10763 = vst [vmem:[#allocation56_spill] sm:$0xff] %v9244_v59  ;;  %10764 = vst [vmem:[#allocation53_spill] sm:$0xff] %v9249_v46  ;;  %v9253_v53 = vsel %vm1866_vm0, %v4706_v37, %v4707_v22  ;;  %6327 = vmatprep.mubr.bf16.mxu1 %v8868_v14 }
 0x3d4   : > { %10765 = vst [vmem:[#allocation61_spill] sm:$0xff] %v9253_v53 }
 0x3d5   : > { %v3611_v21 = vpop.f32.mrb[164].mxu1  ;;  %v3801_v55 = vpop.f32.mrb[196].mxu0 }
 0x3d6   : > { %v4430_v60 = vrot.slane %v3611_v21, 7  ;;  %v4585_v58 = vrot.slane %v3801_v55, 1  ;;  %v9256_v30 = vpop.f32.mrb[165].mxu1  ;;  %v3803_v47 = vpop.f32.mrb[197].mxu0 }
 0x3d7   : > { %10766 = vst [vmem:[#allocation60_spill] sm:$0xff] %v9256_v30  ;;  %v4708_v59 = vrot.slane %v3803_v47, 7  ;;  %v3615_v9 = vpop.f32.mrb[166].mxu1  ;;  %v3805_v32 = vpop.f32.mrb[198].mxu0 }
 0x3d8   : > { %v9260_v34 = vsel %vm2026_vm1, %v4584_v38, %v4585_v58  ;;  %v4431_v46 = vrot.slane %v3615_v9, 7  ;;  %v4586_v56 = vrot.slane %v3805_v32, 1  ;;  %v9262_v37 = vpop.f32.mrb[167].mxu1  ;;  %v3807_v53 = vpop.f32.mrb[199].mxu0  ;;  %v9266_v14 = vsel %vm1866_vm0, %v4429_v57, %v4430_v60 }
 0x3d9   : > { %10767 = vst [vmem:[#allocation58_spill] sm:$0xff] %v9262_v37  ;;  %10768 = vst [vmem:[#allocation63_spill] sm:$0xff] %v9266_v14  ;;  %v9270_v21 = vsel %vm1866_vm0, %v4707_v22, %v4708_v59  ;;  %v4709_v55 = vrot.slane %v3807_v53, 7 }
 0x3da   : > { %v9274_v47 = vsel %vm2026_vm1, %v4585_v58, %v4586_v56  ;;  %6328 = vmatmul.mubr.bf16.gmra.mrb[16].mxu1 %v8872_v12  ;;  %v9279_v9 = vsel %vm1866_vm0, %v4430_v60, %v4431_v46 }
 0x3db   : > { %10769 = vst [vmem:[#allocation62_spill] sm:$0xff] %v9274_v47  ;;  %10770 = vst [vmem:[#allocation59_spill] sm:$0xff] %v9279_v9  ;;  %v9283_v38 = vsel %vm1866_vm0, %v4708_v59, %v4709_v55  ;;  %6331 = vmatprep.mubr.bf16.mxu1 %v8875_v19 }
 0x3dc   : > { %10771 = vst [vmem:[#allocation67_spill] sm:$0xff] %v9283_v38 }
 0x3dd   : > { %v3621_v57 = vpop.f32.mrb[168].mxu1  ;;  %v3811_v22 = vpop.f32.mrb[200].mxu0 }
 0x3de   : > { %v4432_v32 = vrot.slane %v3621_v57, 7  ;;  %v4587_v53 = vrot.slane %v3811_v22, 1  ;;  %v9286_v37 = vpop.f32.mrb[169].mxu1  ;;  %v3813_v58 = vpop.f32.mrb[201].mxu0 }
 0x3df   : > { %10772 = vst [vmem:[#allocation66_spill] sm:$0xff] %v9286_v37  ;;  %v4710_v47 = vrot.slane %v3813_v58, 7  ;;  %v3625_v30 = vpop.f32.mrb[170].mxu1  ;;  %v3815_v12 = vpop.f32.mrb[202].mxu0 }
 0x3e0   : > { %v9290_v60 = vsel %vm2026_vm1, %v4586_v56, %v4587_v53  ;;  %v4433_v9 = vrot.slane %v3625_v30, 7  ;;  %v4588_v14 = vrot.slane %v3815_v12, 1  ;;  %v9292_v59 = vpop.f32.mrb[171].mxu1  ;;  %v3817_v38 = vpop.f32.mrb[203].mxu0  ;;  %v9296_v19 = vsel %vm1866_vm0, %v4431_v46, %v4432_v32 }
 0x3e1   : > { %10773 = vst [vmem:[#allocation70_spill] sm:$0xff] %v9292_v59  ;;  %10774 = vst [vmem:[#allocation64_spill] sm:$0xff] %v9296_v19  ;;  %v9300_v57 = vsel %vm1866_vm0, %v4709_v55, %v4710_v47  ;;  %v4711_v22 = vrot.slane %v3817_v38, 7 }
 0x3e2   : > { %v9304_v58 = vsel %vm2026_vm1, %v4587_v53, %v4588_v14  ;;  %6332 = vmatmul.mubr.bf16.gmra.mrb[20].mxu1 %v8879_v23  ;;  %v9309_v30 = vsel %vm1866_vm0, %v4432_v32, %v4433_v9 }
 0x3e3   : > { %10775 = vst [vmem:[#allocation69_spill] sm:$0xff] %v9304_v58  ;;  %10776 = vst [vmem:[#allocation73_spill] sm:$0xff] %v9309_v30  ;;  %v9313_v56 = vsel %vm1866_vm0, %v4710_v47, %v4711_v22  ;;  %6335 = vmatprep.mubr.bf16.mxu1 %v8883_v28 }
 0x3e4   : > { %10777 = vst [vmem:[#allocation68_spill] sm:$0xff] %v9313_v56 }
 0x3e5   : > { %v3631_v46 = vpop.f32.mrb[172].mxu1  ;;  %v3821_v55 = vpop.f32.mrb[204].mxu0 }
 0x3e6   : > { %v4434_v12 = vrot.slane %v3631_v46, 7  ;;  %v4589_v38 = vrot.slane %v3821_v55, 1  ;;  %v9316_v59 = vpop.f32.mrb[173].mxu1  ;;  %v3823_v53 = vpop.f32.mrb[205].mxu0 }
 0x3e7   : > { %10778 = vst [vmem:[#allocation65_spill] sm:$0xff] %v9316_v59  ;;  %v4712_v58 = vrot.slane %v3823_v53, 7  ;;  %v3635_v37 = vpop.f32.mrb[174].mxu1  ;;  %v3825_v23 = vpop.f32.mrb[206].mxu0 }
 0x3e8   : > { %v9320_v32 = vsel %vm2026_vm1, %v4588_v14, %v4589_v38  ;;  %v4435_v30 = vrot.slane %v3635_v37, 7  ;;  %v4590_v19 = vrot.slane %v3825_v23, 1  ;;  %v9322_v47 = vpop.f32.mrb[175].mxu1  ;;  %v3827_v56 = vpop.f32.mrb[207].mxu0  ;;  %v9326_v28 = vsel %vm1866_vm0, %v4433_v9, %v4434_v12 }
 0x3e9   : > { %10779 = vst [vmem:[#allocation75_spill] sm:$0xff] %v9322_v47  ;;  %10780 = vst [vmem:[#allocation74_spill] sm:$0xff] %v9326_v28  ;;  %v9330_v46 = vsel %vm1866_vm0, %v4711_v22, %v4712_v58  ;;  %v4713_v55 = vrot.slane %v3827_v56, 7 }
 0x3ea   : > { %v9334_v53 = vsel %vm2026_vm1, %v4589_v38, %v4590_v19  ;;  %6336 = vmatmul.mubr.bf16.gmra.mrb[24].mxu1 %v8885_v43  ;;  %v9339_v37 = vsel %vm1866_vm0, %v4434_v12, %v4435_v30 }
 0x3eb   : > { %10781 = vst [vmem:[#allocation78_spill] sm:$0xff] %v9334_v53  ;;  %10782 = vst [vmem:[#allocation71_spill] sm:$0xff] %v9339_v37  ;;  %v9343_v14 = vsel %vm1866_vm0, %v4712_v58, %v4713_v55  ;;  %6339 = vmatprep.mubr.bf16.mxu1 %v8892_v52 }
 0x3ec   : > { %10783 = vst [vmem:[#allocation77_spill] sm:$0xff] %v9343_v14 }
 0x3ed   : > { %v3641_v9 = vpop.f32.mrb[176].mxu1  ;;  %v3831_v22 = vpop.f32.mrb[208].mxu0 }
 0x3ee   : > { %v4436_v23 = vrot.slane %v3641_v9, 7  ;;  %v4591_v56 = vrot.slane %v3831_v22, 1  ;;  %v9346_v47 = vpop.f32.mrb[177].mxu1  ;;  %v3833_v38 = vpop.f32.mrb[209].mxu0 }
 0x3ef   : > { %10784 = vst [vmem:[#allocation81_spill] sm:$0xff] %v9346_v47  ;;  %v4714_v53 = vrot.slane %v3833_v38, 7  ;;  %v3645_v59 = vpop.f32.mrb[178].mxu1  ;;  %v3835_v43 = vpop.f32.mrb[210].mxu0 }
 0x3f0   : > { %v9350_v12 = vsel %vm2026_vm1, %v4590_v19, %v4591_v56  ;;  %v4437_v37 = vrot.slane %v3645_v59, 7  ;;  %v4592_v28 = vrot.slane %v3835_v43, 1  ;;  %v9352_v58 = vpop.f32.mrb[179].mxu1  ;;  %v3837_v14 = vpop.f32.mrb[211].mxu0  ;;  %v9356_v52 = vsel %vm1866_vm0, %v4435_v30, %v4436_v23 }
 0x3f1   : > { %10785 = vst [vmem:[#allocation76_spill] sm:$0xff] %v9350_v12  ;;  %10786 = vst [vmem:[#allocation72_spill] sm:$0xff] %v9352_v58  ;;  %v9360_v9 = vsel %vm1866_vm0, %v4713_v55, %v4714_v53  ;;  %v4715_v22 = vrot.slane %v3837_v14, 7 }
 0x3f2   : > { %10787 = vst [vmem:[#allocation83_spill] sm:$0xff] %v9356_v52  ;;  %10788 = vst [vmem:[#allocation82_spill] sm:$0xff] %v9360_v9  ;;  %v9364_v38 = vsel %vm2026_vm1, %v4591_v56, %v4592_v28  ;;  %6340 = vmatmul.mubr.bf16.gmra.mrb[28].mxu1 %v8857_v31  ;;  %v9369_v59 = vsel %vm1866_vm0, %v4436_v23, %v4437_v37 }
 0x3f3   : > { %10789 = vst [vmem:[#allocation86_spill] sm:$0xff] %v9364_v38  ;;  %10790 = vst [vmem:[#allocation79_spill] sm:$0xff] %v9369_v59  ;;  %v9373_v19 = vsel %vm1866_vm0, %v4714_v53, %v4715_v22 }
 0x3f4   : > { %10791 = vst [vmem:[#allocation85_spill] sm:$0xff] %v9373_v19 }
 0x3f5   : > { %v3651_v30 = vpop.f32.mrb[180].mxu1  ;;  %v3841_v43 = vpop.f32.mrb[212].mxu0 }
 0x3f6   : > { %v4438_v58 = vrot.slane %v3651_v30, 7  ;;  %v4593_v55 = vrot.slane %v3841_v43, 1  ;;  %v9375_v47 = vpop.f32.mrb[181].mxu1  ;;  %v3843_v14 = vpop.f32.mrb[213].mxu0 }
 0x3f7   : > { %10792 = vst [vmem:[#allocation87_spill] sm:$0xff] %v9375_v47  ;;  %v4716_v52 = vrot.slane %v3843_v14, 7  ;;  %v3655_v56 = vpop.f32.mrb[182].mxu1  ;;  %v3845_v38 = vpop.f32.mrb[214].mxu0 }
 0x3f8   : > { %v9379_v31 = vsel %vm2026_vm1, %v4592_v28, %v4593_v55  ;;  %v4439_v23 = vrot.slane %v3655_v56, 7  ;;  %v4594_v59 = vrot.slane %v3845_v38, 1  ;;  %v9381_v9 = vpop.f32.mrb[183].mxu1  ;;  %v3847_v53 = vpop.f32.mrb[215].mxu0  ;;  %v9385_v19 = vsel %vm1866_vm0, %v4437_v37, %v4438_v58 }
 0x3f9   : > { %10793 = vst [vmem:[#allocation84_spill] sm:$0xff] %v9379_v31  ;;  %10794 = vst [vmem:[#allocation80_spill] sm:$0xff] %v9381_v9  ;;  %v9389_v30 = vsel %vm1866_vm0, %v4715_v22, %v4716_v52  ;;  %v4717_v43 = vrot.slane %v3847_v53, 7 }
 0x3fa   : > { %10795 = vst [vmem:[#allocation88_spill] sm:$0xff] %v9385_v19  ;;  %10796 = vst [vmem:[#allocation90_spill] sm:$0xff] %v9389_v30  ;;  %v9393_v14 = vsel %vm2026_vm1, %v4593_v55, %v4594_v59  ;;  %v9397_v28 = vsel %vm1866_vm0, %v4438_v58, %v4439_v23 }
 0x3fb   : > { %10797 = vst [vmem:[#allocation89_spill] sm:$0xff] %v9393_v14  ;;  %10798 = vst [vmem:[#allocation18_spill] sm:$0xff] %v9397_v28  ;;  %v9401_v38 = vsel %vm1866_vm0, %v4716_v52, %v4717_v43 }
 0x3fc   : > { %10799 = vst [vmem:[#allocation17_spill] sm:$0xff] %v9401_v38 }
 0x3fd   : > { %v3661_v56 = vpop.f32.mrb[184].mxu1  ;;  %v3851_v37 = vpop.f32.mrb[216].mxu0 }
 0x3fe   : > { %v4440_v9 = vrot.slane %v3661_v56, 7  ;;  %v4595_v47 = vrot.slane %v3851_v37, 1  ;;  %v9403_v19 = vpop.f32.mrb[185].mxu1  ;;  %v3853_v22 = vpop.f32.mrb[217].mxu0 }
 0x3ff   : > { %10800 = vst [vmem:[#allocation12_spill] sm:$0xff] %v9403_v19  ;;  %v4718_v53 = vrot.slane %v3853_v22, 7  ;;  %v3665_v30 = vpop.f32.mrb[186].mxu1  ;;  %v3855_v31 = vpop.f32.mrb[218].mxu0 }
 0x400   : > { %v9407_v55 = vsel %vm2026_vm1, %v4594_v59, %v4595_v47  ;;  %v4441_v58 = vrot.slane %v3665_v30, 7  ;;  %v4596_v14 = vrot.slane %v3855_v31, 1  ;;  %v9409_v28 = vpop.f32.mrb[187].mxu1  ;;  %v3857_v52 = vpop.f32.mrb[219].mxu0  ;;  %v9413_v38 = vsel %vm1866_vm0, %v4439_v23, %v4440_v9 }
 0x401   : > { %10801 = vst [vmem:[#allocation15_spill] sm:$0xff] %v9407_v55  ;;  %10802 = vst [vmem:[#allocation19_spill] sm:$0xff] %v9409_v28  ;;  %v9417_v56 = vsel %vm1866_vm0, %v4717_v43, %v4718_v53  ;;  %v4719_v37 = vrot.slane %v3857_v52, 7 }
 0x402   : > { %10803 = vst [vmem:[#allocation21_spill] sm:$0xff] %v9413_v38  ;;  %10804 = vst [vmem:[#allocation20_spill] sm:$0xff] %v9417_v56  ;;  %v9421_v22 = vsel %vm2026_vm1, %v4595_v47, %v4596_v14  ;;  %v9425_v59 = vsel %vm1866_vm0, %v4440_v9, %v4441_v58 }
 0x403   : > { %10805 = vst [vmem:[#allocation30_spill] sm:$0xff] %v9421_v22  ;;  %10806 = vst [vmem:[#allocation14_spill] sm:$0xff] %v9425_v59  ;;  %v9429_v31 = vsel %vm1866_vm0, %v4718_v53, %v4719_v37 }
 0x404   : > { %10807 = vst [vmem:[#allocation25_spill] sm:$0xff] %v9429_v31 }
 0x405   : > { %v3671_v30 = vpop.f32.mrb[188].mxu1  ;;  %v3861_v23 = vpop.f32.mrb[220].mxu0 }
 0x406   : > { %v4597_v28 = vrot.slane %v3861_v23, 1  ;;  %v3672_v19 = vpop.f32.mrb[189].mxu1  ;;  %v3863_v38 = vpop.f32.mrb[221].mxu0  ;;  %v10810_v30 = vrot.slane %v8975_v8, 7 }
 0x407   : > { %v4720_v43 = vrot.slane %v3863_v38, 7  ;;  %v3673_v56 = vpop.f32.mrb[190].mxu1  ;;  %v3865_v52 = vpop.f32.mrb[222].mxu0 }
 0x408   : > { %v9433_v47 = vsel %vm2026_vm1, %v4596_v14, %v4597_v28  ;;  %v4442_v22 = vrot.slane %v3673_v56, 7  ;;  %v3675_v55 = vpop.f32.mrb[191].mxu1  ;;  %v3866_v9 = vpop.f32.mrb[223].mxu0  ;;  %v10812_v14 = vrot.slane %v8979_v16, 7 }
 0x409   : > { %10808 = vst [vmem:[#allocation24_spill] sm:$0xff] %v9433_v47  ;;  %v9437_v58 = vsel %vm1866_vm0, %v4719_v37, %v4720_v43  ;;  %v4721_v53 = vrot.slane %v3866_v9, 7 }
 0x40a   : > { %10809 = vst [vmem:[#allocation16_spill] sm:$0xff] %v9437_v58  ;;  %v4472_v19 = vsel %vm1866_vm0, %v4442_v22, %v10810_v30 }
 0x40b   : > { %v9445_v38 = vsel %vm1866_vm0, %v4720_v43, %v4721_v53  ;;  %v4753_v28 = vsel %vm1866_vm0, %v4721_v53, %v10812_v14 }
 0x40c   : > { %10811 = vst [vmem:[#allocation13_spill] sm:$0xff] %v9445_v38  ;;  %v4754_v55 = vsel %vm330_vm2, %v4753_v28, 0.0 }
 0x40d   : > { %v3903_v56 = vpop.f32.mrb[192].mxu1  ;;  %v4096_v37 = vpop.f32.mrb[224].mxu0 }
 0x40e   : > { %v4786_v23 = vadd.f32 %v4754_v55, %v3903_v56  ;;  %v9453_v52 = vpop.f32.mrb[193].mxu1  ;;  %v4097_v8 = vpop.f32.mrb[225].mxu0  ;;  %v4473_v55 = vsel %vm330_vm2, %v4472_v19, 0.0 }
 0x40f   : > { %10813 = vst [vmem:[#allocation91_spill] sm:$0xff] %v9453_v52  ;;  %v3907_v9 = vpop.f32.mrb[194].mxu1  ;;  %v4098_v22 = vpop.f32.mrb[226].mxu0  ;;  %v10531_v16 = vrot.slane %v9453_v52, 1 }
 0x410   : > { %v4787_v30 = vadd.f32 %v9003_v61, %v3907_v9  ;;  %v3909_v43 = vpop.f32.mrb[195].mxu1  ;;  %v4100_v38 = vpop.f32.mrb[227].mxu0  ;;  %v4946_v37 = vrot.slane %v4098_v22, 7 }
 0x411   : > { %v4819_v58 = vrot.slane %v3909_v43, 1 }
 0x413   : > { %v4880_v53 = vsel %vm2026_vm1, %v10531_v16, %v4819_v58 }
 0x414   : > { %v4914_v14 = vadd.f32 %v4880_v53, %v4786_v23 }
 0x415   : > { %v3913_v28 = vpop.f32.mrb[196].mxu1  ;;  %v4103_v56 = vpop.f32.mrb[228].mxu0 }
 0x416   : > { %v4505_v8 = vadd.f32 %v4473_v55, %v3913_v28  ;;  %v4947_v59 = vrot.slane %v4103_v56, 7  ;;  %v3915_v61 = vpop.f32.mrb[197].mxu1  ;;  %v4105_v9 = vpop.f32.mrb[229].mxu0  ;;  %v4629_v28 = vsel %vm333_vm3, %v9013_v6, 0.0 }
 0x417   : > { %v4820_v38 = vrot.slane %v3915_v61, 1  ;;  %v3917_v47 = vpop.f32.mrb[198].mxu1  ;;  %v4107_v31 = vpop.f32.mrb[230].mxu0 }
 0x418   : > { %v4537_v43 = vadd.f32 %v4505_v8, %v8977_v2  ;;  %v5006_v52 = vsel %vm1866_vm0, %v4946_v37, %v4947_v59  ;;  %v4506_v23 = vadd.f32 %v8997_v13, %v3917_v47  ;;  %v4948_v53 = vrot.slane %v4107_v31, 7  ;;  %v3919_v16 = vpop.f32.mrb[199].mxu1  ;;  %v4109_v12 = vpop.f32.mrb[231].mxu0 }
 0x419   : > { %v4879_v19 = vsel %vm2026_vm1, %v4819_v58, %v4820_v38  ;;  %v5007_v22 = vsel %vm330_vm2, %v5006_v52, 0.0  ;;  %v4821_v55 = vrot.slane %v3919_v16, 1  ;;  %v4756_v31 = vsel %vm330_vm2, %v9023_v1, 0.0 }
 0x41a   : > { %v4660_v2 = vadd.f32 %v8991_v41, %v4537_v43  ;;  %v5037_v56 = vadd.f32 %v5007_v22, %v4914_v14  ;;  %v4538_v37 = vadd.f32 %v4506_v23, %v8984_v35  ;;  %v4883_v13 = vsel %vm333_vm3, %v4879_v19, 0.0 }
 0x41b   : > { %v4878_v47 = vsel %vm2026_vm1, %v4820_v38, %v4821_v55  ;;  %v4915_v58 = vadd.f32 %v4883_v13, %v4787_v30  ;;  %v5005_v6 = vsel %vm1866_vm0, %v4947_v59, %v4948_v53  ;;  %v4475_v8 = vsel %vm330_vm2, %v9019_v36, 0.0 }
 0x41c   : > { %v9485_v52 = vadd.f32 %v5037_v56, %v4105_v9  ;;  %v4661_v41 = vadd.f32 %v4629_v28, %v4538_v37  ;;  %v4788_v16 = vadd.f32 %v4756_v31, %v4660_v2 }
 0x41d   : > { %v5038_v14 = vadd.f32 %v5005_v6, %v4915_v58  ;;  %v3923_v35 = vpop.f32.mrb[200].mxu1  ;;  %v4113_v61 = vpop.f32.mrb[232].mxu0 }
 0x41e   : > { %v4507_v43 = vadd.f32 %v4475_v8, %v3923_v35  ;;  %v4949_v1 = vrot.slane %v4113_v61, 7  ;;  %v3925_v23 = vpop.f32.mrb[201].mxu1  ;;  %v4115_v19 = vpop.f32.mrb[233].mxu0  ;;  %v4916_v38 = vadd.f32 %v4878_v47, %v4788_v16  ;;  %v4789_v30 = vadd.f32 %v9037_v45, %v4661_v41 }
 0x41f   : > { %v9491_v22 = vadd.f32 %v5038_v14, %v4109_v12  ;;  %v4822_v59 = vrot.slane %v3925_v23, 1  ;;  %v3927_v9 = vpop.f32.mrb[202].mxu1  ;;  %v4117_v28 = vpop.f32.mrb[234].mxu0  ;;  %v4631_v12 = vsel %vm333_vm3, %v9045_v48, 0.0  ;;  %v4477_v61 = vsel %vm330_vm2, %v9051_v15, 0.0 }
 0x420   : > { %v4539_v2 = vadd.f32 %v4507_v43, %v9009_v44  ;;  %v5004_v56 = vsel %vm1866_vm0, %v4948_v53, %v4949_v1  ;;  %v4508_v36 = vadd.f32 %v9033_v24, %v3927_v9  ;;  %v4950_v37 = vrot.slane %v4117_v28, 7  ;;  %v3929_v13 = vpop.f32.mrb[203].mxu1  ;;  %v4119_v31 = vpop.f32.mrb[235].mxu0 }
 0x421   : > { %v4877_v47 = vsel %vm2026_vm1, %v4821_v55, %v4822_v59  ;;  %v5009_v45 = vsel %vm330_vm2, %v5004_v56, 0.0  ;;  %v4823_v58 = vrot.slane %v3929_v13, 1  ;;  %v4758_v55 = vsel %vm330_vm2, %v9055_v20, 0.0 }
 0x422   : > { %v4662_v44 = vadd.f32 %v9027_v42, %v4539_v2  ;;  %v5039_v6 = vadd.f32 %v5009_v45, %v4916_v38  ;;  %v4540_v53 = vadd.f32 %v4508_v36, %v9015_v54  ;;  %v4885_v24 = vsel %vm333_vm3, %v4877_v47, 0.0 }
 0x423   : > { %v4876_v41 = vsel %vm2026_vm1, %v4822_v59, %v4823_v58  ;;  %v4917_v16 = vadd.f32 %v4885_v24, %v4789_v30  ;;  %v5003_v48 = vsel %vm1866_vm0, %v4949_v1, %v4950_v37 }
 0x424   : > { %v9515_v14 = vadd.f32 %v5039_v6, %v4115_v19  ;;  %v4663_v42 = vadd.f32 %v4631_v12, %v4540_v53  ;;  %v4790_v35 = vadd.f32 %v4758_v55, %v4662_v44 }
 0x425   : > { %v5040_v8 = vadd.f32 %v5003_v48, %v4917_v16  ;;  %v3933_v54 = vpop.f32.mrb[204].mxu1  ;;  %v4123_v43 = vpop.f32.mrb[236].mxu0  ;;  %v4479_v48 = vsel %vm330_vm2, %v9083_v3, 0.0 }
 0x426   : > { %v4509_v23 = vadd.f32 %v4477_v61, %v3933_v54  ;;  %v4951_v20 = vrot.slane %v4123_v43, 7  ;;  %v3935_v38 = vpop.f32.mrb[205].mxu1  ;;  %v4125_v9 = vpop.f32.mrb[237].mxu0  ;;  %v4918_v59 = vadd.f32 %v4876_v41, %v4790_v35  ;;  %v4791_v30 = vadd.f32 %v9069_v39, %v4663_v42 }
 0x427   : > { %v9521_v28 = vadd.f32 %v5040_v8, %v4119_v31  ;;  %v4824_v1 = vrot.slane %v3935_v38, 1  ;;  %v3937_v19 = vpop.f32.mrb[206].mxu1  ;;  %v4127_v2 = vpop.f32.mrb[238].mxu0  ;;  %v4633_v31 = vsel %vm333_vm3, %v9077_v25, 0.0 }
 0x428   : > { %v4541_v56 = vadd.f32 %v4509_v23, %v9041_v17  ;;  %v5002_v36 = vsel %vm1866_vm0, %v4950_v37, %v4951_v20  ;;  %v4510_v15 = vadd.f32 %v9065_v33, %v3937_v19  ;;  %v4952_v13 = vrot.slane %v4127_v2, 7  ;;  %v3939_v47 = vpop.f32.mrb[207].mxu1  ;;  %v4129_v45 = vpop.f32.mrb[239].mxu0 }
 0x429   : > { %v4875_v12 = vsel %vm2026_vm1, %v4823_v58, %v4824_v1  ;;  %v5011_v39 = vsel %vm330_vm2, %v5002_v36, 0.0  ;;  %v4825_v44 = vrot.slane %v3939_v47, 1  ;;  %v4760_v58 = vsel %vm330_vm2, %v9087_v11, 0.0 }
 0x42a   : > { %v4664_v17 = vadd.f32 %v9059_v26, %v4541_v56  ;;  %v5041_v6 = vadd.f32 %v5011_v39, %v4918_v59  ;;  %v4542_v37 = vadd.f32 %v4510_v15, %v9047_v62  ;;  %v4887_v33 = vsel %vm333_vm3, %v4875_v12, 0.0 }
 0x42b   : > { %v4874_v53 = vsel %vm2026_vm1, %v4824_v1, %v4825_v44  ;;  %v4919_v24 = vadd.f32 %v4887_v33, %v4791_v30  ;;  %v5001_v25 = vsel %vm1866_vm0, %v4951_v20, %v4952_v13  ;;  %v10814_v1 = vld [vmem:[#allocation26_spill] sm:$0xff]  ;;  %v4635_v15 = vsel %vm333_vm3, %v9109_v5, 0.0 }
 0x42c   : > { %v9545_v55 = vadd.f32 %v5041_v6, %v4125_v9  ;;  %v4665_v26 = vadd.f32 %v4633_v31, %v4542_v37  ;;  %v4792_v41 = vadd.f32 %v4760_v58, %v4664_v17  ;;  %v10817_v17 = vld [vmem:[#allocation28_spill] sm:$0xff] }
 0x42d   : > { %v5042_v16 = vadd.f32 %v5001_v25, %v4919_v24  ;;  %v3943_v62 = vpop.f32.mrb[208].mxu1  ;;  %v4133_v42 = vpop.f32.mrb[240].mxu0 }
 0x42e   : > { %v4511_v35 = vadd.f32 %v4479_v48, %v3943_v62  ;;  %v4953_v11 = vrot.slane %v4133_v42, 7  ;;  %v3945_v8 = vpop.f32.mrb[209].mxu1  ;;  %v4135_v54 = vpop.f32.mrb[241].mxu0  ;;  %v4920_v61 = vadd.f32 %v4874_v53, %v4792_v41  ;;  %v4793_v43 = vadd.f32 %v9101_v40, %v4665_v26  ;;  %v10818_v26 = vld [vmem:[#allocation31_spill] sm:$0xff] }
 0x42f   : > { %v9551_v23 = vadd.f32 %v5042_v16, %v4129_v45  ;;  %v4826_v20 = vrot.slane %v3945_v8, 1  ;;  %v3947_v38 = vpop.f32.mrb[210].mxu1  ;;  %v4137_v9 = vpop.f32.mrb[242].mxu0  ;;  %v4481_v41 = vsel %vm330_vm2, %v10818_v26, 0.0 }
 0x430   : > { %v4543_v59 = vadd.f32 %v4511_v35, %v9073_v63  ;;  %v5000_v30 = vsel %vm1866_vm0, %v4952_v13, %v4953_v11  ;;  %v4512_v3 = vadd.f32 %v10814_v1, %v3947_v38  ;;  %v4954_v19 = vrot.slane %v4137_v9, 7  ;;  %v3949_v2 = vpop.f32.mrb[211].mxu1  ;;  %v4139_v56 = vpop.f32.mrb[243].mxu0  ;;  %v10815_v63 = vld [vmem:[#allocation27_spill] sm:$0xff]  ;;  %v10816_v13 = vld [vmem:[#allocation22_spill] sm:$0xff]  ;;  %v10821_v1 = vld [vmem:[#allocation33_spill] sm:$0xff] }
 0x431   : > { %v4873_v36 = vsel %vm2026_vm1, %v4825_v44, %v4826_v20  ;;  %v5013_v40 = vsel %vm330_vm2, %v5000_v30, 0.0  ;;  %v4827_v47 = vrot.slane %v3949_v2, 1  ;;  %v4762_v44 = vsel %vm330_vm2, %v10817_v17, 0.0  ;;  %v10820_v9 = vld [vmem:[#allocation23_spill] sm:$0xff] }
 0x432   : > { %v4666_v45 = vadd.f32 %v10815_v63, %v4543_v59  ;;  %v5043_v12 = vadd.f32 %v5013_v40, %v4920_v61  ;;  %v4544_v39 = vadd.f32 %v4512_v3, %v10816_v13  ;;  %v4889_v31 = vsel %vm333_vm3, %v4873_v36, 0.0  ;;  %v10819_v61 = vld [vmem:[#allocation29_spill] sm:$0xff] }
 0x433   : > { %v4872_v6 = vsel %vm2026_vm1, %v4826_v20, %v4827_v47  ;;  %v4921_v37 = vadd.f32 %v4889_v31, %v4793_v43  ;;  %v4999_v5 = vsel %vm1866_vm0, %v4953_v11, %v4954_v19  ;;  %v4637_v63 = vsel %vm333_vm3, %v9140_v7, 0.0 }
 0x434   : > { %v9575_v33 = vadd.f32 %v5043_v12, %v4135_v54  ;;  %v4667_v58 = vadd.f32 %v4635_v15, %v4544_v39  ;;  %v4794_v53 = vadd.f32 %v4762_v44, %v4666_v45  ;;  %v10822_v12 = vld [vmem:[#allocation34_spill] sm:$0xff] }
 0x435   : > { %v5044_v24 = vadd.f32 %v4999_v5, %v4921_v37  ;;  %v3953_v25 = vpop.f32.mrb[212].mxu1  ;;  %v4143_v16 = vpop.f32.mrb[244].mxu0 }
 0x436   : > { %v4513_v62 = vadd.f32 %v4481_v41, %v3953_v25  ;;  %v4955_v48 = vrot.slane %v4143_v16, 7  ;;  %v3955_v42 = vpop.f32.mrb[213].mxu1  ;;  %v4145_v35 = vpop.f32.mrb[245].mxu0  ;;  %v4922_v8 = vadd.f32 %v4872_v6, %v4794_v53  ;;  %v4795_v43 = vadd.f32 %v10819_v61, %v4667_v58  ;;  %v10824_v25 = vld [vmem:[#allocation39_spill] sm:$0xff] }
 0x437   : > { %v9581_v20 = vadd.f32 %v5044_v24, %v4139_v56  ;;  %v4828_v11 = vrot.slane %v3955_v42, 1  ;;  %v3957_v54 = vpop.f32.mrb[214].mxu1  ;;  %v4147_v38 = vpop.f32.mrb[246].mxu0  ;;  %v4483_v26 = vsel %vm330_vm2, %v10824_v25, 0.0  ;;  %v10825_v61 = vld [vmem:[#allocation43_spill] sm:$0xff] }
 0x438   : > { %v4545_v59 = vadd.f32 %v4513_v62, %v10820_v9  ;;  %v4998_v30 = vsel %vm1866_vm0, %v4954_v19, %v4955_v48  ;;  %v4514_v3 = vadd.f32 %v10821_v1, %v3957_v54  ;;  %v4956_v2 = vrot.slane %v4147_v38, 7  ;;  %v3959_v36 = vpop.f32.mrb[215].mxu1  ;;  %v4149_v40 = vpop.f32.mrb[247].mxu0  ;;  %v10823_v19 = vld [vmem:[#allocation32_spill] sm:$0xff]  ;;  %v10826_v38 = vld [vmem:[#allocation37_spill] sm:$0xff] }
 0x439   : > { %v4871_v15 = vsel %vm2026_vm1, %v4827_v47, %v4828_v11  ;;  %v5015_v56 = vsel %vm330_vm2, %v4998_v30, 0.0  ;;  %v4829_v45 = vrot.slane %v3959_v36, 1  ;;  %v4764_v47 = vsel %vm330_vm2, %v9150_v10, 0.0  ;;  %v10827_v30 = vld [vmem:[#allocation36_spill] sm:$0xff] }
 0x43a   : > { %v4668_v13 = vadd.f32 %v10822_v12, %v4545_v59  ;;  %v5045_v39 = vadd.f32 %v5015_v56, %v4922_v8  ;;  %v4546_v31 = vadd.f32 %v4514_v3, %v10823_v19  ;;  %v4891_v17 = vsel %vm333_vm3, %v4871_v15, 0.0 }
 0x43b   : > { %v4870_v44 = vsel %vm2026_vm1, %v4828_v11, %v4829_v45  ;;  %v4923_v6 = vadd.f32 %v4891_v17, %v4795_v43  ;;  %v4997_v7 = vsel %vm1866_vm0, %v4955_v48, %v4956_v2 }
 0x43c   : > { %v9605_v37 = vadd.f32 %v5045_v39, %v4145_v35  ;;  %v4669_v5 = vadd.f32 %v4637_v63, %v4546_v31  ;;  %v4796_v58 = vadd.f32 %v4764_v47, %v4668_v13  ;;  %v4639_v63 = vsel %vm333_vm3, %v9170_v49, 0.0  ;;  %v10828_v13 = vld [vmem:[#allocation38_spill] sm:$0xff] }
 0x43d   : > { %v5046_v53 = vadd.f32 %v4997_v7, %v4923_v6  ;;  %v3963_v24 = vpop.f32.mrb[216].mxu1  ;;  %v4153_v41 = vpop.f32.mrb[248].mxu0 }
 0x43e   : > { %v4515_v16 = vadd.f32 %v4483_v26, %v3963_v24  ;;  %v4957_v10 = vrot.slane %v4153_v41, 7  ;;  %v3965_v62 = vpop.f32.mrb[217].mxu1  ;;  %v4155_v42 = vpop.f32.mrb[249].mxu0  ;;  %v4924_v8 = vadd.f32 %v4870_v44, %v4796_v58  ;;  %v4797_v43 = vadd.f32 %v10825_v61, %v4669_v5  ;;  %v10830_v24 = vld [vmem:[#allocation45_spill] sm:$0xff] }
 0x43f   : > { %v9611_v11 = vadd.f32 %v5046_v53, %v4149_v40  ;;  %v4830_v48 = vrot.slane %v3965_v62, 1  ;;  %v3967_v35 = vpop.f32.mrb[218].mxu1  ;;  %v4157_v54 = vpop.f32.mrb[250].mxu0  ;;  %v4485_v25 = vsel %vm330_vm2, %v10830_v24, 0.0  ;;  %v10831_v61 = vld [vmem:[#allocation49_spill] sm:$0xff] }
 0x440   : > { %v4547_v9 = vadd.f32 %v4515_v16, %v10826_v38  ;;  %v4996_v59 = vsel %vm1866_vm0, %v4956_v2, %v4957_v10  ;;  %v4516_v1 = vadd.f32 %v10827_v30, %v3967_v35  ;;  %v4958_v3 = vrot.slane %v4157_v54, 7  ;;  %v3969_v36 = vpop.f32.mrb[219].mxu1  ;;  %v4159_v15 = vpop.f32.mrb[251].mxu0  ;;  %v10829_v2 = vld [vmem:[#allocation35_spill] sm:$0xff]  ;;  %v10832_v54 = vld [vmem:[#allocation42_spill] sm:$0xff] }
 0x441   : > { %v4869_v56 = vsel %vm2026_vm1, %v4829_v45, %v4830_v48  ;;  %v5017_v40 = vsel %vm330_vm2, %v4996_v59, 0.0  ;;  %v4831_v12 = vrot.slane %v3969_v36, 1  ;;  %v4766_v45 = vsel %vm330_vm2, %v9180_v18, 0.0  ;;  %v10833_v59 = vld [vmem:[#allocation41_spill] sm:$0xff] }
 0x442   : > { %v4670_v39 = vadd.f32 %v10828_v13, %v4547_v9  ;;  %v5047_v19 = vadd.f32 %v5017_v40, %v4924_v8  ;;  %v4548_v31 = vadd.f32 %v4516_v1, %v10829_v2  ;;  %v4893_v17 = vsel %vm333_vm3, %v4869_v56, 0.0 }
 0x443   : > { %v4868_v47 = vsel %vm2026_vm1, %v4830_v48, %v4831_v12  ;;  %v4925_v44 = vadd.f32 %v4893_v17, %v4797_v43  ;;  %v4995_v49 = vsel %vm1866_vm0, %v4957_v10, %v4958_v3 }
 0x444   : > { %v9635_v6 = vadd.f32 %v5047_v19, %v4155_v42  ;;  %v4671_v7 = vadd.f32 %v4639_v63, %v4548_v31  ;;  %v4798_v5 = vadd.f32 %v4766_v45, %v4670_v39  ;;  %v4641_v63 = vsel %vm333_vm3, %v9200_v50, 0.0  ;;  %v10834_v39 = vld [vmem:[#allocation44_spill] sm:$0xff] }
 0x445   : > { %v5048_v58 = vadd.f32 %v4995_v49, %v4925_v44  ;;  %v3973_v53 = vpop.f32.mrb[220].mxu1  ;;  %v4163_v26 = vpop.f32.mrb[252].mxu0 }
 0x446   : > { %v4517_v41 = vadd.f32 %v4485_v25, %v3973_v53  ;;  %v4959_v18 = vrot.slane %v4163_v26, 7  ;;  %v3975_v16 = vpop.f32.mrb[221].mxu1  ;;  %v4165_v62 = vpop.f32.mrb[253].mxu0  ;;  %v4926_v8 = vadd.f32 %v4868_v47, %v4798_v5  ;;  %v4799_v43 = vadd.f32 %v10831_v61, %v4671_v7  ;;  %v10836_v53 = vld [vmem:[#allocation51_spill] sm:$0xff] }
 0x447   : > { %v9641_v48 = vadd.f32 %v5048_v58, %v4159_v15  ;;  %v4832_v10 = vrot.slane %v3975_v16, 1  ;;  %v3977_v42 = vpop.f32.mrb[222].mxu1  ;;  %v4167_v35 = vpop.f32.mrb[254].mxu0  ;;  %v4487_v24 = vsel %vm330_vm2, %v10836_v53, 0.0  ;;  %v10837_v61 = vld [vmem:[#allocation55_spill] sm:$0xff] }
 0x448   : > { %v4549_v38 = vadd.f32 %v4517_v41, %v10832_v54  ;;  %v4994_v9 = vsel %vm1866_vm0, %v4958_v3, %v4959_v18  ;;  %v4518_v30 = vadd.f32 %v10833_v59, %v3977_v42  ;;  %v4960_v1 = vrot.slane %v4167_v35, 7  ;;  %v3979_v36 = vpop.f32.mrb[223].mxu1  ;;  %v4169_v56 = vpop.f32.mrb[255].mxu0  ;;  %v10835_v3 = vld [vmem:[#allocation40_spill] sm:$0xff] }
 0x449   : > { %v4867_v40 = vsel %vm2026_vm1, %v4831_v12, %v4832_v10  ;;  %v5019_v15 = vsel %vm330_vm2, %v4994_v9, 0.0  ;;  %v4833_v13 = vrot.slane %v3979_v36, 1  ;;  %v4768_v12 = vsel %vm330_vm2, %v9210_v51, 0.0  ;;  %v10838_v35 = vld [vmem:[#allocation48_spill] sm:$0xff]  ;;  %v10839_v9 = vld [vmem:[#allocation47_spill] sm:$0xff] }
 0x44a   : > { %v4672_v19 = vadd.f32 %v10834_v39, %v4549_v38  ;;  %v5049_v2 = vadd.f32 %v5019_v15, %v4926_v8  ;;  %v4550_v31 = vadd.f32 %v4518_v30, %v10835_v3  ;;  %v4895_v17 = vsel %vm333_vm3, %v4867_v40, 0.0 }
 0x44b   : > { %v4866_v45 = vsel %vm2026_vm1, %v4832_v10, %v4833_v13  ;;  %v4927_v47 = vadd.f32 %v4895_v17, %v4799_v43  ;;  %v4993_v50 = vsel %vm1866_vm0, %v4959_v18, %v4960_v1 }
 0x44c   : > { %v9665_v44 = vadd.f32 %v5049_v2, %v4165_v62  ;;  %v4673_v49 = vadd.f32 %v4641_v63, %v4550_v31  ;;  %v4800_v7 = vadd.f32 %v4768_v12, %v4672_v19  ;;  %v4643_v63 = vsel %vm333_vm3, %v9230_v4, 0.0  ;;  %v10840_v19 = vld [vmem:[#allocation50_spill] sm:$0xff] }
 0x44d   : > { %v5050_v5 = vadd.f32 %v4993_v50, %v4927_v47  ;;  %v3983_v58 = vpop.f32.mrb[224].mxu1  ;;  %v4173_v25 = vpop.f32.mrb[0].mxu0 }
 0x44e   : > { %v4519_v26 = vadd.f32 %v4487_v24, %v3983_v58  ;;  %v4961_v51 = vrot.slane %v4173_v25, 7  ;;  %v3985_v41 = vpop.f32.mrb[225].mxu1  ;;  %v4175_v16 = vpop.f32.mrb[1].mxu0  ;;  %v4928_v8 = vadd.f32 %v4866_v45, %v4800_v7  ;;  %v4801_v43 = vadd.f32 %v10837_v61, %v4673_v49  ;;  %v10842_v58 = vld [vmem:[#allocation57_spill] sm:$0xff] }
 0x44f   : > { %v9671_v10 = vadd.f32 %v5050_v5, %v4169_v56  ;;  %v4834_v18 = vrot.slane %v3985_v41, 1  ;;  %v3987_v62 = vpop.f32.mrb[226].mxu1  ;;  %v4177_v42 = vpop.f32.mrb[2].mxu0  ;;  %v4489_v53 = vsel %vm330_vm2, %v10842_v58, 0.0  ;;  %v10843_v61 = vld [vmem:[#allocation61_spill] sm:$0xff] }
 0x450   : > { %v4551_v54 = vadd.f32 %v4519_v26, %v10838_v35  ;;  %v4992_v38 = vsel %vm1866_vm0, %v4960_v1, %v4961_v51  ;;  %v4520_v59 = vadd.f32 %v10839_v9, %v3987_v62  ;;  %v4962_v30 = vrot.slane %v4177_v42, 7  ;;  %v3989_v36 = vpop.f32.mrb[227].mxu1  ;;  %v4179_v40 = vpop.f32.mrb[3].mxu0  ;;  %v10841_v1 = vld [vmem:[#allocation46_spill] sm:$0xff] }
 0x451   : > { %v4865_v15 = vsel %vm2026_vm1, %v4833_v13, %v4834_v18  ;;  %v5021_v56 = vsel %vm330_vm2, %v4992_v38, 0.0  ;;  %v4835_v39 = vrot.slane %v3989_v36, 1  ;;  %v4770_v13 = vsel %vm330_vm2, %v9240_v29, 0.0  ;;  %v10844_v42 = vld [vmem:[#allocation54_spill] sm:$0xff]  ;;  %v10845_v38 = vld [vmem:[#allocation53_spill] sm:$0xff] }
 0x452   : > { %v4674_v2 = vadd.f32 %v10840_v19, %v4551_v54  ;;  %v5051_v3 = vadd.f32 %v5021_v56, %v4928_v8  ;;  %v4552_v31 = vadd.f32 %v4520_v59, %v10841_v1  ;;  %v4897_v17 = vsel %vm333_vm3, %v4865_v15, 0.0 }
 0x453   : > { %v4864_v12 = vsel %vm2026_vm1, %v4834_v18, %v4835_v39  ;;  %v4929_v45 = vadd.f32 %v4897_v17, %v4801_v43  ;;  %v4991_v4 = vsel %vm1866_vm0, %v4961_v51, %v4962_v30 }
 0x454   : > { %v9695_v47 = vadd.f32 %v5051_v3, %v4175_v16  ;;  %v4675_v50 = vadd.f32 %v4643_v63, %v4552_v31  ;;  %v4802_v49 = vadd.f32 %v4770_v13, %v4674_v2  ;;  %v4645_v63 = vsel %vm333_vm3, %v9260_v34, 0.0  ;;  %v10846_v2 = vld [vmem:[#allocation56_spill] sm:$0xff] }
 0x455   : > { %v5052_v7 = vadd.f32 %v4991_v4, %v4929_v45  ;;  %v3993_v5 = vpop.f32.mrb[228].mxu1  ;;  %v4183_v24 = vpop.f32.mrb[4].mxu0 }
 0x456   : > { %v4521_v25 = vadd.f32 %v4489_v53, %v3993_v5  ;;  %v4963_v29 = vrot.slane %v4183_v24, 7  ;;  %v3995_v26 = vpop.f32.mrb[229].mxu1  ;;  %v4185_v41 = vpop.f32.mrb[5].mxu0  ;;  %v4930_v8 = vadd.f32 %v4864_v12, %v4802_v49  ;;  %v4803_v43 = vadd.f32 %v10843_v61, %v4675_v50  ;;  %v10848_v5 = vld [vmem:[#allocation63_spill] sm:$0xff] }
 0x457   : > { %v9701_v18 = vadd.f32 %v5052_v7, %v4179_v40  ;;  %v4836_v51 = vrot.slane %v3995_v26, 1  ;;  %v3997_v16 = vpop.f32.mrb[230].mxu1  ;;  %v4187_v62 = vpop.f32.mrb[6].mxu0  ;;  %v4491_v58 = vsel %vm330_vm2, %v10848_v5, 0.0  ;;  %v10849_v61 = vld [vmem:[#allocation67_spill] sm:$0xff] }
 0x458   : > { %v4553_v35 = vadd.f32 %v4521_v25, %v10844_v42  ;;  %v4990_v54 = vsel %vm1866_vm0, %v4962_v30, %v4963_v29  ;;  %v4522_v9 = vadd.f32 %v10845_v38, %v3997_v16  ;;  %v4964_v59 = vrot.slane %v4187_v62, 7  ;;  %v3999_v36 = vpop.f32.mrb[231].mxu1  ;;  %v4189_v15 = vpop.f32.mrb[7].mxu0  ;;  %v10847_v30 = vld [vmem:[#allocation52_spill] sm:$0xff] }
 0x459   : > { %v4863_v56 = vsel %vm2026_vm1, %v4835_v39, %v4836_v51  ;;  %v5023_v40 = vsel %vm330_vm2, %v4990_v54, 0.0  ;;  %v4837_v19 = vrot.slane %v3999_v36, 1  ;;  %v4772_v39 = vsel %vm330_vm2, %v9270_v21, 0.0  ;;  %v10850_v62 = vld [vmem:[#allocation60_spill] sm:$0xff]  ;;  %v10851_v54 = vld [vmem:[#allocation59_spill] sm:$0xff] }
 0x45a   : > { %v4676_v3 = vadd.f32 %v10846_v2, %v4553_v35  ;;  %v5053_v1 = vadd.f32 %v5023_v40, %v4930_v8  ;;  %v4554_v31 = vadd.f32 %v4522_v9, %v10847_v30  ;;  %v4899_v17 = vsel %vm333_vm3, %v4863_v56, 0.0 }
 0x45b   : > { %v4862_v13 = vsel %vm2026_vm1, %v4836_v51, %v4837_v19  ;;  %v4931_v12 = vadd.f32 %v4899_v17, %v4803_v43  ;;  %v4989_v34 = vsel %vm1866_vm0, %v4963_v29, %v4964_v59 }
 0x45c   : > { %v9725_v45 = vadd.f32 %v5053_v1, %v4185_v41  ;;  %v4677_v4 = vadd.f32 %v4645_v63, %v4554_v31  ;;  %v4804_v50 = vadd.f32 %v4772_v39, %v4676_v3  ;;  %v4647_v63 = vsel %vm333_vm3, %v9290_v60, 0.0  ;;  %v10852_v3 = vld [vmem:[#allocation62_spill] sm:$0xff] }
 0x45d   : > { %v5054_v49 = vadd.f32 %v4989_v34, %v4931_v12  ;;  %v4003_v7 = vpop.f32.mrb[232].mxu1  ;;  %v4193_v53 = vpop.f32.mrb[8].mxu0 }
 0x45e   : > { %v4523_v24 = vadd.f32 %v4491_v58, %v4003_v7  ;;  %v4965_v21 = vrot.slane %v4193_v53, 7  ;;  %v4005_v25 = vpop.f32.mrb[233].mxu1  ;;  %v4195_v26 = vpop.f32.mrb[9].mxu0  ;;  %v4932_v8 = vadd.f32 %v4862_v13, %v4804_v50  ;;  %v4805_v43 = vadd.f32 %v10849_v61, %v4677_v4  ;;  %v10854_v7 = vld [vmem:[#allocation64_spill] sm:$0xff] }
 0x45f   : > { %v9731_v51 = vadd.f32 %v5054_v49, %v4189_v15  ;;  %v4838_v29 = vrot.slane %v4005_v25, 1  ;;  %v4007_v41 = vpop.f32.mrb[234].mxu1  ;;  %v4197_v16 = vpop.f32.mrb[10].mxu0  ;;  %v4493_v5 = vsel %vm330_vm2, %v10854_v7, 0.0  ;;  %v10855_v61 = vld [vmem:[#allocation68_spill] sm:$0xff] }
 0x460   : > { %v4555_v42 = vadd.f32 %v4523_v24, %v10850_v62  ;;  %v4988_v35 = vsel %vm1866_vm0, %v4964_v59, %v4965_v21  ;;  %v4524_v38 = vadd.f32 %v10851_v54, %v4007_v41  ;;  %v4966_v9 = vrot.slane %v4197_v16, 7  ;;  %v4009_v36 = vpop.f32.mrb[235].mxu1  ;;  %v4199_v56 = vpop.f32.mrb[11].mxu0  ;;  %v10853_v59 = vld [vmem:[#allocation58_spill] sm:$0xff] }
 0x461   : > { %v4861_v40 = vsel %vm2026_vm1, %v4837_v19, %v4838_v29  ;;  %v5025_v15 = vsel %vm330_vm2, %v4988_v35, 0.0  ;;  %v4839_v2 = vrot.slane %v4009_v36, 1  ;;  %v4774_v19 = vsel %vm330_vm2, %v9300_v57, 0.0  ;;  %v10856_v16 = vld [vmem:[#allocation66_spill] sm:$0xff]  ;;  %v10857_v35 = vld [vmem:[#allocation73_spill] sm:$0xff] }
 0x462   : > { %v4678_v1 = vadd.f32 %v10852_v3, %v4555_v42  ;;  %v5055_v30 = vadd.f32 %v5025_v15, %v4932_v8  ;;  %v4556_v31 = vadd.f32 %v4524_v38, %v10853_v59  ;;  %v4901_v17 = vsel %vm333_vm3, %v4861_v40, 0.0 }
 0x463   : > { %v4860_v39 = vsel %vm2026_vm1, %v4838_v29, %v4839_v2  ;;  %v4933_v13 = vadd.f32 %v4901_v17, %v4805_v43  ;;  %v4987_v60 = vsel %vm1866_vm0, %v4965_v21, %v4966_v9 }
 0x464   : > { %v9755_v12 = vadd.f32 %v5055_v30, %v4195_v26  ;;  %v4679_v34 = vadd.f32 %v4647_v63, %v4556_v31  ;;  %v4806_v4 = vadd.f32 %v4774_v19, %v4678_v1  ;;  %v4649_v63 = vsel %vm333_vm3, %v9320_v32, 0.0  ;;  %v10858_v1 = vld [vmem:[#allocation69_spill] sm:$0xff] }
 0x465   : > { %v5056_v50 = vadd.f32 %v4987_v60, %v4933_v13  ;;  %v4013_v49 = vpop.f32.mrb[236].mxu1  ;;  %v4203_v58 = vpop.f32.mrb[12].mxu0 }
 0x466   : > { %v4525_v53 = vadd.f32 %v4493_v5, %v4013_v49  ;;  %v4967_v57 = vrot.slane %v4203_v58, 7  ;;  %v4015_v24 = vpop.f32.mrb[237].mxu1  ;;  %v4205_v25 = vpop.f32.mrb[13].mxu0  ;;  %v4934_v8 = vadd.f32 %v4860_v39, %v4806_v4  ;;  %v4807_v43 = vadd.f32 %v10855_v61, %v4679_v34  ;;  %v10860_v49 = vld [vmem:[#allocation74_spill] sm:$0xff]  ;;  %v10861_v61 = vld [vmem:[#allocation77_spill] sm:$0xff] }
 0x467   : > { %v9761_v29 = vadd.f32 %v5056_v50, %v4199_v56  ;;  %v4840_v21 = vrot.slane %v4015_v24, 1  ;;  %v4017_v26 = vpop.f32.mrb[238].mxu1  ;;  %v4207_v41 = vpop.f32.mrb[14].mxu0  ;;  %v4495_v7 = vsel %vm330_vm2, %v10860_v49, 0.0 }
 0x468   : > { %v4557_v62 = vadd.f32 %v4525_v53, %v10856_v16  ;;  %v4986_v42 = vsel %vm1866_vm0, %v4966_v9, %v4967_v57  ;;  %v4526_v54 = vadd.f32 %v10857_v35, %v4017_v26  ;;  %v4968_v38 = vrot.slane %v4207_v41, 7  ;;  %v4019_v36 = vpop.f32.mrb[239].mxu1  ;;  %v4209_v40 = vpop.f32.mrb[15].mxu0  ;;  %v10859_v9 = vld [vmem:[#allocation70_spill] sm:$0xff]  ;;  %v10862_v41 = vld [vmem:[#allocation65_spill] sm:$0xff] }
 0x469   : > { %v4859_v15 = vsel %vm2026_vm1, %v4839_v2, %v4840_v21  ;;  %v5027_v56 = vsel %vm330_vm2, %v4986_v42, 0.0  ;;  %v4841_v3 = vrot.slane %v4019_v36, 1  ;;  %v4776_v2 = vsel %vm330_vm2, %v9330_v46, 0.0  ;;  %v10863_v42 = vld [vmem:[#allocation71_spill] sm:$0xff] }
 0x46a   : > { %v4680_v30 = vadd.f32 %v10858_v1, %v4557_v62  ;;  %v5057_v59 = vadd.f32 %v5027_v56, %v4934_v8  ;;  %v4558_v31 = vadd.f32 %v4526_v54, %v10859_v9  ;;  %v4903_v17 = vsel %vm333_vm3, %v4859_v15, 0.0 }
 0x46b   : > { %v4858_v19 = vsel %vm2026_vm1, %v4840_v21, %v4841_v3  ;;  %v4935_v39 = vadd.f32 %v4903_v17, %v4807_v43  ;;  %v4985_v32 = vsel %vm1866_vm0, %v4967_v57, %v4968_v38 }
 0x46c   : > { %v9785_v13 = vadd.f32 %v5057_v59, %v4205_v25  ;;  %v4681_v60 = vadd.f32 %v4649_v63, %v4558_v31  ;;  %v4808_v34 = vadd.f32 %v4776_v2, %v4680_v30  ;;  %v10864_v63 = vld [vmem:[#allocation76_spill] sm:$0xff]  ;;  %v10865_v59 = vld [vmem:[#allocation78_spill] sm:$0xff] }
 0x46d   : > { %v5058_v4 = vadd.f32 %v4985_v32, %v4935_v39  ;;  %v4023_v50 = vpop.f32.mrb[240].mxu1  ;;  %v4213_v5 = vpop.f32.mrb[16].mxu0  ;;  %v4651_v1 = vsel %vm333_vm3, %v10864_v63, 0.0 }
 0x46e   : > { %v4527_v58 = vadd.f32 %v4495_v7, %v4023_v50  ;;  %v4969_v46 = vrot.slane %v4213_v5, 7  ;;  %v4025_v53 = vpop.f32.mrb[241].mxu1  ;;  %v4215_v24 = vpop.f32.mrb[17].mxu0  ;;  %v4936_v8 = vadd.f32 %v4858_v19, %v4808_v34  ;;  %v4809_v43 = vadd.f32 %v10861_v61, %v4681_v60  ;;  %v10867_v19 = vld [vmem:[#allocation82_spill] sm:$0xff]  ;;  %v10868_v5 = vld [vmem:[#allocation83_spill] sm:$0xff] }
 0x46f   : > { %v9791_v21 = vadd.f32 %v5058_v4, %v4209_v40  ;;  %v4842_v57 = vrot.slane %v4025_v53, 1  ;;  %v4027_v25 = vpop.f32.mrb[242].mxu1  ;;  %v4217_v26 = vpop.f32.mrb[18].mxu0 }
 0x470   : > { %v4559_v16 = vadd.f32 %v4527_v58, %v10862_v41  ;;  %v4984_v62 = vsel %vm1866_vm0, %v4968_v38, %v4969_v46  ;;  %v4528_v35 = vadd.f32 %v10863_v42, %v4027_v25  ;;  %v4970_v54 = vrot.slane %v4217_v26, 7  ;;  %v4029_v36 = vpop.f32.mrb[243].mxu1  ;;  %v4219_v15 = vpop.f32.mrb[19].mxu0  ;;  %v10866_v38 = vld [vmem:[#allocation75_spill] sm:$0xff]  ;;  %v10870_v42 = vld [vmem:[#allocation81_spill] sm:$0xff] }
 0x471   : > { %v4857_v56 = vsel %vm2026_vm1, %v4841_v3, %v4842_v57  ;;  %v5029_v40 = vsel %vm330_vm2, %v4984_v62, 0.0  ;;  %v4843_v30 = vrot.slane %v4029_v36, 1  ;;  %v4778_v3 = vsel %vm330_vm2, %v10867_v19, 0.0 }
 0x472   : > { %v4682_v9 = vadd.f32 %v10865_v59, %v4559_v16  ;;  %v5059_v31 = vadd.f32 %v5029_v40, %v4936_v8  ;;  %v4560_v17 = vadd.f32 %v4528_v35, %v10866_v38  ;;  %v4905_v2 = vsel %vm333_vm3, %v4857_v56, 0.0  ;;  %v10871_v56 = vld [vmem:[#allocation79_spill] sm:$0xff] }
 0x473   : > { %v4856_v39 = vsel %vm2026_vm1, %v4842_v57, %v4843_v30  ;;  %v4937_v32 = vadd.f32 %v4905_v2, %v4809_v43  ;;  %v4983_v60 = vsel %vm1866_vm0, %v4969_v46, %v4970_v54  ;;  %v4497_v58 = vsel %vm330_vm2, %v10868_v5, 0.0  ;;  %v10869_v43 = vld [vmem:[#allocation85_spill] sm:$0xff]  ;;  %v10873_v2 = vld [vmem:[#allocation86_spill] sm:$0xff] }
 0x474   : > { %v9815_v34 = vadd.f32 %v5059_v31, %v4215_v24  ;;  %v4683_v4 = vadd.f32 %v4651_v1, %v4560_v17  ;;  %v4810_v50 = vadd.f32 %v4778_v3, %v4682_v9  ;;  %v10872_v31 = vld [vmem:[#allocation84_spill] sm:$0xff] }
 0x475   : > { %v5060_v49 = vadd.f32 %v4983_v60, %v4937_v32  ;;  %v4033_v7 = vpop.f32.mrb[244].mxu1  ;;  %v4223_v53 = vpop.f32.mrb[20].mxu0  ;;  %v4653_v38 = vsel %vm333_vm3, %v10872_v31, 0.0  ;;  %v10875_v60 = vld [vmem:[#allocation90_spill] sm:$0xff] }
 0x476   : > { %v4529_v8 = vadd.f32 %v4497_v58, %v4033_v7  ;;  %v4971_v61 = vrot.slane %v4223_v53, 7  ;;  %v4035_v25 = vpop.f32.mrb[245].mxu1  ;;  %v4225_v26 = vpop.f32.mrb[21].mxu0  ;;  %v4938_v57 = vadd.f32 %v4856_v39, %v4810_v50  ;;  %v4811_v41 = vadd.f32 %v10869_v43, %v4683_v4  ;;  %v10879_v31 = vld [vmem:[#allocation18_spill] sm:$0xff] }
 0x477   : > { %v9821_v16 = vadd.f32 %v5060_v49, %v4219_v15  ;;  %v4844_v46 = vrot.slane %v4035_v25, 1  ;;  %v4037_v24 = vpop.f32.mrb[246].mxu1  ;;  %v4227_v62 = vpop.f32.mrb[22].mxu0  ;;  %v10876_v25 = vld [vmem:[#allocation88_spill] sm:$0xff] }
 0x478   : > { %v4561_v35 = vadd.f32 %v4529_v8, %v10870_v42  ;;  %v4982_v36 = vsel %vm1866_vm0, %v4970_v54, %v4971_v61  ;;  %v4530_v40 = vadd.f32 %v10871_v56, %v4037_v24  ;;  %v4972_v63 = vrot.slane %v4227_v62, 7  ;;  %v4039_v1 = vpop.f32.mrb[247].mxu1  ;;  %v4229_v59 = vpop.f32.mrb[23].mxu0  ;;  %v10874_v54 = vld [vmem:[#allocation72_spill] sm:$0xff] }
 0x479   : > { %v4855_v9 = vsel %vm2026_vm1, %v4843_v30, %v4844_v46  ;;  %v5031_v15 = vsel %vm330_vm2, %v4982_v36, 0.0  ;;  %v4845_v17 = vrot.slane %v4039_v1, 1  ;;  %v4780_v30 = vsel %vm330_vm2, %v10875_v60, 0.0  ;;  %v10878_v1 = vld [vmem:[#allocation87_spill] sm:$0xff] }
 0x47a   : > { %v4684_v19 = vadd.f32 %v10873_v2, %v4561_v35  ;;  %v5061_v3 = vadd.f32 %v5031_v15, %v4938_v57  ;;  %v4562_v39 = vadd.f32 %v4530_v40, %v10874_v54  ;;  %v4907_v32 = vsel %vm333_vm3, %v4855_v9, 0.0 }
 0x47b   : > { %v4854_v4 = vsel %vm2026_vm1, %v4844_v46, %v4845_v17  ;;  %v4939_v50 = vadd.f32 %v4907_v32, %v4811_v41  ;;  %v4981_v49 = vsel %vm1866_vm0, %v4971_v61, %v4972_v63  ;;  %v4499_v57 = vsel %vm330_vm2, %v10876_v25, 0.0  ;;  %v10877_v41 = vld [vmem:[#allocation17_spill] sm:$0xff] }
 0x47c   : > { %v9845_v7 = vadd.f32 %v5061_v3, %v4225_v26  ;;  %v4685_v5 = vadd.f32 %v4653_v38, %v4562_v39  ;;  %v4812_v58 = vadd.f32 %v4780_v30, %v4684_v19  ;;  %v10880_v39 = vld [vmem:[#allocation15_spill] sm:$0xff]  ;;  %v10881_v30 = vld [vmem:[#allocation89_spill] sm:$0xff] }
 0x47d   : > { %v5062_v53 = vadd.f32 %v4981_v49, %v4939_v50  ;;  %v4043_v8 = vpop.f32.mrb[248].mxu1  ;;  %v4233_v43 = vpop.f32.mrb[24].mxu0  ;;  %v4655_v32 = vsel %vm333_vm3, %v10880_v39, 0.0 }
 0x47e   : > { %v4531_v24 = vadd.f32 %v4499_v57, %v4043_v8  ;;  %v4973_v62 = vrot.slane %v4233_v43, 7  ;;  %v4045_v42 = vpop.f32.mrb[249].mxu1  ;;  %v4235_v35 = vpop.f32.mrb[25].mxu0  ;;  %v4940_v46 = vadd.f32 %v4854_v4, %v4812_v58  ;;  %v4813_v36 = vadd.f32 %v10877_v41, %v4685_v5  ;;  %v10883_v58 = vld [vmem:[#allocation20_spill] sm:$0xff]  ;;  %v10884_v41 = vld [vmem:[#allocation21_spill] sm:$0xff] }
 0x47f   : > { %v9851_v56 = vadd.f32 %v5062_v53, %v4229_v59  ;;  %v4846_v61 = vrot.slane %v4045_v42, 1  ;;  %v4047_v26 = vpop.f32.mrb[250].mxu1  ;;  %v4237_v40 = vpop.f32.mrb[26].mxu0 }
 0x480   : > { %v4563_v9 = vadd.f32 %v4531_v24, %v10878_v1  ;;  %v4980_v15 = vsel %vm1866_vm0, %v4972_v63, %v4973_v62  ;;  %v4532_v38 = vadd.f32 %v10879_v31, %v4047_v26  ;;  %v4974_v2 = vrot.slane %v4237_v40, 7  ;;  %v4049_v19 = vpop.f32.mrb[251].mxu1  ;;  %v4239_v3 = vpop.f32.mrb[27].mxu0  ;;  %v10882_v63 = vld [vmem:[#allocation80_spill] sm:$0xff] }
 0x481   : > { %v4853_v54 = vsel %vm2026_vm1, %v4845_v17, %v4846_v61  ;;  %v5033_v59 = vsel %vm330_vm2, %v4980_v15, 0.0  ;;  %v4847_v60 = vrot.slane %v4049_v19, 1  ;;  %v4782_v17 = vsel %vm330_vm2, %v10883_v58, 0.0 }
 0x482   : > { %v4686_v4 = vadd.f32 %v10881_v30, %v4563_v9  ;;  %v5063_v50 = vadd.f32 %v5033_v59, %v4940_v46  ;;  %v4564_v49 = vadd.f32 %v4532_v38, %v10882_v63  ;;  %v4909_v5 = vsel %vm333_vm3, %v4853_v54, 0.0  ;;  %v10886_v54 = vld [vmem:[#allocation24_spill] sm:$0xff] }
 0x483   : > { %v4852_v53 = vsel %vm2026_vm1, %v4846_v61, %v4847_v60  ;;  %v4941_v8 = vadd.f32 %v4909_v5, %v4813_v36  ;;  %v4979_v25 = vsel %vm1866_vm0, %v4973_v62, %v4974_v2  ;;  %v4501_v26 = vsel %vm330_vm2, %v10884_v41, 0.0  ;;  %v10885_v36 = vld [vmem:[#allocation25_spill] sm:$0xff] }
 0x484   : > { %v9875_v57 = vadd.f32 %v5063_v50, %v4235_v35  ;;  %v4687_v43 = vadd.f32 %v4655_v32, %v4564_v49  ;;  %v4814_v24 = vadd.f32 %v4782_v17, %v4686_v4  ;;  %v4657_v59 = vsel %vm333_vm3, %v10886_v54, 0.0  ;;  %v10887_v32 = vld [vmem:[#allocation12_spill] sm:$0xff]  ;;  %v10888_v50 = vld [vmem:[#allocation14_spill] sm:$0xff] }
 0x485   : > { %v5064_v42 = vadd.f32 %v4979_v25, %v4941_v8  ;;  %v4053_v46 = vpop.f32.mrb[252].mxu1  ;;  %v4243_v40 = vpop.f32.mrb[28].mxu0  ;;  %v10889_v17 = vld [vmem:[#allocation16_spill] sm:$0xff] }
 0x486   : > { %v4533_v1 = vadd.f32 %v4501_v26, %v4053_v46  ;;  %v4975_v9 = vrot.slane %v4243_v40, 7  ;;  %v4055_v15 = vpop.f32.mrb[253].mxu1  ;;  %v4245_v31 = vpop.f32.mrb[29].mxu0  ;;  %v4942_v61 = vadd.f32 %v4852_v53, %v4814_v24  ;;  %v4815_v38 = vadd.f32 %v10885_v36, %v4687_v43  ;;  %v10890_v43 = vld [vmem:[#allocation30_spill] sm:$0xff]  ;;  %v10892_v40 = vld [vmem:[#allocation91_spill] sm:$0xff] }
 0x487   : > { %v9881_v19 = vadd.f32 %v5064_v42, %v4239_v3  ;;  %v4848_v62 = vrot.slane %v4055_v15, 1  ;;  %v4057_v35 = vpop.f32.mrb[254].mxu1  ;;  %v4247_v39 = vpop.f32.mrb[30].mxu0  ;;  %v4784_v3 = vsel %vm330_vm2, %v10889_v17, 0.0 }
 0x488   : > { %v4565_v30 = vadd.f32 %v4533_v1, %v10887_v32  ;;  %v4978_v4 = vsel %vm1866_vm0, %v4974_v2, %v4975_v9  ;;  %v4534_v63 = vadd.f32 %v10888_v50, %v4057_v35  ;;  %v4976_v49 = vrot.slane %v4247_v39, 7  ;;  %v4059_v5 = vpop.f32.mrb[255].mxu1  ;;  %v4249_v58 = vpop.f32.mrb[31].mxu0  ;;  %v10891_v2 = vld [vmem:[#allocation19_spill] sm:$0xff]  ;;  %v9914_v39 = vld [vmem:[%s10504_s5] ss:$0 sm:$0xff] }
 0x489   : > { %v4851_v53 = vsel %vm2026_vm1, %v4847_v60, %v4848_v62  ;;  %v5035_v8 = vsel %vm330_vm2, %v4978_v4, 0.0  ;;  %v4849_v25 = vrot.slane %v4059_v5, 1  ;;  %v10893_v1 = vrot.slane %v10892_v40, 1 }
 0x48a   : > { %v4688_v24 = vadd.f32 %v10890_v43, %v4565_v30  ;;  %v5065_v42 = vadd.f32 %v5035_v8, %v4942_v61  ;;  %v4566_v46 = vadd.f32 %v4534_v63, %v10891_v2  ;;  %v4911_v41 = vsel %vm333_vm3, %v4851_v53, 0.0  ;;  %v10894_v30 = vld [vmem:[#allocation13_spill] sm:$0xff] }
 0x48b   : > { %v4850_v26 = vsel %vm2026_vm1, %v4848_v62, %v4849_v25  ;;  %v4881_v60 = vsel %vm2026_vm1, %v4849_v25, %v10893_v1  ;;  %v4943_v15 = vadd.f32 %v4911_v41, %v4815_v38  ;;  %v4977_v36 = vsel %vm1866_vm0, %v4975_v9, %v4976_v49  ;;  %v9924_v9 = vld [vmem:[%s10505_s6] ss:$0 sm:$0xff] }
 0x48c   : > { %v4816_v35 = vadd.f32 %v4784_v3, %v4688_v24  ;;  %v9909_v54 = vadd.f32 %v5065_v42, %v4245_v31  ;;  %v4689_v61 = vadd.f32 %v4657_v59, %v4566_v46  ;;  %v4913_v38 = vsel %vm333_vm3, %v4881_v60, 0.0 }
 0x48d   : > { %v5066_v32 = vadd.f32 %v4977_v36, %v4943_v15  ;;  %v6313_v62 = vpop.f32.mrb[0].mxu1 }
 0x48e   : > { %v4817_v4 = vadd.f32 %v10894_v30, %v4689_v61  ;;  %v4944_v50 = vadd.f32 %v4850_v26, %v4816_v35  ;;  %v9917_v63 = vpop.f32.mrb[1].mxu1  ;;  %v5102_v17 = vrot.slane %v6313_v62, 1 }
 0x48f   : > { %v9926_v31 = vadd.f32 %v5066_v32, %v4249_v58  ;;  %v6314_v59 = vpop.f32.mrb[2].mxu1 }
 0x490   : > { %v4945_v49 = vadd.f32 %v4913_v38, %v4817_v4  ;;  %v5261_v5 = vmul.f32 %v9914_v39, %v4944_v50  ;;  %v5103_v3 = vrot.slane %v6314_v59, 1  ;;  %v4289_v53 = vpop.f32.mrb[3].mxu1 }
 0x492   : > { %v5262_v8 = vmul.f32 %v9914_v39, %v4945_v49  ;;  %v9931_v25 = vadd.f32 %v9924_v9, %v5261_v5  ;;  %v5160_v43 = vsel %vm2026_vm1, %v5102_v17, %v5103_v3 }
 0x493   : > { %v5192_v24 = vadd.f32 %v5160_v43, %v9485_v52 }
 0x494   : > { %v9937_v58 = vadd.f32 %v9924_v9, %v5262_v8  ;;  %v5332_v42 = vmul.f32 %v9931_v25, %v9931_v25 }
 0x495   : > { %v5231_v2 = vmul.f32 %v9914_v39, %v5192_v24  ;;  %v6317_v46 = vpop.f32.mrb[4].mxu1 }
 0x496   : > { %v5333_v41 = vmul.f32 %v9937_v58, %v9937_v58  ;;  %v5364_v26 = vmul.f32 %v5332_v42, %v9931_v25  ;;  %v4301_v40 = vpop.f32.mrb[5].mxu1  ;;  %v5106_v35 = vrot.slane %v6317_v46, 1 }
 0x497   : > { %v9946_v1 = vadd.f32 %v9924_v9, %v5231_v2  ;;  %v5104_v60 = vrot.slane %v4301_v40, 1  ;;  %v6318_v52 = vpop.f32.mrb[6].mxu1 }
 0x498   : > { %v5365_v15 = vmul.f32 %v5333_v41, %v9937_v58  ;;  %v5396_v36 = vmul.f32 0.044715, %v5364_v26  ;;  %v5107_v61 = vrot.slane %v6318_v52, 1  ;;  %v4304_v32 = vpop.f32.mrb[7].mxu1 }
 0x499   : > { %v5302_v62 = vmul.f32 %v9946_v1, %v9946_v1  ;;  %v5159_v30 = vsel %vm2026_vm1, %v5103_v3, %v5104_v60  ;;  %v5105_v4 = vrot.slane %v4304_v32, 1 }
 0x49a   : > { %v5397_v50 = vmul.f32 0.044715, %v5365_v15  ;;  %v5428_v38 = vadd.f32 %v5396_v36, %v9931_v25  ;;  %v5163_v59 = vsel %vm333_vm3, %v5159_v30, 0.0  ;;  %v5156_v49 = vsel %vm2026_vm1, %v5106_v35, %v5107_v61 }
 0x49b   : > { %v5334_v5 = vmul.f32 %v5302_v62, %v9946_v1  ;;  %v5193_v17 = vadd.f32 %v5163_v59, %v9491_v22  ;;  %v5196_v53 = vadd.f32 %v5156_v49, %v9545_v55  ;;  %v5157_v8 = vsel %vm2026_vm1, %v5105_v4, %v5106_v35 }
 0x49c   : > { %v5429_v3 = vadd.f32 %v5397_v50, %v9937_v58  ;;  %v5460_v43 = vmul.f32 0.7978846, %v5428_v38  ;;  %v5158_v24 = vsel %vm2026_vm1, %v5104_v60, %v5105_v4  ;;  %v5165_v42 = vsel %vm333_vm3, %v5157_v8, 0.0 }
 0x49d   : > { %v5366_v2 = vmul.f32 0.044715, %v5334_v5  ;;  %v5232_v46 = vmul.f32 %v9914_v39, %v5193_v17  ;;  %v5235_v41 = vmul.f32 %v9914_v39, %v5196_v53  ;;  %v5194_v22 = vadd.f32 %v5158_v24, %v9515_v14  ;;  %v6321_v55 = vpop.f32.mrb[8].mxu1 }
 0x49e   : > { %v5461_v26 = vmul.f32 0.7978846, %v5429_v3  ;;  %6705 = vtanh.f32 %v5460_v43  ;;  %v5195_v40 = vadd.f32 %v5165_v42, %v9521_v28  ;;  %v5110_v52 = vrot.slane %v6321_v55, 1  ;;  %v4317_v15 = vpop.f32.mrb[9].mxu1 }
 0x49f   : > { %v5398_v36 = vadd.f32 %v5366_v2, %v9946_v1  ;;  %v9974_v60 = vadd.f32 %v9924_v9, %v5232_v46  ;;  %v9977_v35 = vadd.f32 %v9924_v9, %v5235_v41  ;;  %v5233_v32 = vmul.f32 %v9914_v39, %v5194_v22  ;;  %v9980_v62 = vpop.f32.mrb[10].mxu1 }
 0x4a0   : > { %6707 = vtanh.f32 %v5461_v26  ;;  %v5234_v14 = vmul.f32 %v9914_v39, %v5195_v40  ;;  %v5108_v30 = vrot.slane %v4317_v15, 1  ;;  %v5111_v28 = vrot.slane %v9980_v62, 1  ;;  %v4320_v4 = vpop.f32.mrb[11].mxu1 }
 0x4a1   : > { %v5430_v50 = vmul.f32 0.7978846, %v5398_v36  ;;  %v5303_v38 = vmul.f32 %v9974_v60, %v9974_v60  ;;  %v5306_v59 = vmul.f32 %v9977_v35, %v9977_v35  ;;  %v9989_v49 = vadd.f32 %v9924_v9, %v5233_v32 }
 0x4a2   : > { %v9992_v5 = vadd.f32 %v9924_v9, %v5234_v14  ;;  %v5155_v17 = vsel %vm2026_vm1, %v5107_v61, %v5108_v30  ;;  %v5152_v53 = vsel %vm2026_vm1, %v5110_v52, %v5111_v28  ;;  %v5109_v8 = vrot.slane %v4320_v4, 1 }
 0x4a3   : > { %6709 = vtanh.f32 %v5430_v50  ;;  %v5335_v3 = vmul.f32 %v5303_v38, %v9974_v60  ;;  %v5338_v43 = vmul.f32 %v5306_v59, %v9977_v35  ;;  %v5304_v24 = vmul.f32 %v9989_v49, %v9989_v49 }
 0x4a4   : > { %v5305_v42 = vmul.f32 %v9992_v5, %v9992_v5  ;;  %v5167_v61 = vsel %vm333_vm3, %v5155_v17, 0.0  ;;  %v5200_v2 = vadd.f32 %v5152_v53, %v9605_v37  ;;  %v5153_v46 = vsel %vm2026_vm1, %v5109_v8, %v5110_v52 }
 0x4a5   : > { %v5367_v41 = vmul.f32 0.044715, %v5335_v3  ;;  %v5370_v22 = vmul.f32 0.044715, %v5338_v43  ;;  %v5336_v55 = vmul.f32 %v5304_v24, %v9989_v49  ;;  %v5197_v26 = vadd.f32 %v5167_v61, %v9551_v23  ;;  %v10013_v40 = vpop.f32.mrb[12].mxu1 }
 0x4a6   : > { %v5337_v15 = vmul.f32 %v5305_v42, %v9992_v5  ;;  %v5239_v36 = vmul.f32 %v9914_v39, %v5200_v2  ;;  %v5154_v32 = vsel %vm2026_vm1, %v5108_v30, %v5109_v8  ;;  %v5169_v37 = vsel %vm333_vm3, %v5153_v46, 0.0  ;;  %v10021_v14 = vpop.f32.mrb[13].mxu1 }
 0x4a7   : > { %v5399_v52 = vadd.f32 %v5367_v41, %v9974_v60  ;;  %v5402_v4 = vadd.f32 %v5370_v22, %v9977_v35  ;;  %v5368_v50 = vmul.f32 0.044715, %v5336_v55  ;;  %v5236_v23 = vmul.f32 %v9914_v39, %v5197_v26  ;;  %v10026_v38 = vpop.f32.mrb[14].mxu1 }
 0x4a8   : > { %v6706_v59 = vpop.eup %6705  ;;  %v5369_v17 = vmul.f32 0.044715, %v5337_v15  ;;  %v10029_v53 = vadd.f32 %v9924_v9, %v5239_v36  ;;  %v5198_v30 = vadd.f32 %v5154_v32, %v9575_v33  ;;  %v5199_v8 = vadd.f32 %v5169_v37, %v9581_v20  ;;  %v10033_v3 = vpop.f32.mrb[15].mxu1 }
 0x4a9   : > { %v5524_v43 = vadd.f32 1.0, %v6706_v59  ;;  %v5431_v24 = vmul.f32 0.7978846, %v5399_v52  ;;  %v5434_v42 = vmul.f32 0.7978846, %v5402_v4  ;;  %v5400_v61 = vadd.f32 %v5368_v50, %v9989_v49 }
 0x4aa   : > { %v6708_v2 = vpop.eup %6707  ;;  %v5401_v46 = vadd.f32 %v5369_v17, %v9992_v5  ;;  %v10038_v41 = vadd.f32 %v9924_v9, %v5236_v23  ;;  %v5310_v22 = vmul.f32 %v10029_v53, %v10029_v53  ;;  %v5237_v33 = vmul.f32 %v9914_v39, %v5198_v30 }
 0x4ab   : > { %v5525_v55 = vadd.f32 1.0, %v6708_v2  ;;  %v5556_v20 = vmul.f32 0.5, %v5524_v43  ;;  %6711 = vtanh.f32 %v5431_v24  ;;  %v5432_v26 = vmul.f32 0.7978846, %v5400_v61 }
 0x4ac   : > { %6713 = vtanh.f32 %v5434_v42  ;;  %v5433_v15 = vmul.f32 0.7978846, %v5401_v46  ;;  %v5307_v36 = vmul.f32 %v10038_v41, %v10038_v41  ;;  %v5342_v32 = vmul.f32 %v5310_v22, %v10029_v53 }
 0x4ad   : > { %v6710_v37 = vpop.eup %6709  ;;  %v5557_v52 = vmul.f32 0.5, %v5525_v55  ;;  %v5588_v4 = vmul.f32 %v5556_v20, %v9931_v25  ;;  %6715 = vtanh.f32 %v5432_v26  ;;  %v5238_v50 = vmul.f32 %v9914_v39, %v5199_v8  ;;  %v10048_v23 = vpop.f32.mrb[16].mxu1 }
 0x4ae   : > { %v5494_v59 = vadd.f32 1.0, %v6710_v37  ;;  %6717 = vtanh.f32 %v5433_v15  ;;  %v5339_v17 = vmul.f32 %v5307_v36, %v10038_v41  ;;  %v5374_v30 = vmul.f32 0.044715, %v5342_v32  ;;  %v10051_v43 = vpop.f32.mrb[17].mxu1 }
 0x4af   : > { %v5589_v24 = vmul.f32 %v5557_v52, %v9937_v58  ;;  %v10055_v42 = vadd.f32 %v9924_v9, %v5237_v33  ;;  %v10058_v61 = vadd.f32 %v9924_v9, %v5238_v50  ;;  %v5114_v25 = vrot.slane %v10013_v40, 1  ;;  %v10061_v8 = vpop.f32.mrb[18].mxu1 }
 0x4b0   : > { %v5526_v2 = vmul.f32 0.5, %v5494_v59  ;;  %v5371_v46 = vmul.f32 0.044715, %v5339_v17  ;;  %v5406_v22 = vadd.f32 %v5374_v30, %v10029_v53  ;;  %v5112_v55 = vrot.slane %v10021_v14, 1  ;;  %v10065_v20 = vpop.f32.mrb[19].mxu1 }
 0x4b1   : > { %v6182_v58 = vpack.c.bf16 %v5589_v24, %v5588_v4  ;;  %v5308_v33 = vmul.f32 %v10055_v42, %v10055_v42  ;;  %v5309_v26 = vmul.f32 %v10058_v61, %v10058_v61  ;;  %v5115_v15 = vrot.slane %v10026_v38, 1 }
 0x4b2   : > { %v5558_v40 = vmul.f32 %v5526_v2, %v9946_v1  ;;  %v5403_v36 = vadd.f32 %v5371_v46, %v10038_v41  ;;  %v5438_v32 = vmul.f32 0.7978846, %v5406_v22  ;;  %v5151_v14 = vsel %vm2026_vm1, %v5111_v28, %v5112_v55 }
 0x4b3   : > { %6198 = vst [vmem:[%s10080_s12 + $0x78] sm:$0xff] %v6182_v58   ;;  %v5340_v37 = vmul.f32 %v5308_v33, %v10055_v42  ;;  %v5341_v52 = vmul.f32 %v5309_v26, %v10058_v61  ;;  %v5171_v1 = vsel %vm333_vm3, %v5151_v14, 0.0  ;;  %v5148_v62 = vsel %vm2026_vm1, %v5114_v25, %v5115_v15 }
 0x4b4   : > { %v5435_v4 = vmul.f32 0.7978846, %v5403_v36  ;;  %6719 = vtanh.f32 %v5438_v32  ;;  %v5201_v28 = vadd.f32 %v5171_v1, %v9611_v11  ;;  %v5204_v50 = vadd.f32 %v5148_v62, %v9665_v44 }
 0x4b5   : > { %v6712_v59 = vpop.eup %6711  ;;  %v5372_v17 = vmul.f32 0.044715, %v5340_v37  ;;  %v5373_v30 = vmul.f32 0.044715, %v5341_v52  ;;  %v5113_v24 = vrot.slane %v10033_v3, 1  ;;  %v10097_v26 = vpop.f32.mrb[20].mxu1 }
 0x4b6   : > { %v6714_v46 = vpop.eup %6713  ;;  %v5495_v22 = vadd.f32 1.0, %v6712_v59  ;;  %6721 = vtanh.f32 %v5435_v4  ;;  %v5240_v58 = vmul.f32 %v9914_v39, %v5201_v28  ;;  %v5243_v33 = vmul.f32 %v9914_v39, %v5204_v50  ;;  %v10103_v14 = vpop.f32.mrb[21].mxu1 }
 0x4b7   : > { %v6716_v36 = vpop.eup %6715  ;;  %v5498_v11 = vadd.f32 1.0, %v6714_v46  ;;  %v5404_v44 = vadd.f32 %v5372_v17, %v10055_v42  ;;  %v5405_v32 = vadd.f32 %v5373_v30, %v10058_v61  ;;  %v5149_v3 = vsel %vm2026_vm1, %v5113_v24, %v5114_v25  ;;  %v10111_v28 = vpop.f32.mrb[22].mxu1 }
 0x4b8   : > { %v6718_v37 = vpop.eup %6717  ;;  %v5527_v52 = vmul.f32 0.5, %v5495_v22  ;;  %v5496_v1 = vadd.f32 1.0, %v6716_v36  ;;  %v10106_v62 = vadd.f32 %v9924_v9, %v5240_v58  ;;  %v10109_v4 = vadd.f32 %v9924_v9, %v5243_v33  ;;  %v10118_v58 = vpop.f32.mrb[23].mxu1 }
 0x4b9   : > { %v5530_v50 = vmul.f32 0.5, %v5498_v11  ;;  %v5497_v59 = vadd.f32 1.0, %v6718_v37  ;;  %v5436_v17 = vmul.f32 0.7978846, %v5404_v44  ;;  %v5437_v30 = vmul.f32 0.7978846, %v5405_v32 }
 0x4ba   : > { %v5559_v46 = vmul.f32 %v5527_v52, %v9974_v60  ;;  %v5528_v25 = vmul.f32 0.5, %v5496_v1  ;;  %v5311_v2 = vmul.f32 %v10106_v62, %v10106_v62  ;;  %v5314_v22 = vmul.f32 %v10109_v4, %v10109_v4 }
 0x4bb   : > { %v10121_v33 = vmul.f32 %v5530_v50, %v9977_v35  ;;  %v5529_v36 = vmul.f32 0.5, %v5497_v59  ;;  %6723 = vtanh.f32 %v5436_v17  ;;  %v5150_v11 = vsel %vm2026_vm1, %v5112_v55, %v5113_v24 }
 0x4bc   : > { %v6107_v44 = vpack.c.bf16 %v5559_v46, %v5558_v40  ;;  %v5560_v60 = vmul.f32 %v5528_v25, %v9989_v49  ;;  %6725 = vtanh.f32 %v5437_v30  ;;  %v5343_v32 = vmul.f32 %v5311_v2, %v10106_v62 }
 0x4bd   : > { %v5561_v37 = vmul.f32 %v5529_v36, %v9992_v5  ;;  %v5346_v52 = vmul.f32 %v5314_v22, %v10109_v4  ;;  %v5173_v1 = vsel %vm333_vm3, %v5149_v3, 0.0  ;;  %v5202_v35 = vadd.f32 %v5150_v11, %v9635_v6  ;;  %v10132_v50 = vpop.f32.mrb[24].mxu1 }
 0x4be   : > { %v6720_v59 = vpop.eup %6719  ;;  %6108 = vst [vmem:[%s10080_s12] sm:$0xff] %v6107_v44   ;;  %v5375_v55 = vmul.f32 0.044715, %v5343_v32  ;;  %v5203_v49 = vadd.f32 %v5173_v1, %v9641_v48  ;;  %v5116_v40 = vrot.slane %v10051_v43, 1  ;;  %v5119_v24 = vrot.slane %v10061_v8, 1  ;;  %v10138_v5 = vpop.f32.mrb[25].mxu1 }
 0x4bf   : > { %v6112_v2 = vpack.c.bf16 %v5561_v37, %v5560_v60  ;;  %v5502_v17 = vadd.f32 1.0, %v6720_v59  ;;  %v5378_v30 = vmul.f32 0.044715, %v5346_v52  ;;  %v5241_v3 = vmul.f32 %v9914_v39, %v5202_v35  ;;  %v10141_v6 = vpop.f32.mrb[26].mxu1 }
 0x4c0   : > { %v6722_v46 = vpop.eup %6721  ;;  %v5407_v25 = vadd.f32 %v5375_v55, %v10106_v62  ;;  %v5242_v22 = vmul.f32 %v9914_v39, %v5203_v49  ;;  %v5147_v48 = vsel %vm2026_vm1, %v5115_v15, %v5116_v40  ;;  %v10895_v43 = vrot.slane %v10048_v23, 1  ;;  %v10155_v11 = vpop.f32.mrb[27].mxu1 }
 0x4c1   : > { %6184 = vst [vmem:[%s10080_s12 + $0x8] sm:$0xff] %v6112_v2   ;;  %v5499_v44 = vadd.f32 1.0, %v6722_v46  ;;  %v5534_v60 = vmul.f32 0.5, %v5502_v17  ;;  %v5410_v32 = vadd.f32 %v5378_v30, %v10109_v4  ;;  %v10160_v37 = vadd.f32 %v9924_v9, %v5241_v3 }
 0x4c2   : > { %v5144_v36 = vsel %vm2026_vm1, %v10895_v43, %v5119_v24  ;;  %v5439_v38 = vmul.f32 0.7978846, %v5407_v25  ;;  %v10163_v15 = vadd.f32 %v9924_v9, %v5242_v22  ;;  %v5175_v52 = vsel %vm333_vm3, %v5147_v48, 0.0 }
 0x4c3   : > { %v5208_v1 = vadd.f32 %v5144_v36, %v9725_v45  ;;  %v5531_v35 = vmul.f32 0.5, %v5499_v44  ;;  %v10169_v59 = vmul.f32 %v5534_v60, %v10029_v53  ;;  %v5442_v55 = vmul.f32 0.7978846, %v5410_v32 }
 0x4c4   : > { %v5312_v49 = vmul.f32 %v10160_v37, %v10160_v37  ;;  %6727 = vtanh.f32 %v5439_v38  ;;  %v5313_v2 = vmul.f32 %v10163_v15, %v10163_v15  ;;  %v5205_v17 = vadd.f32 %v5175_v52, %v9671_v10 }
 0x4c5   : > { %v5247_v30 = vmul.f32 %v9914_v39, %v5208_v1  ;;  %v6724_v3 = vpop.eup %6723  ;;  %v5563_v46 = vmul.f32 %v5531_v35, %v10038_v41  ;;  %6729 = vtanh.f32 %v5442_v55  ;;  %v5117_v53 = vrot.slane %v10065_v20, 1  ;;  %v10180_v25 = vpop.f32.mrb[28].mxu1 }
 0x4c6   : > { %v5344_v45 = vmul.f32 %v5312_v49, %v10160_v37  ;;  %v6726_v22 = vpop.eup %6725  ;;  %v5500_v48 = vadd.f32 1.0, %v6724_v3  ;;  %v5345_v43 = vmul.f32 %v5313_v2, %v10163_v15  ;;  %v5244_v36 = vmul.f32 %v9914_v39, %v5205_v17  ;;  %v10187_v44 = vpop.f32.mrb[29].mxu1 }
 0x4c7   : > { %v10185_v10 = vadd.f32 %v9924_v9, %v5247_v30  ;;  %v6117_v41 = vpack.c.bf16 %v5563_v46, %v10121_v33  ;;  %v5501_v60 = vadd.f32 1.0, %v6726_v22  ;;  %v10896_v20 = vrot.slane %v10048_v23, 1  ;;  %v10194_v52 = vpop.f32.mrb[30].mxu1 }
 0x4c8   : > { %v5376_v32 = vmul.f32 0.044715, %v5344_v45  ;;  %v5532_v1 = vmul.f32 0.5, %v5500_v48  ;;  %v5377_v35 = vmul.f32 0.044715, %v5345_v43  ;;  %v10197_v55 = vadd.f32 %v9924_v9, %v5244_v36  ;;  %v10201_v2 = vpop.f32.mrb[31].mxu1 }
 0x4c9   : > { %v5145_v38 = vsel %vm2026_vm1, %v5117_v53, %v10896_v20  ;;  %v5318_v49 = vmul.f32 %v10185_v10, %v10185_v10  ;;  %6185 = vst [vmem:[%s10080_s12 + $0x10] sm:$0xff] %v6117_v41   ;;  %v5533_v33 = vmul.f32 0.5, %v5501_v60  ;;  %v5146_v23 = vsel %vm2026_vm1, %v5116_v40, %v5117_v53 }
 0x4ca   : > { %v5408_v17 = vadd.f32 %v5376_v32, %v10160_v37  ;;  %v5177_v30 = vsel %vm333_vm3, %v5145_v38, 0.0  ;;  %v5564_v3 = vmul.f32 %v5532_v1, %v10055_v42  ;;  %v5409_v46 = vadd.f32 %v5377_v35, %v10163_v15 }
 0x4cb   : > { %v5315_v45 = vmul.f32 %v10197_v55, %v10197_v55  ;;  %v5350_v22 = vmul.f32 %v5318_v49, %v10185_v10  ;;  %v5565_v48 = vmul.f32 %v5533_v33, %v10058_v61  ;;  %v5206_v36 = vadd.f32 %v5146_v23, %v9695_v47 }
 0x4cc   : > { %v5440_v43 = vmul.f32 0.7978846, %v5408_v17  ;;  %v5207_v40 = vadd.f32 %v5177_v30, %v9701_v18  ;;  %v5441_v53 = vmul.f32 0.7978846, %v5409_v46  ;;  %v5122_v42 = vrot.slane %v10097_v26, 1 }
 0x4cd   : > { %v5347_v41 = vmul.f32 %v5315_v45, %v10197_v55  ;;  %v5382_v60 = vmul.f32 0.044715, %v5350_v22  ;;  %v6122_v32 = vpack.c.bf16 %v5565_v48, %v5564_v3  ;;  %v5245_v20 = vmul.f32 %v9914_v39, %v5206_v36 }
 0x4ce   : > { %6731 = vtanh.f32 %v5440_v43  ;;  %v5246_v38 = vmul.f32 %v9914_v39, %v5207_v40  ;;  %v6728_v1 = vpop.eup %6727  ;;  %v5120_v35 = vrot.slane %v10103_v14, 1  ;;  %v5123_v17 = vrot.slane %v10111_v28, 1 }
 0x4cf   : > { %6733 = vtanh.f32 %v5441_v53  ;;  %v5379_v61 = vmul.f32 0.044715, %v5347_v41  ;;  %v5414_v47 = vadd.f32 %v5382_v60, %v10185_v10  ;;  %v6730_v18 = vpop.eup %6729  ;;  %6186 = vst [vmem:[%s10080_s12 + $0x18] sm:$0xff] %v6122_v32   ;;  %v5503_v49 = vadd.f32 1.0, %v6728_v1 }
 0x4d0   : > { %v10225_v33 = vadd.f32 %v9924_v9, %v5245_v20  ;;  %v10228_v26 = vadd.f32 %v9924_v9, %v5246_v38  ;;  %v5506_v23 = vadd.f32 1.0, %v6730_v18  ;;  %v5143_v14 = vsel %vm2026_vm1, %v5119_v24, %v5120_v35 }
 0x4d1   : > { %v5411_v30 = vadd.f32 %v5379_v61, %v10197_v55  ;;  %v5446_v3 = vmul.f32 0.7978846, %v5414_v47  ;;  %v5535_v46 = vmul.f32 0.5, %v5503_v49  ;;  %v5179_v48 = vsel %vm333_vm3, %v5143_v14, 0.0 }
 0x4d2   : > { %v5316_v45 = vmul.f32 %v10225_v33, %v10225_v33  ;;  %v5317_v22 = vmul.f32 %v10228_v26, %v10228_v26  ;;  %v5538_v28 = vmul.f32 0.5, %v5506_v23  ;;  %v5209_v36 = vadd.f32 %v5179_v48, %v9731_v51 }
 0x4d3   : > { %v5443_v43 = vmul.f32 0.7978846, %v5411_v30  ;;  %6735 = vtanh.f32 %v5446_v3  ;;  %v5567_v8 = vmul.f32 %v5535_v46, %v10106_v62  ;;  %v5140_v53 = vsel %vm2026_vm1, %v5122_v42, %v5123_v17 }
 0x4d4   : > { %v5348_v40 = vmul.f32 %v5316_v45, %v10225_v33  ;;  %v5349_v24 = vmul.f32 %v5317_v22, %v10228_v26  ;;  %v5101_v41 = vrot.slane %v9917_v63, 1  ;;  %v5248_v60 = vmul.f32 %v9914_v39, %v5209_v36 }
 0x4d5   : > { %6737 = vtanh.f32 %v5443_v43  ;;  %v5212_v32 = vadd.f32 %v5140_v53, %v9785_v13  ;;  %v6127_v20 = vpack.c.bf16 %v5567_v8, %v10169_v59  ;;  %v5121_v62 = vrot.slane %v10118_v58, 1 }
 0x4d6   : > { %v5380_v51 = vmul.f32 0.044715, %v5348_v40  ;;  %v5381_v38 = vmul.f32 0.044715, %v5349_v24  ;;  %v10254_v1 = vmul.f32 %v5538_v28, %v10109_v4  ;;  %v10257_v61 = vadd.f32 %v9924_v9, %v5248_v60 }
 0x4d7   : > { %v5251_v47 = vmul.f32 %v9914_v39, %v5212_v32  ;;  %v5124_v18 = vrot.slane %v10138_v5, 1  ;;  %6187 = vst [vmem:[%s10080_s12 + $0x20] sm:$0xff] %v6127_v20   ;;  %v5141_v23 = vsel %vm2026_vm1, %v5121_v62, %v5122_v42  ;;  %v5142_v4 = vsel %vm2026_vm1, %v5120_v35, %v5121_v62 }
 0x4d8   : > { %v6732_v49 = vpop.eup %6731  ;;  %v5412_v13 = vadd.f32 %v5380_v51, %v10225_v33  ;;  %v5413_v59 = vadd.f32 %v5381_v38, %v10228_v26  ;;  %v5319_v3 = vmul.f32 %v10257_v61, %v10257_v61  ;;  %v5181_v46 = vsel %vm333_vm3, %v5141_v23, 0.0 }
 0x4d9   : > { %v6734_v58 = vpop.eup %6733  ;;  %v5504_v30 = vadd.f32 1.0, %v6732_v49  ;;  %v10271_v14 = vadd.f32 %v9924_v9, %v5251_v47  ;;  %v5210_v28 = vadd.f32 %v5142_v4, %v9755_v12  ;;  %v5211_v36 = vadd.f32 %v5181_v46, %v9761_v29 }
 0x4da   : > { %v5505_v45 = vadd.f32 1.0, %v6734_v58  ;;  %v5444_v22 = vmul.f32 0.7978846, %v5412_v13  ;;  %v5445_v48 = vmul.f32 0.7978846, %v5413_v59  ;;  %v5351_v43 = vmul.f32 %v5319_v3, %v10257_v61 }
 0x4db   : > { %v5536_v42 = vmul.f32 0.5, %v5504_v30  ;;  %v5322_v35 = vmul.f32 %v10271_v14, %v10271_v14  ;;  %v5249_v40 = vmul.f32 %v9914_v39, %v5210_v28  ;;  %v5139_v24 = vsel %vm2026_vm1, %v5123_v17, %v5124_v18 }
 0x4dc   : > { %v5537_v8 = vmul.f32 0.5, %v5505_v45  ;;  %6739 = vtanh.f32 %v5444_v22  ;;  %v5383_v60 = vmul.f32 0.044715, %v5351_v43  ;;  %v5250_v29 = vmul.f32 %v9914_v39, %v5211_v36 }
 0x4dd   : > { %v6736_v53 = vpop.eup %6735  ;;  %v5568_v12 = vmul.f32 %v5536_v42, %v10160_v37  ;;  %6741 = vtanh.f32 %v5445_v48  ;;  %v5354_v32 = vmul.f32 %v5322_v35, %v10271_v14  ;;  %v10290_v38 = vadd.f32 %v9924_v9, %v5249_v40 }
 0x4de   : > { %v5569_v20 = vmul.f32 %v5537_v8, %v10163_v15  ;;  %v5510_v51 = vadd.f32 1.0, %v6736_v53  ;;  %v5415_v47 = vadd.f32 %v5383_v60, %v10257_v61  ;;  %v5183_v37 = vsel %vm333_vm3, %v5139_v24, 0.0 }
 0x4df   : > { %v6738_v62 = vpop.eup %6737  ;;  %v5386_v17 = vmul.f32 0.044715, %v5354_v32  ;;  %v5127_v49 = vrot.slane %v10141_v6, 1  ;;  %v10297_v15 = vadd.f32 %v9924_v9, %v5250_v29  ;;  %v5126_v23 = vrot.slane %v10132_v50, 1 }
 0x4e0   : > { %v6132_v13 = vpack.c.bf16 %v5569_v20, %v5568_v12  ;;  %v5507_v59 = vadd.f32 1.0, %v6738_v62  ;;  %v5447_v4 = vmul.f32 0.7978846, %v5415_v47  ;;  %v5320_v30 = vmul.f32 %v10290_v38, %v10290_v38 }
 0x4e1   : > { %v5418_v58 = vadd.f32 %v5386_v17, %v10271_v14  ;;  %v5213_v3 = vadd.f32 %v5183_v37, %v9791_v21  ;;  %v10305_v45 = vmul.f32 0.5, %v5510_v51  ;;  %v5321_v22 = vmul.f32 %v10297_v15, %v10297_v15 }
 0x4e2   : > { %6188 = vst [vmem:[%s10080_s12 + $0x28] sm:$0xff] %v6132_v13   ;;  %v5539_v46 = vmul.f32 0.5, %v5507_v59  ;;  %v5136_v50 = vsel %vm2026_vm1, %v5126_v23, %v5127_v49  ;;  %6743 = vtanh.f32 %v5447_v4  ;;  %v5352_v28 = vmul.f32 %v5320_v30, %v10290_v38 }
 0x4e3   : > { %v5450_v48 = vmul.f32 0.7978846, %v5418_v58  ;;  %v5252_v42 = vmul.f32 %v9914_v39, %v5213_v3  ;;  %v5353_v43 = vmul.f32 %v5321_v22, %v10297_v15  ;;  %v5216_v35 = vadd.f32 %v5136_v50, %v9845_v7 }
 0x4e4   : > { %v5571_v21 = vmul.f32 %v5539_v46, %v10197_v55  ;;  %v5125_v36 = vrot.slane %v10155_v11, 1  ;;  %v5384_v8 = vmul.f32 0.044715, %v5352_v28  ;;  %v5130_v24 = vrot.slane %v10180_v25, 1 }
 0x4e5   : > { %6745 = vtanh.f32 %v5450_v48  ;;  %v10320_v40 = vadd.f32 %v9924_v9, %v5252_v42  ;;  %v5385_v60 = vmul.f32 0.044715, %v5353_v43  ;;  %v5255_v55 = vmul.f32 %v9914_v39, %v5216_v35 }
 0x4e6   : > { %v6740_v53 = vpop.eup %6739  ;;  %v6137_v12 = vpack.c.bf16 %v5571_v21, %v10254_v1  ;;  %v5137_v32 = vsel %vm2026_vm1, %v5125_v36, %v5126_v23  ;;  %v5416_v11 = vadd.f32 %v5384_v8, %v10290_v38  ;;  %v5138_v29 = vsel %vm2026_vm1, %v5124_v18, %v5125_v36 }
 0x4e7   : > { %v6742_v7 = vpop.eup %6741  ;;  %v5508_v20 = vadd.f32 1.0, %v6740_v53  ;;  %v5323_v51 = vmul.f32 %v10320_v40, %v10320_v40  ;;  %v5417_v62 = vadd.f32 %v5385_v60, %v10297_v15  ;;  %v10337_v47 = vadd.f32 %v9924_v9, %v5255_v55 }
 0x4e8   : > { %6189 = vst [vmem:[%s10080_s12 + $0x30] sm:$0xff] %v6137_v12   ;;  %v5509_v1 = vadd.f32 1.0, %v6742_v7  ;;  %v5185_v17 = vsel %vm333_vm3, %v5137_v32, 0.0  ;;  %v5448_v13 = vmul.f32 0.7978846, %v5416_v11  ;;  %v5214_v23 = vadd.f32 %v5138_v29, %v9815_v34 }
 0x4e9   : > { %v5540_v37 = vmul.f32 0.5, %v5508_v20  ;;  %v5355_v59 = vmul.f32 %v5323_v51, %v10320_v40  ;;  %v5449_v4 = vmul.f32 0.7978846, %v5417_v62  ;;  %v5326_v18 = vmul.f32 %v10337_v47, %v10337_v47 }
 0x4ea   : > { %v5541_v5 = vmul.f32 0.5, %v5509_v1  ;;  %v5215_v58 = vadd.f32 %v5185_v17, %v9821_v16  ;;  %6747 = vtanh.f32 %v5448_v13  ;;  %v5253_v46 = vmul.f32 %v9914_v39, %v5214_v23 }
 0x4eb   : > { %v5572_v30 = vmul.f32 %v5540_v37, %v10225_v33  ;;  %v5387_v3 = vmul.f32 0.044715, %v5355_v59  ;;  %6749 = vtanh.f32 %v5449_v4  ;;  %v5358_v50 = vmul.f32 %v5326_v18, %v10337_v47 }
 0x4ec   : > { %v5573_v22 = vmul.f32 %v5541_v5, %v10228_v26  ;;  %v5254_v34 = vmul.f32 %v9914_v39, %v5215_v58  ;;  %v6744_v48 = vpop.eup %6743  ;;  %v10353_v42 = vadd.f32 %v9924_v9, %v5253_v46  ;;  %v5128_v16 = vrot.slane %v10187_v44, 1 }
 0x4ed   : > { %v5419_v28 = vadd.f32 %v5387_v3, %v10320_v40  ;;  %v5131_v33 = vrot.slane %v10194_v52, 1  ;;  %v5511_v43 = vadd.f32 1.0, %v6744_v48  ;;  %v5390_v35 = vmul.f32 0.044715, %v5358_v50 }
 0x4ee   : > { %v6142_v21 = vpack.c.bf16 %v5573_v22, %v5572_v30  ;;  %v10358_v26 = vadd.f32 %v9924_v9, %v5254_v34  ;;  %v5324_v53 = vmul.f32 %v10353_v42, %v10353_v42  ;;  %v5135_v12 = vsel %vm2026_vm1, %v5127_v49, %v5128_v16 }
 0x4ef   : > { %v6746_v36 = vpop.eup %6745  ;;  %v5451_v8 = vmul.f32 0.7978846, %v5419_v28  ;;  %v5132_v44 = vsel %vm2026_vm1, %v5130_v24, %v5131_v33  ;;  %v5543_v52 = vmul.f32 0.5, %v5511_v43  ;;  %v5187_v6 = vsel %vm333_vm3, %v5135_v12, 0.0 }
 0x4f0   : > { %6190 = vst [vmem:[%s10080_s12 + $0x38] sm:$0xff] %v6142_v21   ;;  %v5514_v60 = vadd.f32 1.0, %v6746_v36  ;;  %v5325_v55 = vmul.f32 %v10358_v26, %v10358_v26  ;;  %v5356_v32 = vmul.f32 %v5324_v53, %v10353_v42  ;;  %v5161_v49 = vsel %vm2026_vm1, %v5131_v33, %v5101_v41 }
 0x4f1   : > { %6751 = vtanh.f32 %v5451_v8  ;;  %v5574_v7 = vmul.f32 %v10305_v45, %v10185_v10  ;;  %v5575_v20 = vmul.f32 %v5543_v52, %v10257_v61  ;;  %v5422_v11 = vadd.f32 %v5390_v35, %v10337_v47 }
 0x4f2   : > { %v5357_v51 = vmul.f32 %v5325_v55, %v10358_v26  ;;  %v5388_v29 = vmul.f32 0.044715, %v5356_v32  ;;  %v5217_v1 = vadd.f32 %v5187_v6, %v9851_v56  ;;  %v5191_v62 = vsel %vm333_vm3, %v5161_v49, 0.0 }
 0x4f3   : > { %v5220_v63 = vadd.f32 %v5132_v44, %v9909_v54  ;;  %v6147_v17 = vpack.c.bf16 %v5575_v20, %v5574_v7  ;;  %v5546_v41 = vmul.f32 0.5, %v5514_v60  ;;  %v5221_v45 = vadd.f32 %v5191_v62, %v9926_v31 }
 0x4f4   : > { %v5389_v37 = vmul.f32 0.044715, %v5357_v51  ;;  %v6748_v13 = vpop.eup %6747  ;;  %v5420_v10 = vadd.f32 %v5388_v29, %v10353_v42  ;;  %v5256_v61 = vmul.f32 %v9914_v39, %v5217_v1  ;;  %v5454_v5 = vmul.f32 0.7978846, %v5422_v11 }
 0x4f5   : > { %v5259_v59 = vmul.f32 %v9914_v39, %v5220_v63  ;;  %v6750_v23 = vpop.eup %6749  ;;  %6191 = vst [vmem:[%s10080_s12 + $0x40] sm:$0xff] %v6147_v17   ;;  %v5512_v56 = vadd.f32 1.0, %v6748_v13  ;;  %v5129_v54 = vrot.slane %v10201_v2, 1  ;;  %v5260_v3 = vmul.f32 %v9914_v39, %v5221_v45 }
 0x4f6   : > { %v5421_v4 = vadd.f32 %v5389_v37, %v10358_v26  ;;  %v5513_v18 = vadd.f32 1.0, %v6750_v23  ;;  %v5452_v58 = vmul.f32 0.7978846, %v5420_v10  ;;  %v10397_v30 = vadd.f32 %v9924_v9, %v5256_v61 }
 0x4f7   : > { %v5544_v46 = vmul.f32 0.5, %v5512_v56  ;;  %v10401_v31 = vadd.f32 %v9924_v9, %v5259_v59  ;;  %v5133_v50 = vsel %vm2026_vm1, %v5129_v54, %v5130_v24  ;;  %v10410_v48 = vadd.f32 %v9924_v9, %v5260_v3 }
 0x4f8   : > { %v5453_v22 = vmul.f32 0.7978846, %v5421_v4  ;;  %v5545_v34 = vmul.f32 0.5, %v5513_v18  ;;  %6753 = vtanh.f32 %v5452_v58  ;;  %v5327_v2 = vmul.f32 %v10397_v30, %v10397_v30 }
 0x4f9   : > { %v5576_v28 = vmul.f32 %v5544_v46, %v10290_v38  ;;  %v5330_v33 = vmul.f32 %v10401_v31, %v10401_v31  ;;  %v5134_v25 = vsel %vm2026_vm1, %v5128_v16, %v5129_v54  ;;  %v5331_v35 = vmul.f32 %v10410_v48, %v10410_v48 }
 0x4fa   : > { %6755 = vtanh.f32 %v5453_v22  ;;  %v5577_v24 = vmul.f32 %v5545_v34, %v10297_v15  ;;  %v5359_v43 = vmul.f32 %v5327_v2, %v10397_v30  ;;  %v5189_v36 = vsel %vm333_vm3, %v5133_v50, 0.0 }
 0x4fb   : > { %v6752_v21 = vpop.eup %6751  ;;  %v5362_v8 = vmul.f32 %v5330_v33, %v10401_v31  ;;  %v5218_v53 = vadd.f32 %v5134_v25, %v9875_v57  ;;  %v5219_v27 = vadd.f32 %v5189_v36, %v9881_v19  ;;  %6757 = vtanh.f32 %v5454_v5 }
 0x4fc   : > { %v5515_v38 = vadd.f32 1.0, %v6752_v21  ;;  %v6152_v16 = vpack.c.bf16 %v5577_v24, %v5576_v28  ;;  %v5391_v12 = vmul.f32 0.044715, %v5359_v43  ;;  %v5363_v15 = vmul.f32 %v5331_v35, %v10410_v48 }
 0x4fd   : > { %v5394_v52 = vmul.f32 0.044715, %v5362_v8  ;;  %v5257_v60 = vmul.f32 %v9914_v39, %v5218_v53  ;;  %v5258_v55 = vmul.f32 %v9914_v39, %v5219_v27  ;;  %v5578_v0 = vmul.f32 %v5546_v41, %v10271_v14 }
 0x4fe   : > { %v5547_v44 = vmul.f32 0.5, %v5515_v38  ;;  %6192 = vst [vmem:[%s10080_s12 + $0x48] sm:$0xff] %v6152_v16   ;;  %v5423_v32 = vadd.f32 %v5391_v12, %v10397_v30  ;;  %v5395_v57 = vmul.f32 0.044715, %v5363_v15 }
 0x4ff   : > { %v5426_v6 = vadd.f32 %v5394_v52, %v10401_v31  ;;  %v5296_v49 = vadd.f32 %v9924_v9, %v5257_v60  ;;  %v5297_v7 = vadd.f32 %v9924_v9, %v5258_v55 }
 0x500   : > { %v5579_v19 = vmul.f32 %v5547_v44, %v10320_v40  ;;  %v5455_v20 = vmul.f32 0.7978846, %v5423_v32  ;;  %v5427_v11 = vadd.f32 %v5395_v57, %v10410_v48 }
 0x501   : > { %v5458_v39 = vmul.f32 0.7978846, %v5426_v6  ;;  %v5328_v29 = vmul.f32 %v5296_v49, %v5296_v49  ;;  %v5329_v14 = vmul.f32 %v5297_v7, %v5297_v7 }
 0x502   : > { %v6157_v51 = vpack.c.bf16 %v5579_v19, %v5578_v0  ;;  %v6754_v1 = vpop.eup %6753  ;;  %6759 = vtanh.f32 %v5455_v20  ;;  %v5459_v62 = vmul.f32 0.7978846, %v5427_v11 }
 0x503   : > { %v5516_v17 = vadd.f32 1.0, %v6754_v1  ;;  %6761 = vtanh.f32 %v5458_v39  ;;  %v5360_v40 = vmul.f32 %v5328_v29, %v5296_v49  ;;  %v5361_v41 = vmul.f32 %v5329_v14, %v5297_v7 }
 0x504   : > { %v6756_v63 = vpop.eup %6755  ;;  %6193 = vst [vmem:[%s10080_s12 + $0x50] sm:$0xff] %v6157_v51   ;;  %6763 = vtanh.f32 %v5459_v62 }
 0x505   : > { %v5517_v37 = vadd.f32 1.0, %v6756_v63  ;;  %v5548_v9 = vmul.f32 0.5, %v5516_v17  ;;  %v5392_v13 = vmul.f32 0.044715, %v5360_v40  ;;  %v5393_v10 = vmul.f32 0.044715, %v5361_v41  ;;  %v6758_v61 = vpop.eup %6757 }
 0x506   : > { %v5518_v4 = vadd.f32 1.0, %v6758_v61 }
 0x507   : > { %v5549_v45 = vmul.f32 0.5, %v5517_v37  ;;  %v5580_v59 = vmul.f32 %v5548_v9, %v10353_v42  ;;  %v5424_v23 = vadd.f32 %v5392_v13, %v5296_v49  ;;  %v5425_v56 = vadd.f32 %v5393_v10, %v5297_v7 }
 0x508   : > { %v5550_v22 = vmul.f32 0.5, %v5518_v4 }
 0x509   : > { %v5581_v5 = vmul.f32 %v5549_v45, %v10358_v26  ;;  %v5456_v54 = vmul.f32 0.7978846, %v5424_v23  ;;  %v5457_v18 = vmul.f32 0.7978846, %v5425_v56 }
 0x50a   : > { %v5582_v26 = vmul.f32 %v5550_v22, %v10337_v47 }
 0x50b   : > { %v6162_v58 = vpack.c.bf16 %v5581_v5, %v5580_v59  ;;  %6765 = vtanh.f32 %v5456_v54 }
 0x50c   : > { %v6760_v3 = vpop.eup %6759  ;;  %6767 = vtanh.f32 %v5457_v18 }
 0x50d   : > { %6194 = vst [vmem:[%s10080_s12 + $0x58] sm:$0xff] %v6162_v58   ;;  %v6762_v46 = vpop.eup %6761  ;;  %v5519_v50 = vadd.f32 1.0, %v6760_v3 }
 0x50e   : > { %v6764_v34 = vpop.eup %6763  ;;  %v5522_v2 = vadd.f32 1.0, %v6762_v46 }
 0x50f   : > { %v5551_v42 = vmul.f32 0.5, %v5519_v50  ;;  %v5523_v28 = vadd.f32 1.0, %v6764_v34 }
 0x510   : > { %v5554_v33 = vmul.f32 0.5, %v5522_v2 }
 0x511   : > { %v5583_v25 = vmul.f32 %v5551_v42, %v10397_v30  ;;  %v5555_v21 = vmul.f32 0.5, %v5523_v28 }
 0x512   : > { %v5586_v24 = vmul.f32 %v5554_v33, %v10401_v31 }
 0x513   : > { %v6167_v43 = vpack.c.bf16 %v5583_v25, %v5582_v26  ;;  %v5587_v35 = vmul.f32 %v5555_v21, %v10410_v48 }
 0x515   : > { %v6766_v36 = vpop.eup %6765  ;;  %6195 = vst [vmem:[%s10080_s12 + $0x60] sm:$0xff] %v6167_v43   ;;  %v6177_v38 = vpack.c.bf16 %v5587_v35, %v5586_v24 }
 0x516   : > { %v6768_v8 = vpop.eup %6767  ;;  %v5520_v53 = vadd.f32 1.0, %v6766_v36 }
 0x517   : > { %6197 = vst [vmem:[%s10080_s12 + $0x70] sm:$0xff] %v6177_v38   ;;  %v5521_v27 = vadd.f32 1.0, %v6768_v8 }
 0x518   : > { %v5552_v47 = vmul.f32 0.5, %v5520_v53 }
 0x519   : > { %v5553_v16 = vmul.f32 0.5, %v5521_v27 }
 0x51a   : > { %v5584_v30 = vmul.f32 %v5552_v47, %v5296_v49 }
 0x51b   : > { %v5585_v12 = vmul.f32 %v5553_v16, %v5297_v7 }
 0x51d   : > { %v6172_v31 = vpack.c.bf16 %v5585_v12, %v5584_v30 }
 0x51f   : > { %6196 = vst [vmem:[%s10080_s12 + $0x68] sm:$0xff] %v6172_v31  }
 0x520   : > { %6868 = shalt.err (!%p6865_p2)
}
 0x521   : > { %s6869_s10 = scalar_lea.hbm %s10452_s30, 2048  ;;  %s6873_s12 = scalar_lea.hbm %s10506_s7, 4096 }
 0x522   : > { %p6870_p13 = scmp.ne.s32.totalorder %s10452_s30, %s6869_s10  ;;  %p6874_p4 = scmp.lt.u32.totalorder %s10452_s30, %s10506_s7 }
 0x523   : > { %p6875_p5 = scmp.lt.u32.totalorder %s6873_s12, %s6869_s10  ;;  %p6877_p11 = scmp.lt.u32.totalorder %s6869_s10, %s10452_s30 }
 0x524   : > { %p6871_p6 = pnand %p6870_p13, %p10897_p0 }
 0x525   : > { %p6876_p8 = por %p6875_p5, %p6874_p4 }
 0x526   : > { %p6872_p10 = pneg %p6871_p6 }
 0x527   : > { %p6878_p1 = por %p6877_p11, %p6876_p8 }
 0x529   : > { %p6879_p3 = pnand %p6878_p1, %p6872_p10 }
 0x52b   : > { %6882 = shalt.err (!%p6879_p3)
}
 0x52c   : > { %s6936_s21 = smov 64   ;;  %s6937_s20 = smov 4  }
 0x52d   : > { %6353 = dma.vmem_to_hbm [thread:$0]  (%p10897_p0), %s10454_s29, 2048, %s10452_s30, %s5751_s9, %s6936_s21, %s6936_s21, %s6937_s20  }
 0x52e PF: > { %s5779_s28 = sand.u32 1, %s6913_s24   ;;  %p10898_p7 = scmp.ne.s32.totalorder %s10533_s8, 0 }
 0x52f   : > { %p10899_p9 = scmp.ge.s32.totalorder %s6925_s27, 2  ;;  %s5780_s11 = scalar_lea.sflag [#allocation4], %s5779_s28 }
 0x531   : > { %p6367_p12 = pnand %p10899_p9, %p10898_p7 }
 0x533   : > { %6908 = dma.done.wait (!%p6367_p12), %s5780_s11, 2048  }
 0x534   : > { %6910 = vsyncadd (!%p6367_p12), %s5780_s11, 4294965248  ;;  %p21_p2 = scmp.ge.s32.totalorder %s7088_s13, 4   ;;  %s10900_s24 = smov %s6917_s25 }
 0x535   : > { %s10901_s25 = smov %s6921_s26  ;;  %s10902_s26 = smov %s7104_s17 }
 0x536   : > { %s10903_s27 = smov %s7088_s13  ;;  %23 = sbr.rel (!%p21_p2) target bundleno = 6 (0x6), region = 101 }
 0x53d   :  { %5785 = vsyncpa [#allocation3], 1 }
 0x53e   :  { %5787 = vsyncpa [#allocation3 + $0x1], 1 }
 0x53f   :  { %5788 = vsyncpa [#allocation6], 1 }
 0x540   :  { %5789 = vsyncpa [#allocation4], 1 }
 0x541   :  { %5791 = vsyncpa [#allocation4 + $0x1], 1 }

</bundles_post_ra>
